<compile_context>
chip_gen: v7x
topology: tpu7x:2x2x1
jax: 0.10.0
libtpu: 0.0.40
codegen_flags: <defaults>
</compile_context>

<pallas_src>
import numpy as np

import jax
import jax.numpy as jnp
from jax.experimental import pallas as pl
from jax.experimental.pallas import tpu as pltpu


# ----------------------------- kernel ----------------------------------------
def _shifted_rows(a, zrow, H):
    """a: (Bblk, H, L). Returns (Bblk, H, 3L) = [row h-1 | row h | row h+1]
    per output row, zero-padded at the image top/bottom.  All pieces are full
    lane-width, so the lane concats are 128-aligned."""
    up = jnp.concatenate([zrow, a[:, :H - 1]], axis=1)    # input row h-1 (ky=0)
    down = jnp.concatenate([a[:, 1:], zrow], axis=1)      # input row h+1 (ky=2)
    return jnp.concatenate([up, a, down], axis=-1)


def _se_block_kernel(
    x_ref,      # (Bblk, H, W*Cin)        lane-dense input, bf16
    w1sc_ref,   # (3*W*Cin, 2*W*Cout)     [conv1 band | 1x1-shortcut band], bf16
    w2_ref,     # (3*W*Cout, W*Cout)      conv2 band weight, bf16
    fc1_ref,    # (W*Cout, Chid)          SE squeeze FC with avg-pool folded in
    fc2_ref,    # (Chid, Cout)            SE excite FC (transposed)
    rep_ref,    # (Cout, W*Cout)          lane-replication matrix for the SE gate
    bias_ref,   # (8, W*Cout)             packed tiled biases [b1, b2, bsc, 0...]
    o_ref,      # (Bblk, H, W*Cout)       lane-dense output, f32
):
    Bblk, H, WCin = x_ref.shape
    WCout = o_ref.shape[2]

    bias = bias_ref[...]
    b1, b2, bsc = bias[0:1], bias[1:2], bias[2:3]          # (1, W*Cout) each

    # ---- conv1 (3x3, pad=1) + 1x1 shortcut: ONE banded row matmul -----------
    x = x_ref[...]                                         # bf16
    zin = jnp.zeros((Bblk, 1, WCin), x.dtype)
    rows1 = _shifted_rows(x, zin, H).reshape(Bblk * H, 3 * WCin)
    both = jnp.dot(rows1, w1sc_ref[...],
                   preferred_element_type=jnp.float32)     # (Bblk*H, 2*W*Cout)

    # 128-aligned column split (W*Cout is a multiple of 128 at these sizes).
    out1 = jnp.maximum(both[:, :WCout] + b1, 0.0)          # conv1+BN1+ReLU
    sc = both[:, WCout:] + bsc                             # shortcut+BNsc

    # ---- conv2 (3x3, pad=1) + BN2: banded row matmul -------------------------
    out1_3d = out1.reshape(Bblk, H, WCout)
    zc = jnp.zeros((Bblk, 1, WCout), jnp.float32)
    rows2 = _shifted_rows(out1_3d, zc, H).reshape(Bblk * H, 3 * WCout)
    rows2 = rows2.astype(jnp.bfloat16)
    out2 = jnp.dot(rows2, w2_ref[...],
                   preferred_element_type=jnp.float32) + b2  # (Bblk*H, W*Cout)

    # ---- SE attention --------------------------------------------------------
    out2_3d = out2.reshape(Bblk, H, WCout)
    hsum = jnp.sum(out2_3d, axis=1)                        # (Bblk, W*Cout)
    # fc1_ref already contains the 1/(H*W) pool + channel gather: one tiny dot.
    y = jnp.maximum(jnp.dot(hsum, fc1_ref[...],
                            preferred_element_type=jnp.float32), 0.0)
    y = jax.nn.sigmoid(jnp.dot(y, fc2_ref[...],
                               preferred_element_type=jnp.float32))  # (Bblk, Cout)
    # Broadcast the per-channel gate to the lane-dense layout via a tiny matmul
    # (avoids W non-128-aligned lane concats).
    y_ld = jnp.dot(y, rep_ref[...],
                   preferred_element_type=jnp.float32)     # (Bblk, W*Cout)

    # ---- residual add + final ReLU, lane-dense store -------------------------
    out = jnp.maximum(out2_3d * y_ld[:, None, :] + sc.reshape(Bblk, H, WCout),
                      0.0)
    o_ref[...] = out.astype(o_ref.dtype)


# ----------------------------- host-side weight prep --------------------------
def _fold_bn(gamma, beta, mean, var, eps=1e-5):
    scale = gamma / jnp.sqrt(var + eps)
    bias = beta - mean * scale
    return scale, bias


def _band_conv3x3(w_oihw, W, scale):
    """3x3 conv (stride 1, pad 1) as a banded row-matmul weight.

    Returns (3*W*Cin, W*Cout) such that
        out_row[h] = concat_ky(in_row[h+ky-1]) @ band
    with the kx shifts and W-edge zero padding absorbed in the band structure
    and the folded-BN scale baked into the output columns."""
    w = np.asarray(jnp.transpose(w_oihw, (2, 3, 1, 0))
                   * scale[None, None, None, :], dtype=np.float32)  # (3,3,Ci,Co)
    Cin, Cout = w.shape[2], w.shape[3]
    band = np.zeros((3, W * Cin, W * Cout), np.float32)
    for ky in range(3):
        for kx in range(3):
            for wo in range(W):
                wi = wo + kx - 1
                if 0 <= wi < W:
                    band[ky, wi * Cin:(wi + 1) * Cin,
                         wo * Cout:(wo + 1) * Cout] = w[ky, kx]
    return band.reshape(3 * W * Cin, W * Cout)


def _band_conv1x1(w_io, W, scale):
    """1x1 conv as a block-diagonal (W*Cin, W*Cout) weight (BN scale folded)."""
    w = np.asarray(w_io * scale[None, :], dtype=np.float32)  # (Cin, Cout)
    Cin, Cout = w.shape
    band = np.zeros((W * Cin, W * Cout), np.float32)
    for wo in range(W):
        band[wo * Cin:(wo + 1) * Cin, wo * Cout:(wo + 1) * Cout] = w
    return band


def se_block_forward(x_nchw, params, batch_block=1, vmem_limit_bytes=None):
    """x_nchw: (B, Cin, H, W) float32. Returns (B, Cout, H, W) float32.

    batch_block: images per grid step.  Keep <= B//2 on v7x (2 TensorCores need
    >= 2 parallel grid steps); use batch_block=B on single-TC v5e/v6e to
    collapse the grid (and pass vmem_limit_bytes if the working set needs it).
    """
    B, Cin, H, W = x_nchw.shape
    Cout = params["w1"].shape[0]
    Chid = params["fc1"].shape[0]
    Bblk = batch_block
    assert B % Bblk == 0, (B, Bblk)

    s1, b1 = _fold_bn(*params["bn1"])
    s2, b2 = _fold_bn(*params["bn2"])
    if "wsc" in params:
        wsc = jnp.transpose(params["wsc"][:, :, 0, 0], (1, 0))   # (Cin, Cout)
        ssc, bsc = _fold_bn(*params["bnsc"])
    else:
        # Identity shortcut is only valid when channel counts match.
        assert Cin == Cout, "identity shortcut requires in_channels == out_channels"
        wsc = jnp.eye(Cin, dtype=jnp.float32)
        ssc = jnp.ones((Cout,), jnp.float32)
        bsc = jnp.zeros((Cout,), jnp.float32)

    # Banded conv weights with BN scales folded into the columns, bf16 for MXU.
    w1_band = _band_conv3x3(params["w1"], W, s1)                 # (3*W*Cin, W*Cout)
    sc_band = np.zeros((3 * W * Cin, W * Cout), np.float32)
    sc_band[W * Cin:2 * W * Cin, :] = _band_conv1x1(wsc, W, ssc)  # center (ky=1) rows
    w1sc = jnp.asarray(np.concatenate([w1_band, sc_band], axis=1),
                       dtype=jnp.bfloat16)                       # (3*W*Cin, 2*W*Cout)
    w2 = jnp.asarray(_band_conv3x3(params["w2"], W, s2), dtype=jnp.bfloat16)

    # Folded-BN biases, pre-tiled to lane-dense (W*Cout,) rows; one packed DMA.
    bias_pack = np.zeros((8, W * Cout), np.float32)
    bias_pack[0] = np.tile(np.asarray(b1), W)
    bias_pack[1] = np.tile(np.asarray(b2), W)
    bias_pack[2] = np.tile(np.asarray(bsc), W)
    bias_pack = jnp.asarray(bias_pack)

    # SE weights: fold the global average pool into fc1 (tiled rows / (H*W)).
    fc1_eff = jnp.asarray(np.tile(np.asarray(params["fc1"]).T, (W, 1)) / (H * W),
                          dtype=jnp.float32)                     # (W*Cout, Chid)
    fc2_t = jnp.asarray(np.asarray(params["fc2"]).T, dtype=jnp.float32)  # (Chid, Cout)
    rep = jnp.asarray(np.tile(np.eye(Cout, dtype=np.float32), (1, W)))   # (Cout, W*Cout)

    # NCHW -> lane-dense (B, H, W*Cin) bf16; no wrapper-side spatial padding.
    # (The NCHW<->NHWC boundary transposes would be amortized across a whole
    # ResNet stage in real use.)
    x_ld = jnp.transpose(x_nchw, (0, 2, 3, 1)).reshape(B, H, W * Cin)
    x_ld = x_ld.astype(jnp.bfloat16)

    def full(a):
        return pl.BlockSpec(a.shape, lambda b: (0,) * a.ndim)

    compiler_params = pltpu.CompilerParams(
        dimension_semantics=("parallel",),
        vmem_limit_bytes=vmem_limit_bytes)

    out_ld = pl.pallas_call(
        _se_block_kernel,
        out_shape=jax.ShapeDtypeStruct((B, H, W * Cout), jnp.float32),
        grid_spec=pltpu.PrefetchScalarGridSpec(
            num_scalar_prefetch=0,
            grid=(B // Bblk,),
            in_specs=[
                pl.BlockSpec((Bblk, H, W * Cin), lambda b: (b, 0, 0)),
                full(w1sc), full(w2), full(fc1_eff), full(fc2_t),
                full(rep), full(bias_pack),
            ],
            out_specs=pl.BlockSpec((Bblk, H, W * Cout), lambda b: (b, 0, 0)),
        ),
        compiler_params=compiler_params,
    )(x_ld, w1sc, w2, fc1_eff, fc2_t, rep, bias_pack)

    out = out_ld.reshape(B, H, W, Cout)
    return jnp.transpose(out, (0, 3, 1, 2))


# ------------------------- pure-JAX reference ---------------------------------
def _conv_nhwc(x, w_oihw, stride=1, pad=1):
    w_hwio = jnp.transpose(w_oihw, (2, 3, 1, 0))
    return jax.lax.conv_general_dilated(
        x, w_hwio, window_strides=(stride, stride),
        padding=[(pad, pad), (pad, pad)],
        dimension_numbers=("NHWC", "HWIO", "NHWC"))


def se_block_reference(x_nchw, params):
    x = jnp.transpose(x_nchw, (0, 2, 3, 1)).astype(jnp.float32)
    s1, b1 = _fold_bn(*params["bn1"])
    s2, b2 = _fold_bn(*params["bn2"])
    ssc, bsc = _fold_bn(*params["bnsc"])

    out = jax.nn.relu(_conv_nhwc(x, params["w1"]) * s1 + b1)
    out = _conv_nhwc(out, params["w2"]) * s2 + b2
    y = jnp.mean(out, axis=(1, 2))                       # (B, Cout)
    y = jax.nn.relu(y @ params["fc1"].T)
    y = jax.nn.sigmoid(y @ params["fc2"].T)
    out = out * y[:, None, None, :]
    sc = _conv_nhwc(x, params["wsc"], pad=0) * ssc + bsc
    out = jax.nn.relu(out + sc)
    return jnp.transpose(out, (0, 3, 1, 2))


if __name__ == "__main__":
    B, Cin, Cout, H, W = 2, 16, 32, 16, 16
    reduction = 16
    Chid = Cout // reduction

    key = jax.random.PRNGKey(0)
    ks = jax.random.split(key, 16)

    def bn_params(k):
        k1, k2, k3, k4 = jax.random.split(k, 4)
        gamma = 1.0 + 0.1 * jax.random.normal(k1, (Cout,), jnp.float32)
        beta = 0.1 * jax.random.normal(k2, (Cout,), jnp.float32)
        mean = 0.1 * jax.random.normal(k3, (Cout,), jnp.float32)
        var = jnp.abs(jax.random.normal(k4, (Cout,), jnp.float32)) + 0.5
        return (gamma, beta, mean, var)

    params = {
        "w1": 0.1 * jax.random.normal(ks[0], (Cout, Cin, 3, 3), jnp.float32),
        "bn1": bn_params(ks[1]),
        "w2": 0.1 * jax.random.normal(ks[2], (Cout, Cout, 3, 3), jnp.float32),
        "bn2": bn_params(ks[3]),
        "fc1": 0.2 * jax.random.normal(ks[4], (Chid, Cout), jnp.float32),
        "fc2": 0.2 * jax.random.normal(ks[5], (Cout, Chid), jnp.float32),
        "wsc": 0.1 * jax.random.normal(ks[6], (Cout, Cin, 1, 1), jnp.float32),
        "bnsc": bn_params(ks[7]),
    }

    x = jax.random.normal(ks[8], (B, Cin, H, W), jnp.float32)

    # batch_block=1 keeps >= 2 parallel grid steps (v7x-safe); use
    # batch_block=B on single-TC v5e/v6e.
    out = jax.block_until_ready(se_block_forward(x, params, batch_block=1))
    ref = jax.block_until_ready(se_block_reference(x, params))

    assert out.shape == (B, Cout, H, W), out.shape
    # Tolerance loosened vs the f32 version: conv matmuls run in bf16 on the MXU.
    max_err = float(jnp.max(jnp.abs(out - ref)))
    assert jnp.allclose(out, ref, atol=5e-2, rtol=5e-2), max_err
    print("KERNEL_OK")
</pallas_src>

<mosaic_0001>
module attributes {stable_mosaic.version = 11 : i64} {
  func.func @_se_block_kernel(%arg0: i32, %arg1: memref<1x16x256xbf16, #tpu.memory_space<vmem>>, %arg2: memref<768x1024xbf16, #tpu.memory_space<vmem>>, %arg3: memref<1536x512xbf16, #tpu.memory_space<vmem>>, %arg4: memref<512x2xf32, #tpu.memory_space<vmem>>, %arg5: memref<2x32xf32, #tpu.memory_space<vmem>>, %arg6: memref<32x512xf32, #tpu.memory_space<vmem>>, %arg7: memref<8x512xf32, #tpu.memory_space<vmem>>, %arg8: memref<1x16x512xf32, #tpu.memory_space<vmem>>) attributes {dimension_semantics = [#tpu.dimension_semantics<parallel>], iteration_bounds = array<i64: 2>, scalar_prefetch = 0 : i64, scratch_operands = 0 : i64, tpu.core_type = #tpu.core_type<tc>, window_params = [{transform_indices = @transform_0, window_bounds = array<i64: 1, 16, 256>}, {pipeline_mode = #tpu.pipeline_mode<synchronous>, transform_indices = @transform_1, window_bounds = array<i64: 768, 1024>}, {pipeline_mode = #tpu.pipeline_mode<synchronous>, transform_indices = @transform_2, window_bounds = array<i64: 1536, 512>}, {pipeline_mode = #tpu.pipeline_mode<synchronous>, transform_indices = @transform_3, window_bounds = array<i64: 512, 2>}, {pipeline_mode = #tpu.pipeline_mode<synchronous>, transform_indices = @transform_4, window_bounds = array<i64: 2, 32>}, {pipeline_mode = #tpu.pipeline_mode<synchronous>, transform_indices = @transform_5, window_bounds = array<i64: 32, 512>}, {pipeline_mode = #tpu.pipeline_mode<synchronous>, transform_indices = @transform_6, window_bounds = array<i64: 8, 512>}, {transform_indices = @transform_7, window_bounds = array<i64: 1, 16, 512>}]} {
    %c0 = arith.constant 0 : index
    %c0_0 = arith.constant 0 : index
    %0 = vector.load %arg7[%c0, %c0_0] : memref<8x512xf32, #tpu.memory_space<vmem>>, vector<8x512xf32>
    %1 = vector.extract_strided_slice %0 {offsets = [0, 0], sizes = [1, 512], strides = [1, 1]} : vector<8x512xf32> to vector<1x512xf32>
    %2 = vector.extract_strided_slice %0 {offsets = [1, 0], sizes = [1, 512], strides = [1, 1]} : vector<8x512xf32> to vector<1x512xf32>
    %3 = vector.extract_strided_slice %0 {offsets = [2, 0], sizes = [1, 512], strides = [1, 1]} : vector<8x512xf32> to vector<1x512xf32>
    %c0_1 = arith.constant 0 : index
    %c0_2 = arith.constant 0 : index
    %c0_3 = arith.constant 0 : index
    %4 = vector.load %arg1[%c0_1, %c0_2, %c0_3] : memref<1x16x256xbf16, #tpu.memory_space<vmem>>, vector<1x16x256xbf16>
    %cst = arith.constant 0.000000e+00 : bf16
    %5 = vector.broadcast %cst : bf16 to vector<1x1x256xbf16>
    %6 = vector.extract_strided_slice %4 {offsets = [0, 0, 0], sizes = [1, 15, 256], strides = [1, 1, 1]} : vector<1x16x256xbf16> to vector<1x15x256xbf16>
    %7 = tpu.concatenate %5, %6 in 1 : vector<1x1x256xbf16>, vector<1x15x256xbf16> -> vector<1x16x256xbf16>
    %8 = vector.extract_strided_slice %4 {offsets = [0, 1, 0], sizes = [1, 15, 256], strides = [1, 1, 1]} : vector<1x16x256xbf16> to vector<1x15x256xbf16>
    %9 = tpu.concatenate %8, %5 in 1 : vector<1x15x256xbf16>, vector<1x1x256xbf16> -> vector<1x16x256xbf16>
    %10 = tpu.concatenate %7, %4, %9 in 2 : vector<1x16x256xbf16>, vector<1x16x256xbf16>, vector<1x16x256xbf16> -> vector<1x16x768xbf16>
    %11 = vector.shape_cast %10 : vector<1x16x768xbf16> to vector<16x768xbf16>
    %c0_4 = arith.constant 0 : index
    %c0_5 = arith.constant 0 : index
    %12 = vector.load %arg2[%c0_4, %c0_5] : memref<768x1024xbf16, #tpu.memory_space<vmem>>, vector<768x1024xbf16>
    %cst_6 = arith.constant dense<0.000000e+00> : vector<16x1024xf32>
    %13 = tpu.matmul %11, %12, %cst_6 {dimension_numbers = #tpu.dot_dimension_numbers<[1], [0], [0], [1], [0, 0, 1, 1], [], []>} : vector<16x768xbf16>, vector<768x1024xbf16>, vector<16x1024xf32> -> vector<16x1024xf32>
    %14 = vector.extract_strided_slice %13 {offsets = [0, 0], sizes = [16, 512], strides = [1, 1]} : vector<16x1024xf32> to vector<16x512xf32>
    %15 = vector.broadcast %1 : vector<1x512xf32> to vector<16x512xf32>
    %16 = arith.addf %14, %15 : vector<16x512xf32>
    %cst_7 = arith.constant 0.000000e+00 : f32
    %17 = vector.broadcast %cst_7 : f32 to vector<16x512xf32>
    %18 = arith.maximumf %16, %17 : vector<16x512xf32>
    %19 = vector.extract_strided_slice %13 {offsets = [0, 512], sizes = [16, 512], strides = [1, 1]} : vector<16x1024xf32> to vector<16x512xf32>
    %20 = vector.broadcast %3 : vector<1x512xf32> to vector<16x512xf32>
    %21 = arith.addf %19, %20 : vector<16x512xf32>
    %22 = vector.shape_cast %18 : vector<16x512xf32> to vector<1x16x512xf32>
    %cst_8 = arith.constant 0.000000e+00 : f32
    %23 = vector.broadcast %cst_8 : f32 to vector<1x1x512xf32>
    %24 = vector.extract_strided_slice %22 {offsets = [0, 0, 0], sizes = [1, 15, 512], strides = [1, 1, 1]} : vector<1x16x512xf32> to vector<1x15x512xf32>
    %25 = tpu.concatenate %23, %24 in 1 : vector<1x1x512xf32>, vector<1x15x512xf32> -> vector<1x16x512xf32>
    %26 = vector.extract_strided_slice %22 {offsets = [0, 1, 0], sizes = [1, 15, 512], strides = [1, 1, 1]} : vector<1x16x512xf32> to vector<1x15x512xf32>
    %27 = tpu.concatenate %26, %23 in 1 : vector<1x15x512xf32>, vector<1x1x512xf32> -> vector<1x16x512xf32>
    %28 = tpu.concatenate %25, %22, %27 in 2 : vector<1x16x512xf32>, vector<1x16x512xf32>, vector<1x16x512xf32> -> vector<1x16x1536xf32>
    %29 = vector.shape_cast %28 : vector<1x16x1536xf32> to vector<16x1536xf32>
    %30 = arith.truncf %29 : vector<16x1536xf32> to vector<16x1536xbf16>
    %c0_9 = arith.constant 0 : index
    %c0_10 = arith.constant 0 : index
    %31 = vector.load %arg3[%c0_9, %c0_10] : memref<1536x512xbf16, #tpu.memory_space<vmem>>, vector<1536x512xbf16>
    %cst_11 = arith.constant dense<0.000000e+00> : vector<16x512xf32>
    %32 = tpu.matmul %30, %31, %cst_11 {dimension_numbers = #tpu.dot_dimension_numbers<[1], [0], [0], [1], [0, 0, 1, 1], [], []>} : vector<16x1536xbf16>, vector<1536x512xbf16>, vector<16x512xf32> -> vector<16x512xf32>
    %33 = vector.broadcast %2 : vector<1x512xf32> to vector<16x512xf32>
    %34 = arith.addf %32, %33 : vector<16x512xf32>
    %35 = vector.shape_cast %34 : vector<16x512xf32> to vector<1x16x512xf32>
    %cst_12 = arith.constant dense<0.000000e+00> : vector<1x512xf32>
    %36 = vector.multi_reduction <add>, %35, %cst_12 [1] : vector<1x16x512xf32> to vector<1x512xf32>
    %c0_13 = arith.constant 0 : index
    %c0_14 = arith.constant 0 : index
    %37 = vector.load %arg4[%c0_13, %c0_14] : memref<512x2xf32, #tpu.memory_space<vmem>>, vector<512x2xf32>
    %cst_15 = arith.constant dense<0.000000e+00> : vector<1x2xf32>
    %38 = tpu.matmul %36, %37, %cst_15 {dimension_numbers = #tpu.dot_dimension_numbers<[1], [0], [0], [1], [0, 0, 1, 1], [], []>} : vector<1x512xf32>, vector<512x2xf32>, vector<1x2xf32> -> vector<1x2xf32>
    %cst_16 = arith.constant 0.000000e+00 : f32
    %39 = vector.broadcast %cst_16 : f32 to vector<1x2xf32>
    %40 = arith.maximumf %38, %39 : vector<1x2xf32>
    %c0_17 = arith.constant 0 : index
    %c0_18 = arith.constant 0 : index
    %41 = vector.load %arg5[%c0_17, %c0_18] : memref<2x32xf32, #tpu.memory_space<vmem>>, vector<2x32xf32>
    %cst_19 = arith.constant dense<0.000000e+00> : vector<1x32xf32>
    %42 = tpu.matmul %40, %41, %cst_19 {dimension_numbers = #tpu.dot_dimension_numbers<[1], [0], [0], [1], [0, 0, 1, 1], [], []>} : vector<1x2xf32>, vector<2x32xf32>, vector<1x32xf32> -> vector<1x32xf32>
    %43 = arith.negf %42 : vector<1x32xf32>
    %44 = math.exp %43 : vector<1x32xf32>
    %cst_20 = arith.constant 1.000000e+00 : f32
    %45 = vector.broadcast %cst_20 : f32 to vector<1x32xf32>
    %46 = arith.addf %45, %44 : vector<1x32xf32>
    %47 = arith.divf %45, %46 : vector<1x32xf32>
    %c0_21 = arith.constant 0 : index
    %c0_22 = arith.constant 0 : index
    %48 = vector.load %arg6[%c0_21, %c0_22] : memref<32x512xf32, #tpu.memory_space<vmem>>, vector<32x512xf32>
    %cst_23 = arith.constant dense<0.000000e+00> : vector<1x512xf32>
    %49 = tpu.matmul %47, %48, %cst_23 {dimension_numbers = #tpu.dot_dimension_numbers<[1], [0], [0], [1], [0, 0, 1, 1], [], []>} : vector<1x32xf32>, vector<32x512xf32>, vector<1x512xf32> -> vector<1x512xf32>
    %50 = vector.shape_cast %49 : vector<1x512xf32> to vector<1x1x512xf32>
    %51 = vector.broadcast %50 : vector<1x1x512xf32> to vector<1x16x512xf32>
    %52 = arith.mulf %35, %51 : vector<1x16x512xf32>
    %53 = vector.shape_cast %21 : vector<16x512xf32> to vector<1x16x512xf32>
    %54 = arith.addf %52, %53 : vector<1x16x512xf32>
    %cst_24 = arith.constant 0.000000e+00 : f32
    %55 = vector.broadcast %cst_24 : f32 to vector<1x16x512xf32>
    %56 = arith.maximumf %54, %55 : vector<1x16x512xf32>
    %c0_25 = arith.constant 0 : index
    %c0_26 = arith.constant 0 : index
    %c0_27 = arith.constant 0 : index
    %57 = vector.load %arg8[%c0_25, %c0_26, %c0_27] : memref<1x16x512xf32, #tpu.memory_space<vmem>>, vector<1x16x512xf32>
    tpu.vector_store %arg8[%c0_25, %c0_26, %c0_27], %56 {strides = array<i32>} : memref<1x16x512xf32, #tpu.memory_space<vmem>>, vector<1x16x512xf32>,
    return
  }
  func.func @transform_0(%arg0: i32) -> (i32, i32, i32) {
    %c0_i32 = arith.constant 0 : i32
    %c0_i32_0 = arith.constant 0 : i32
    %c0_i32_1 = arith.constant 0 : i32
    return %arg0, %c0_i32, %c0_i32_0 : i32, i32, i32
  }
  func.func @transform_1(%arg0: i32) -> (i32, i32) {
    %c0_i32 = arith.constant 0 : i32
    %c0_i32_0 = arith.constant 0 : i32
    %c0_i32_1 = arith.constant 0 : i32
    return %c0_i32, %c0_i32_0 : i32, i32
  }
  func.func @transform_2(%arg0: i32) -> (i32, i32) {
    %c0_i32 = arith.constant 0 : i32
    %c0_i32_0 = arith.constant 0 : i32
    %c0_i32_1 = arith.constant 0 : i32
    return %c0_i32, %c0_i32_0 : i32, i32
  }
  func.func @transform_3(%arg0: i32) -> (i32, i32) {
    %c0_i32 = arith.constant 0 : i32
    %c0_i32_0 = arith.constant 0 : i32
    %c0_i32_1 = arith.constant 0 : i32
    return %c0_i32, %c0_i32_0 : i32, i32
  }
  func.func @transform_4(%arg0: i32) -> (i32, i32) {
    %c0_i32 = arith.constant 0 : i32
    %c0_i32_0 = arith.constant 0 : i32
    %c0_i32_1 = arith.constant 0 : i32
    return %c0_i32, %c0_i32_0 : i32, i32
  }
  func.func @transform_5(%arg0: i32) -> (i32, i32) {
    %c0_i32 = arith.constant 0 : i32
    %c0_i32_0 = arith.constant 0 : i32
    %c0_i32_1 = arith.constant 0 : i32
    return %c0_i32, %c0_i32_0 : i32, i32
  }
  func.func @transform_6(%arg0: i32) -> (i32, i32) {
    %c0_i32 = arith.constant 0 : i32
    %c0_i32_0 = arith.constant 0 : i32
    %c0_i32_1 = arith.constant 0 : i32
    return %c0_i32, %c0_i32_0 : i32, i32
  }
  func.func @transform_7(%arg0: i32) -> (i32, i32, i32) {
    %c0_i32 = arith.constant 0 : i32
    %c0_i32_0 = arith.constant 0 : i32
    %c0_i32_1 = arith.constant 0 : i32
    return %arg0, %c0_i32, %c0_i32_0 : i32, i32, i32
  }
}

</mosaic_0001>

<bundles_post_ra>
// kernel: tpu_custom_call.1
= control target key start
LH: loop header
LB: loop body
LE: loop exit
PB: predicated region body
PF: predicated region fallthrough
CT: control target
= control target key end

     0   :  { %s9726_s0 = inlined_call_operand.hbm [shape: bf16[2,16,256], index: 0, kind: input, shape index: {}]   ;;  %s9727_s1 = inlined_call_operand.hbm [shape: bf16[768,1024], index: 1, kind: input, shape index: {}]   ;;  %s9728_s2 = inlined_call_operand.hbm [shape: bf16[1536,512], index: 2, kind: input, shape index: {}]   ;;  %s9729_s3 = inlined_call_operand.vmem [shape: f32[512,2], index: 3, kind: input, shape index: {}]   ;;  %s9730_s4 = inlined_call_operand.hbm [shape: f32[2,32], index: 4, kind: input, shape index: {}]   ;;  %s9731_s5 = inlined_call_operand.hbm [shape: f32[32,512], index: 5, kind: input, shape index: {}]   ;;  %s9732_s6 = inlined_call_operand.hbm [shape: f32[8,512], index: 6, kind: input, shape index: {}]   ;;  %s9733_s7 = inlined_call_operand.hbm [shape: f32[2,16,512], index: 7, kind: output, shape index: {}]  }
   0x1   :  { %9739 = sst [smem:[#allocation19_spill]] %s9727_s1 }
   0x2   :  { %12 = vsyncpa [#allocation3], 0 }
   0x3   :  { %14 = vsyncpa [#allocation3 + $0x1], 0 }
   0x4   :  { %15 = vsyncpa [#allocation6], 0 }
   0x5   :  { %16 = vsyncpa [#allocation9], 0 }
   0x6   :  { %17 = vsyncpa [#allocation12], 0 }
   0x7   :  { %18 = vsyncpa [#allocation4], 0 }
   0x8   :  { %20 = vsyncpa [#allocation4 + $0x1], 0  ;;  %s8959_s24 = smov 0   ;;  %s8961_s25 = smov 0  }
   0x9   :  { %s8963_s26 = smov 0   ;;  %s8965_s27 = smov 0  }
   0xa LB: > { %s8901_s28 = smov [#allocation5]   ;;  %s8980_s30 = sadd.s32 4294967295, %s8899_s27   ;;  %s8899_s27 = sphi %s8965_s27, %s9774_s27   ;;  %s8895_s26 = sphi %s8963_s26, %s9773_s26   ;;  %s8891_s25 = sphi %s8961_s25, %s9772_s25   ;;  %s8887_s24 = sphi %s8959_s24, %s9771_s24  }
   0xb   : > { %s221_s29 = sshll.u32 %s8901_s28, 4  ;;  %p6861_p0 = scmp.ge.s32.totalorder %s8899_s27, 1  ;;  %s8985_s29 = int_to_ptr.vmem [resolvable:$true] %s221_s29 }
   0xc   : > { %p9736_p1 = scmp.eq.s32.totalorder %s8980_s30, 0  ;;  %p209_p2 = scmp.lt.s32.totalorder %s8899_s27, 3 }
   0xd   : > { %s8902_s9 = smov [#allocation8]   ;;  %s8903_s12 = smov [#allocation7]  }
   0xe   : > { %p8987_p3 = pnand %p6861_p0, %p209_p2  ;;  %s251_s10 = sshll.u32 %s8902_s9, 4  ;;  %s9000_s10 = int_to_ptr.vmem [resolvable:$true] %s251_s10 }
   0xf   : > { %s234_s13 = sshll.u32 %s8903_s12, 4  ;;  %s9742_s1 = sld [smem:[#allocation19_spill]]  ;;  %s9002_s13 = int_to_ptr.vmem [resolvable:$true] %s234_s13 }
  0x10   : > { %s9740_s8 = scalar_select %p8987_p3, 1, 0 }
  0x11   : > { %p7978_p5 = pneg %p8987_p3 }
  0x13   : > { %p8996_p6 = pnand %p7978_p5, %p9736_p1 }
  0x15   : > { %s8651_s16 = scalar_lea.hbm %s9742_s1, 49152  ;;  %p9012_p8 = pneg %p8996_p6 }
  0x16   : > { %p8652_p7 = scmp.ne.s32.totalorder %s9742_s1, %s8651_s16  ;;  %p8658_p11 = scmp.lt.u32.totalorder %s8651_s16, %s9742_s1 }
  0x18   : > { %p8654_p9 = pnand %p9012_p8, %p8652_p7 }
  0x1a   : > { %p8655_p10 = pneg %p8654_p9 }
  0x1c   : > { %p8660_p12 = pnand %p8658_p11, %p8655_p10 }
  0x1e   : > { %8663 = shalt.err (!%p8660_p12)
}
  0x1f   : > { %s8664_s22 = scalar_lea.vmem %s8985_s29, 49152  ;;  %p8672_p5 = scmp.lt.s32.totalorder %s8985_s29, %s8985_s29 }
  0x20   : > { %p8665_p13 = scmp.ne.s32.totalorder %s8985_s29, %s8664_s22  ;;  %p8673_p4 = scmp.lt.s32.totalorder %s8664_s22, %s8664_s22 }
  0x22   : > { %p8667_p0 = pnand %p8665_p13, %p9012_p8  ;;  %p8674_p7 = por %p8673_p4, %p8672_p5 }
  0x24   : > { %p8668_p2 = pneg %p8667_p0 }
  0x26   : > { %p8675_p9 = pnand %p8674_p7, %p8668_p2 }
  0x28   : > { %8678 = shalt.err (!%p8675_p9)
}
  0x29   : > { %s9734_s23 = smov 512   ;;  %s9735_s28 = smov 32  }
  0x2a   : > { %7981 = dma.hbm_to_vmem [thread:$0]  (!%p8996_p6), %s9742_s1, 49152, %s8985_s29, [#allocation6], %s9734_s23, %s9734_s23, %s9735_s28  }
  0x2b   : > { %s8679_s16 = scalar_lea.hbm %s9730_s4, 32 }
  0x2c   : > { %p8680_p4 = scmp.ne.s32.totalorder %s9730_s4, %s8679_s16  ;;  %p8686_p12 = scmp.lt.u32.totalorder %s8679_s16, %s9730_s4 }
  0x2e   : > { %p8682_p10 = pnand %p8680_p4, %p9012_p8 }
  0x30   : > { %p8683_p11 = pneg %p8682_p10 }
  0x32   : > { %p8688_p13 = pnand %p8686_p12, %p8683_p11 }
  0x34   : > { %8691 = shalt.err (!%p8688_p13)
}
  0x35   : > { %s8692_s29 = scalar_lea.vmem %s9000_s10, 32  ;;  %p8700_p7 = scmp.lt.s32.totalorder %s9000_s10, %s9000_s10 }
  0x36   : > { %p8693_p0 = scmp.ne.s32.totalorder %s9000_s10, %s8692_s29  ;;  %p8701_p9 = scmp.lt.s32.totalorder %s8692_s29, %s8692_s29 }
  0x38   : > { %p8695_p2 = pnand %p8693_p0, %p9012_p8  ;;  %p8702_p4 = por %p8701_p9, %p8700_p7 }
  0x3a   : > { %p8696_p5 = pneg %p8695_p2 }
  0x3c   : > { %p8703_p10 = pnand %p8702_p4, %p8696_p5 }
  0x3e   : > { %8706 = shalt.err (!%p8703_p10)
}
  0x3f   : > { %7987 = dma.hbm_to_vmem [thread:$0]  (!%p8996_p6), %s9730_s4, 32, %s9000_s10, [#allocation9]  }
  0x40   : > { %s8707_s15 = scalar_lea.hbm %s9728_s2, 49152 }
  0x41   : > { %p8708_p11 = scmp.ne.s32.totalorder %s9728_s2, %s8707_s15  ;;  %p8714_p0 = scmp.lt.u32.totalorder %s8707_s15, %s9728_s2 }
  0x43   : > { %p8710_p12 = pnand %p8708_p11, %p9012_p8 }
  0x45   : > { %p8711_p13 = pneg %p8710_p12 }
  0x47   : > { %p8716_p2 = pnand %p8714_p0, %p8711_p13 }
  0x49   : > { %8719 = shalt.err (!%p8716_p2)
}
  0x4a   : > { %s8720_s10 = scalar_lea.vmem %s9002_s13, 49152  ;;  %p8728_p4 = scmp.lt.s32.totalorder %s9002_s13, %s9002_s13 }
  0x4b   : > { %p8721_p5 = scmp.ne.s32.totalorder %s9002_s13, %s8720_s10  ;;  %p8729_p10 = scmp.lt.s32.totalorder %s8720_s10, %s8720_s10 }
  0x4d   : > { %p8723_p7 = pnand %p8721_p5, %p9012_p8  ;;  %p8730_p11 = por %p8729_p10, %p8728_p4 }
  0x4f   : > { %p8724_p9 = pneg %p8723_p7 }
  0x51   : > { %p8731_p12 = pnand %p8730_p11, %p8724_p9 }
  0x53   : > { %8734 = shalt.err (!%p8731_p12)
}
  0x54   : > { %s8906_s21 = smov 256   ;;  %s8907_s29 = smov 16  }
  0x55   : > { %7984 = dma.hbm_to_vmem [thread:$0]  (!%p8996_p6), %s9728_s2, 49152, %s9002_s13, [#allocation6], %s8906_s21, %s8906_s21, %s8907_s29  }
  0x56   : > { %s8908_s12 = smov [#allocation10]   ;;  %s8909_s15 = smov [#allocation11]  }
  0x57   : > { %s261_s14 = sshll.u32 %s8908_s12, 4  ;;  %s275_s16 = sshll.u32 %s8909_s15, 4  ;;  %s262_s14 = int_to_ptr.vmem [resolvable:$true] %s261_s14  ;;  %s276_s16 = int_to_ptr.vmem [resolvable:$true] %s275_s16 }
  0x58   : > { %s8735_s20 = scalar_lea.hbm %s9731_s5, 2048 }
  0x59   : > { %p8736_p13 = scmp.ne.s32.totalorder %s9731_s5, %s8735_s20  ;;  %p8742_p5 = scmp.lt.u32.totalorder %s8735_s20, %s9731_s5 }
  0x5b   : > { %p8738_p0 = pnand %p8736_p13, %p9012_p8 }
  0x5d   : > { %p8739_p2 = pneg %p8738_p0 }
  0x5f   : > { %p8744_p7 = pnand %p8742_p5, %p8739_p2 }
  0x61   : > { %8747 = shalt.err (!%p8744_p7)
}
  0x62   : > { %s8748_s13 = scalar_lea.vmem %s262_s14, 2048  ;;  %p8756_p11 = scmp.lt.s32.totalorder %s262_s14, %s262_s14 }
  0x63   : > { %p8749_p9 = scmp.ne.s32.totalorder %s262_s14, %s8748_s13  ;;  %p8757_p12 = scmp.lt.s32.totalorder %s8748_s13, %s8748_s13 }
  0x65   : > { %p8751_p4 = pnand %p8749_p9, %p9012_p8  ;;  %p8758_p1 = por %p8757_p12, %p8756_p11 }
  0x67   : > { %p8752_p10 = pneg %p8751_p4 }
  0x69   : > { %p8759_p3 = pnand %p8758_p1, %p8752_p10 }
  0x6b   : > { %8762 = shalt.err (!%p8759_p3)
}
  0x6c   : > { %s9744_s23 = smov 32   ;;  %s9745_s21 = smov 512  }
  0x6d   : > { %7990 = dma.hbm_to_vmem [thread:$0]  (!%p8996_p6), %s9731_s5, 2048, %s262_s14, [#allocation9], %s9745_s21, %s9745_s21, %s9744_s23  }
  0x6e   : > { %s8763_s9 = scalar_lea.hbm %s9732_s6, 512 }
  0x6f   : > { %p8764_p1 = scmp.ne.s32.totalorder %s9732_s6, %s8763_s9  ;;  %p8770_p0 = scmp.lt.u32.totalorder %s8763_s9, %s9732_s6 }
  0x71   : > { %p8766_p3 = pnand %p8764_p1, %p9012_p8 }
  0x73   : > { %p8767_p13 = pneg %p8766_p3 }
  0x75   : > { %p8772_p2 = pnand %p8770_p0, %p8767_p13 }
  0x77   : > { %8775 = shalt.err (!%p8772_p2)
}
  0x78   : > { %s8776_s20 = scalar_lea.vmem %s276_s16, 512  ;;  %p8784_p4 = scmp.lt.s32.totalorder %s276_s16, %s276_s16 }
  0x79   : > { %p8777_p5 = scmp.ne.s32.totalorder %s276_s16, %s8776_s20  ;;  %p8785_p10 = scmp.lt.s32.totalorder %s8776_s20, %s8776_s20 }
  0x7b   : > { %p8779_p7 = pnand %p8777_p5, %p9012_p8  ;;  %p8786_p11 = por %p8785_p10, %p8784_p4 }
  0x7d   : > { %p8780_p9 = pneg %p8779_p7 }
  0x7f   : > { %p8787_p12 = pnand %p8786_p11, %p8780_p9 }
  0x81   : > { %8790 = shalt.err (!%p8787_p12)
}
  0x82   : > { %7993 = dma.hbm_to_vmem [thread:$0]  (!%p8996_p6), %s9732_s6, 512, %s276_s16, [#allocation12]  }
  0x83   : > { %s6860_s19 = sadd.s32 4294967294, %s8899_s27   ;;  %s9123_s11 = sadd.s32 1, %s8899_s27  }
  0x84   : > { %s33_s13 = sadd.s32 1, %s8895_s26  ;;  %s30_s23 = ssub.s32 %s8899_s27, %s9123_s11 }
  0x85   : > { %p40_p8 = scmp.ne.s32.totalorder %s8895_s26, %s8891_s25  ;;  %p31_p1 = scmp.eq.s32.totalorder %s30_s23, 0 }
  0x86   : > { %p41_p3 = scmp.eq.s32.totalorder %s8899_s27, 0  ;;  %p46_p13 = scmp.ne.s32.totalorder %s8891_s25, %s8887_s24 }
  0x87   : > { %p196_p0 = scmp.eq.s32.totalorder %s8980_s30, 1  ;;  %p9746_p5 = scmp.eq.s32.totalorder %s8980_s30, 0 }
  0x88   : > { %s9135_s21 = scalar_select %p31_p1, %s8895_s26, %s33_s13  }
  0x89   : > { %p42_p2 = por %p41_p3, %p40_p8  ;;  %p9139_p7 = por %p9746_p5, %p46_p13 }
  0x8a   : > { %p9143_p6 = por %p196_p0, %p40_p8  ;;  %p202_p9 = scmp.eq.s32.totalorder %s6860_s19, 1 }
  0x8b   : > { %p8007_p4 = scmp.lt.s32.totalorder %s8899_s27, 2  ;;  %s286_s28 = sand.u32 1, %s8895_s26  }
  0x8c   : > { %s9748_s16 = scalar_select %p9143_p6, 1, 0 }
  0x8d   : > { %p9149_p10 = por %p202_p9, %p46_p13  ;;  %s6868_s22 = sshll.u32 %s286_s28, 4 }
  0x8e   : > { %s7715_s9 = sshll.u32 %s8899_s27, 8  ;;  %s290_s18 = scalar_lea.vmem [#allocation2], %s6868_s22 }
  0x8f   : > { %s9749_s29 = scalar_select %p9149_p10, 1, 0 }
  0x90   : > { %s9157_s17 = scalar_lea.hbm %s9726_s0, %s7715_s9  ;;  %s297_s20 = sshll.u32 %s290_s18, 4  ;;  %s9163_s20 = int_to_ptr.vmem [resolvable:$true] %s297_s20 }
  0x91   : > { %p9159_p11 = pnand %p8007_p4, %p42_p2  ;;  %s9165_s10 = scalar_lea.sflag [#allocation3], %s286_s28 }
  0x92   : > { %s8791_s19 = scalar_lea.hbm %s9157_s17, 256  ;;  %s8796_s22 = scalar_lea.hbm %s9726_s0, 512 }
  0x93   : > { %p8792_p12 = scmp.ne.s32.totalorder %s9157_s17, %s8791_s19  ;;  %p8793_p8 = pneg %p9159_p11 }
  0x94   : > { %p8797_p13 = scmp.lt.u32.totalorder %s9157_s17, %s9726_s0  ;;  %p8798_p0 = scmp.lt.u32.totalorder %s8796_s22, %s8791_s19 }
  0x95   : > { %p8794_p1 = pnand %p8793_p8, %p8792_p12  ;;  %p8800_p5 = scmp.lt.u32.totalorder %s8791_s19, %s9157_s17 }
  0x96   : > { %p8799_p2 = por %p8798_p0, %p8797_p13 }
  0x97   : > { %p8795_p3 = pneg %p8794_p1 }
  0x98   : > { %p8801_p9 = por %p8800_p5, %p8799_p2 }
  0x9a   : > { %p8802_p4 = pnand %p8801_p9, %p8795_p3 }
  0x9c   : > { %8805 = shalt.err (!%p8802_p4)
}
  0x9d   : > { %s8806_s28 = scalar_lea.vmem %s9163_s20, 256  ;;  %s8910_s15 = smov [#allocation2]  }
  0x9e   : > { %p8807_p12 = scmp.ne.s32.totalorder %s9163_s20, %s8806_s28  ;;  %s8811_s18 = sshll.u32 %s8910_s15, 4  ;;  %s8812_s18 = int_to_ptr.vmem [resolvable:$false] %s8811_s18 }
  0x9f   : > { %s8813_s13 = scalar_lea.vmem %s8812_s18, 512  ;;  %p8814_p6 = scmp.lt.s32.totalorder %s9163_s20, %s8812_s18 }
  0xa0   : > { %p8809_p1 = pnand %p8807_p12, %p8793_p8  ;;  %p8815_p13 = scmp.lt.s32.totalorder %s8813_s13, %s8806_s28 }
  0xa2   : > { %p8810_p10 = pneg %p8809_p1  ;;  %p8816_p0 = por %p8815_p13, %p8814_p6 }
  0xa4   : > { %p8817_p2 = pnand %p8816_p0, %p8810_p10 }
  0xa6   : > { %8820 = shalt.err (!%p8817_p2)
}
  0xa7   : > { %s8911_s19 = smov 128   ;;  %s8912_s23 = smov 8  }
  0xa8   : > { %7997 = dma.hbm_to_vmem [thread:$0]  (!%p9159_p11), %s9157_s17, 256, %s9163_s20, %s9165_s10, %s8911_s19, %s8911_s19, %s8912_s23  }
  0xa9   : > { %p9751_p8 = scmp.ne.s32.totalorder %s9740_s8, 0 }
  0xaa   : > { %s9196_s22 = sand.u32 (!%p9751_p8), 1, %s8891_s25  }
  0xab   : > { %309 = sbr.rel (%p9751_p8) target bundleno = 1889 (0x761), region = 48  ;;  %s6872_s9 = sshll.u32 (!%p9751_p8), %s9196_s22, 4 }
  0xac   : > { %s312_s12 = scalar_lea.sflag (!%p9751_p8), [#allocation3], %s9196_s22  ;;  %s9200_s28 = scalar_lea.vmem (!%p9751_p8), [#allocation2], %s6872_s9 }
  0xb2   : > { %8866 = dma.done.wait (%p9139_p7), %s312_s12, 256  }
  0xb3   : > { %8868 = vsyncadd (%p9139_p7), %s312_s12, 4294967040  ;;  %p9752_p6 = scmp.eq.s32.totalorder %s8980_s30, 0 }
  0xb5   : > { %8870 = dma.done.wait (%p9752_p6), [#allocation6], 98304   ;;  %p9753_p10 = pmov %p9752_p6 }
  0xb6   : > { %p9754_p11 = pmov %p9752_p6 }
  0xb7   : > { %8872 = vsyncadd (%p9753_p10), [#allocation6], 4294868992 }
  0xb8   : > { %8874 = dma.done.wait (%p9754_p11), [#allocation9], 2080   ;;  %p9755_p3 = pmov %p9752_p6 }
  0xba   : > { %8876 = vsyncadd (%p9755_p3), [#allocation9], 4294965216  ;;  %p9756_p5 = pmov %p9755_p3 }
  0xbb   : > { %p9757_p9 = pmov %p9755_p3 }
  0xbc   : > { %8878 = dma.done.wait (%p9756_p5), [#allocation12], 512  }
  0xbd   : > { %8880 = vsyncadd (%p9757_p9), [#allocation12], 4294966784  ;;  %v415_v0 = vld [vmem:[#allocation5] sm:$0xff]  ;;  %v416_v2 = vld [vmem:[#allocation5 + $0x8] sm:$0xff]  ;;  %vm397_vm0 = vcmask 1040384   ;;  %vm408_vm3 = vcmask 1047552  }
  0xbe   : > { %v419_v1 = vld [vmem:[#allocation5 + $0x20] sm:$0xff]  ;;  %v420_v4 = vld [vmem:[#allocation5 + $0x28] sm:$0xff]  ;;  %vm398_vm1 = vsmask.f32 256  ;;  %vm409_vm4 = vsmask.f32 7424  ;;  %vm9311_vm7 = vmneg %vm397_vm0 }
  0xbf   : > { %v6882_v3 = vcombine.high %v415_v0, %v419_v1  ;;  %v6881_v5 = vcombine.low %v415_v0, %v419_v1  ;;  %v423_v6 = vld [vmem:[#allocation5 + $0x40] sm:$0xff]  ;;  %v6884_v8 = vcombine.high %v416_v2, %v420_v4  ;;  %v6883_v9 = vcombine.low %v416_v2, %v420_v4  ;;  %v424_v11 = vld [vmem:[#allocation5 + $0x48] sm:$0xff]  ;;  %vm9226_vm2 = vmand %vm397_vm0, %vm398_vm1  ;;  %s6878_s17 = sshll.u32 %s9196_s22, 6  ;;  %s7716_s20 = sshll.u32 %s8980_s30, 10 }
  0xc0   : > { %v427_v7 = vld [vmem:[#allocation5 + $0x60] sm:$0xff]  ;;  %v428_v12 = vld [vmem:[#allocation5 + $0x68] sm:$0xff]  ;;  %vm9259_vm5 = vmand %vm408_vm3, %vm409_vm4  ;;  %vm3324_vm6 = vcmask 1046528   ;;  %vm8913_vm8 = vmmov 1   ;;  %vm6435_vm11 = vcmask 1041408   ;;  %vm8915_vm12 = vmmov 0   ;;  %s9680_s13 = scalar_lea.hbm %s9733_s7, %s7716_s20 }
  0xc1   : > { %v6890_v10 = vcombine.high %v423_v6, %v427_v7  ;;  %v431_v13 = vld [vmem:[#allocation5 + $0x80] sm:$0xff]  ;;  %2719 = vmatprep.subr.bf16.mxu0 %v6882_v3  ;;  %v6892_v14 = vcombine.high %v424_v11, %v428_v12  ;;  %v432_v16 = vld [vmem:[#allocation5 + $0x88] sm:$0xff]  ;;  %2848 = vmatprep.subr.bf16.mxu1 %v6884_v8  ;;  %v6889_v18 = vcombine.low %v423_v6, %v427_v7  ;;  %vm9329_vm9 = vmpackc.low %vm8913_vm8, %vm9311_vm7  ;;  %vm6431_vm13 = vcmask 15360   ;;  %s365_s14 = scalar_lea.vmem [#allocation13], %s6878_s17  ;;  %s6726_s30 = scalar_lea.sflag [#allocation4], %s9196_s22 }
  0xc2   : > { %v435_v15 = vld [vmem:[#allocation5 + $0xa0] sm:$0xff]  ;;  %v436_v17 = vld [vmem:[#allocation5 + $0xa8] sm:$0xff]  ;;  %2720 = vmatpush1.bf16.msra.mxu0 %v6881_v5  ;;  %2849 = vmatpush1.bf16.msra.mxu1 %v6883_v9  ;;  %v6891_v19 = vcombine.low %v424_v11, %v428_v12  ;;  %vm9391_vm10 = vmpackc.low %vm3324_vm6, %vm8913_vm8  ;;  %vm6531_vm14 = vcmask 261120   ;;  %s6739_s10 = sshll.u32 %s365_s14, 4  ;;  %p9768_p4 = scmp.ne.s32.totalorder %s9748_s16, 0  ;;  %s9682_s10 = int_to_ptr.vmem [resolvable:$true] %s6739_s10 }
  0xc3   : > { %2721 = vmatprep.subr.bf16.mxu0 %v6890_v10  ;;  %v6898_v20 = vcombine.high %v431_v13, %v435_v15  ;;  %2850 = vmatprep.subr.bf16.mxu1 %v6892_v14  ;;  %v6900_v21 = vcombine.high %v432_v16, %v436_v17  ;;  %v439_v22 = vld [vmem:[#allocation5 + $0xc0] sm:$0xff]  ;;  %v440_v24 = vld [vmem:[#allocation5 + $0xc8] sm:$0xff]  ;;  %v6897_v26 = vcombine.low %v431_v13, %v435_v15  ;;  %s8821_s19 = scalar_lea.vmem %s9682_s10, 1024  ;;  %s8916_s23 = smov [#allocation13]  }
  0xc4   : > { %v443_v23 = vld [vmem:[#allocation5 + $0xe0] sm:$0xff]  ;;  %v444_v25 = vld [vmem:[#allocation5 + $0xe8] sm:$0xff]  ;;  %v6899_v27 = vcombine.low %v432_v16, %v436_v17  ;;  %p8822_p7 = scmp.ne.s32.totalorder %s9682_s10, %s8821_s19  ;;  %s8825_s9 = sshll.u32 %s8916_s23, 4  ;;  %s8826_s9 = int_to_ptr.vmem [resolvable:$false] %s8825_s9 }
  0xc5   : > { %v6906_v28 = vcombine.high %v439_v22, %v443_v23  ;;  %v6908_v29 = vcombine.high %v440_v24, %v444_v25  ;;  %v447_v30 = vld [vmem:[#allocation5 + $0x100] sm:$0xff]  ;;  %v448_v32 = vld [vmem:[#allocation5 + $0x108] sm:$0xff]  ;;  %v6905_v34 = vcombine.low %v439_v22, %v443_v23  ;;  %v6907_v35 = vcombine.low %v440_v24, %v444_v25  ;;  %s8827_s12 = scalar_lea.vmem %s8826_s9, 2048  ;;  %p8828_p13 = scmp.lt.s32.totalorder %s9682_s10, %s8826_s9 }
  0xc6   : > { %2722 = vmatpush1.bf16.msra.mxu0 %v6889_v18  ;;  %2851 = vmatpush1.bf16.msra.mxu1 %v6891_v19  ;;  %v451_v31 = vld [vmem:[#allocation5 + $0x120] sm:$0xff]  ;;  %v452_v33 = vld [vmem:[#allocation5 + $0x128] sm:$0xff]  ;;  %p8823_p12 = pnand %p8822_p7, %p9768_p4  ;;  %p8829_p0 = scmp.lt.s32.totalorder %s8827_s12, %s8821_s19 }
  0xc7   : > { %2723 = vmatprep.subr.bf16.mxu0 %v6898_v20  ;;  %2852 = vmatprep.subr.bf16.mxu1 %v6900_v21  ;;  %v6914_v36 = vcombine.high %v447_v30, %v451_v31  ;;  %v6916_v37 = vcombine.high %v448_v32, %v452_v33  ;;  %v455_v38 = vld [vmem:[#allocation5 + $0x140] sm:$0xff]  ;;  %v456_v40 = vld [vmem:[#allocation5 + $0x148] sm:$0xff]  ;;  %v6913_v42 = vcombine.low %v447_v30, %v451_v31 }
  0xc8   : > { %v459_v39 = vld [vmem:[#allocation5 + $0x160] sm:$0xff]  ;;  %v460_v41 = vld [vmem:[#allocation5 + $0x168] sm:$0xff]  ;;  %v6915_v43 = vcombine.low %v448_v32, %v452_v33  ;;  %p8824_p1 = pneg %p8823_p12  ;;  %p8830_p2 = por %p8829_p0, %p8828_p13 }
  0xc9   : > { %v6922_v44 = vcombine.high %v455_v38, %v459_v39  ;;  %v6924_v45 = vcombine.high %v456_v40, %v460_v41  ;;  %v463_v46 = vld [vmem:[#allocation5 + $0x180] sm:$0xff]  ;;  %v464_v48 = vld [vmem:[#allocation5 + $0x188] sm:$0xff]  ;;  %v6921_v50 = vcombine.low %v455_v38, %v459_v39  ;;  %v6923_v51 = vcombine.low %v456_v40, %v460_v41 }
  0xca   : > { %2724 = vmatpush1.bf16.msra.mxu0 %v6897_v26  ;;  %2853 = vmatpush1.bf16.msra.mxu1 %v6899_v27  ;;  %v467_v47 = vld [vmem:[#allocation5 + $0x1a0] sm:$0xff]  ;;  %v468_v49 = vld [vmem:[#allocation5 + $0x1a8] sm:$0xff]  ;;  %p8831_p8 = pnand %p8830_p2, %p8824_p1 }
  0xcb   : > { %2725 = vmatprep.subr.bf16.mxu0 %v6906_v28  ;;  %2854 = vmatprep.subr.bf16.mxu1 %v6908_v29  ;;  %v6930_v52 = vcombine.high %v463_v46, %v467_v47  ;;  %v6932_v53 = vcombine.high %v464_v48, %v468_v49  ;;  %v471_v54 = vld [vmem:[#allocation5 + $0x1c0] sm:$0xff]  ;;  %v472_v57 = vld [vmem:[#allocation5 + $0x1c8] sm:$0xff]  ;;  %v6929_v59 = vcombine.low %v463_v46, %v467_v47 }
  0xcc   : > { %v475_v55 = vld [vmem:[#allocation5 + $0x1e0] sm:$0xff]  ;;  %v476_v58 = vld [vmem:[#allocation5 + $0x1e8] sm:$0xff]  ;;  %v6931_v62 = vcombine.low %v464_v48, %v468_v49 }
  0xcd   : > { %v9219_v56 = vld [vmem:[%s9200_s28 + $0x4] ss:$8 sps:$4 sm:$0xff]   ;;  %v6938_v63 = vcombine.high %v471_v54, %v475_v55  ;;  %v6940_v0 = vcombine.high %v472_v57, %v476_v58  ;;  %v6937_v7 = vcombine.low %v471_v54, %v475_v55  ;;  %v6939_v9 = vcombine.low %v472_v57, %v476_v58 }
  0xce   : > { %2726 = vmatpush1.bf16.msra.mxu0 %v6905_v34  ;;  %2855 = vmatpush1.bf16.msra.mxu1 %v6907_v35  ;;  %v389_v60 = vshrl.u32 %v9219_v56, 16  ;;  %v392_v61 = vshll.u32 %v9219_v56, 16  ;;  %v479_v1 = vld [vmem:[#allocation5 + $0x200] sm:$0xff]  ;;  %v480_v4 = vld [vmem:[#allocation5 + $0x208] sm:$0xff] }
  0xcf   : > { %2727 = vmatprep.subr.bf16.mxu0 %v6914_v36  ;;  %2856 = vmatprep.subr.bf16.mxu1 %v6916_v37  ;;  %v483_v2 = vld [vmem:[#allocation5 + $0x220] sm:$0xff]  ;;  %v484_v5 = vld [vmem:[#allocation5 + $0x228] sm:$0xff] }
  0xd0   : > { %v391_v3 = vrot.slane %v389_v60, 7  ;;  %v6946_v10 = vcombine.high %v479_v1, %v483_v2  ;;  %v6948_v11 = vcombine.high %v480_v4, %v484_v5  ;;  %v487_v12 = vld [vmem:[#allocation5 + $0x240] sm:$0xff]  ;;  %v488_v15 = vld [vmem:[#allocation5 + $0x248] sm:$0xff]  ;;  %v6945_v17 = vcombine.low %v479_v1, %v483_v2 }
  0xd1   : > { %v491_v13 = vld [vmem:[#allocation5 + $0x260] sm:$0xff]  ;;  %v492_v16 = vld [vmem:[#allocation5 + $0x268] sm:$0xff]  ;;  %v6947_v18 = vcombine.low %v480_v4, %v484_v5 }
  0xd2   : > { %2728 = vmatpush1.bf16.msra.mxu0 %v6913_v42  ;;  %2857 = vmatpush1.bf16.msra.mxu1 %v6915_v43  ;;  %v394_v8 = vor.u32 %v392_v61, %v391_v3  ;;  %v6954_v19 = vcombine.high %v487_v12, %v491_v13  ;;  %v6956_v20 = vcombine.high %v488_v15, %v492_v16  ;;  %v495_v21 = vld [vmem:[#allocation5 + $0x280] sm:$0xff]  ;;  %v496_v23 = vld [vmem:[#allocation5 + $0x288] sm:$0xff] }
  0xd3   : > { %2729 = vmatprep.subr.bf16.mxu0 %v6922_v44  ;;  %2858 = vmatprep.subr.bf16.mxu1 %v6924_v45  ;;  %v499_v22 = vld [vmem:[#allocation5 + $0x2a0] sm:$0xff]  ;;  %v500_v24 = vld [vmem:[#allocation5 + $0x2a8] sm:$0xff]  ;;  %v6953_v25 = vcombine.low %v487_v12, %v491_v13  ;;  %v6955_v26 = vcombine.low %v488_v15, %v492_v16 }
  0xd4   : > { %v9234_v14 = vsel %vm9226_vm2, 0, %v394_v8  ;;  %v6962_v27 = vcombine.high %v495_v21, %v499_v22  ;;  %v6964_v28 = vcombine.high %v496_v23, %v500_v24  ;;  %v503_v29 = vld [vmem:[#allocation5 + $0x2c0] sm:$0xff]  ;;  %v504_v31 = vld [vmem:[#allocation5 + $0x2c8] sm:$0xff]  ;;  %v6961_v33 = vcombine.low %v495_v21, %v499_v22 }
  0xd5   : > { %2751 = vmatprep.mubr.bf16.mxu0 %v9234_v14  ;;  %2880 = vmatprep.mubr.bf16.mxu1 %v9234_v14  ;;  %v507_v30 = vld [vmem:[#allocation5 + $0x2e0] sm:$0xff]  ;;  %v508_v32 = vld [vmem:[#allocation5 + $0x2e8] sm:$0xff]  ;;  %v6963_v34 = vcombine.low %v496_v23, %v500_v24 }
  0xd6   : > { %2730 = vmatpush1.bf16.msra.mxu0 %v6921_v50  ;;  %2859 = vmatpush1.bf16.msra.mxu1 %v6923_v51  ;;  %v6970_v35 = vcombine.high %v503_v29, %v507_v30  ;;  %v6972_v36 = vcombine.high %v504_v31, %v508_v32  ;;  %v511_v37 = vld [vmem:[#allocation5 + $0x300] sm:$0xff]  ;;  %v512_v39 = vld [vmem:[#allocation5 + $0x308] sm:$0xff]  ;;  %v6969_v41 = vcombine.low %v503_v29, %v507_v30 }
  0xd7   : > { %2731 = vmatprep.subr.bf16.mxu0 %v6930_v52  ;;  %2860 = vmatprep.subr.bf16.mxu1 %v6932_v53  ;;  %v515_v38 = vld [vmem:[#allocation5 + $0x320] sm:$0xff]  ;;  %v516_v40 = vld [vmem:[#allocation5 + $0x328] sm:$0xff]  ;;  %v6971_v42 = vcombine.low %v504_v31, %v508_v32 }
  0xd8   : > { %v6978_v43 = vcombine.high %v511_v37, %v515_v38  ;;  %v6980_v44 = vcombine.high %v512_v39, %v516_v40  ;;  %v519_v45 = vld [vmem:[#allocation5 + $0x340] sm:$0xff]  ;;  %v520_v47 = vld [vmem:[#allocation5 + $0x348] sm:$0xff]  ;;  %v6977_v49 = vcombine.low %v511_v37, %v515_v38  ;;  %v6979_v51 = vcombine.low %v512_v39, %v516_v40 }
  0xd9   : > { %v523_v46 = vld [vmem:[#allocation5 + $0x360] sm:$0xff]  ;;  %v524_v48 = vld [vmem:[#allocation5 + $0x368] sm:$0xff] }
  0xda   : > { %2732 = vmatpush1.bf16.msra.mxu0 %v6929_v59  ;;  %2861 = vmatpush1.bf16.msra.mxu1 %v6931_v62  ;;  %v9239_v50 = vld [vmem:[%s9200_s28] ss:$8 sps:$4 sm:$0xff]   ;;  %v6986_v52 = vcombine.high %v519_v45, %v523_v46  ;;  %v6988_v53 = vcombine.high %v520_v47, %v524_v48  ;;  %v6985_v59 = vcombine.low %v519_v45, %v523_v46 }
  0xdb   : > { %2733 = vmatprep.subr.bf16.mxu0 %v6938_v63  ;;  %2862 = vmatprep.subr.bf16.mxu1 %v6940_v0  ;;  %v527_v54 = vld [vmem:[#allocation5 + $0x380] sm:$0xff]  ;;  %v528_v57 = vld [vmem:[#allocation5 + $0x388] sm:$0xff]  ;;  %v382_v62 = vshrl.u32 %v9239_v50, 16  ;;  %v6987_v63 = vcombine.low %v520_v47, %v524_v48 }
  0xdc   : > { %v531_v55 = vld [vmem:[#allocation5 + $0x3a0] sm:$0xff]  ;;  %v532_v58 = vld [vmem:[#allocation5 + $0x3a8] sm:$0xff] }
  0xdd   : > { %v6994_v0 = vcombine.high %v527_v54, %v531_v55  ;;  %v6996_v1 = vcombine.high %v528_v57, %v532_v58  ;;  %v535_v2 = vld [vmem:[#allocation5 + $0x3c0] sm:$0xff]  ;;  %v536_v4 = vld [vmem:[#allocation5 + $0x3c8] sm:$0xff]  ;;  %v384_v8 = vrot.slane %v382_v62, 7 }
  0xde   : > { %2734 = vmatpush1.bf16.msra.mxu0 %v6937_v7  ;;  %2863 = vmatpush1.bf16.msra.mxu1 %v6939_v9  ;;  %v539_v3 = vld [vmem:[#allocation5 + $0x3e0] sm:$0xff]  ;;  %v540_v5 = vld [vmem:[#allocation5 + $0x3e8] sm:$0xff]  ;;  %v6993_v7 = vcombine.low %v527_v54, %v531_v55  ;;  %v385_v9 = vshll.u32 %v9239_v50, 16 }
  0xdf   : > { %2735 = vmatprep.subr.bf16.mxu0 %v6946_v10  ;;  %2864 = vmatprep.subr.bf16.mxu1 %v6948_v11  ;;  %v6995_v10 = vcombine.low %v528_v57, %v532_v58  ;;  %v7002_v11 = vcombine.high %v535_v2, %v539_v3  ;;  %v7004_v12 = vcombine.high %v536_v4, %v540_v5  ;;  %v543_v13 = vld [vmem:[#allocation5 + $0x400] sm:$0xff]  ;;  %v544_v16 = vld [vmem:[#allocation5 + $0x408] sm:$0xff] }
  0xe0   : > { %v547_v15 = vld [vmem:[#allocation5 + $0x420] sm:$0xff]  ;;  %v564_v6 = vld [vmem:[#allocation5 + $0x4a8] sm:$0xff] }
  0xe1   : > { %v7010_v21 = vcombine.high %v543_v13, %v547_v15  ;;  %v551_v23 = vld [vmem:[#allocation5 + $0x440] sm:$0xff]  ;;  %v7009_v29 = vcombine.low %v543_v13, %v547_v15  ;;  %v600_v15 = vld [vmem:[#allocation5 + $0x5c8] sm:$0xff] }
  0xe2   : > { %2736 = vmatpush1.bf16.msra.mxu0 %v6945_v17  ;;  %2865 = vmatpush1.bf16.msra.mxu1 %v6947_v18  ;;  %v548_v17 = vld [vmem:[#allocation5 + $0x428] sm:$0xff]  ;;  %v7001_v18 = vcombine.low %v535_v2, %v539_v3  ;;  %v555_v24 = vld [vmem:[#allocation5 + $0x460] sm:$0xff] }
  0xe3   : > { %2737 = vmatprep.subr.bf16.mxu0 %v6954_v19  ;;  %2866 = vmatprep.subr.bf16.mxu1 %v6956_v20  ;;  %v387_v19 = vor.u32 %v385_v9, %v384_v8  ;;  %v7003_v20 = vcombine.low %v536_v4, %v540_v5  ;;  %v7012_v22 = vcombine.high %v544_v16, %v548_v17  ;;  %v575_v48 = vld [vmem:[#allocation5 + $0x500] sm:$0xff]  ;;  %v592_v5 = vld [vmem:[#allocation5 + $0x588] sm:$0xff] }
  0xe4   : > { %v7011_v31 = vcombine.low %v544_v16, %v548_v17  ;;  %v7018_v32 = vcombine.high %v551_v23, %v555_v24  ;;  %v7017_v38 = vcombine.low %v551_v23, %v555_v24  ;;  %v583_v58 = vld [vmem:[#allocation5 + $0x540] sm:$0xff]  ;;  %v596_v8 = vld [vmem:[#allocation5 + $0x5a8] sm:$0xff] }
  0xe5   : > { %v9247_v30 = vsel %vm9226_vm2, 0, %v387_v19  ;;  %v591_v3 = vld [vmem:[#allocation5 + $0x580] sm:$0xff]  ;;  %v7060_v16 = vcombine.high %v592_v5, %v596_v8  ;;  %v604_v17 = vld [vmem:[#allocation5 + $0x5e8] sm:$0xff]  ;;  %v7059_v19 = vcombine.low %v592_v5, %v596_v8 }
  0xe6   : > { %2738 = vmatpush1.bf16.msra.mxu0 %v6953_v25  ;;  %2867 = vmatpush1.bf16.msra.mxu1 %v6955_v26  ;;  %v552_v25 = vld [vmem:[#allocation5 + $0x448] sm:$0xff]  ;;  %v595_v4 = vld [vmem:[#allocation5 + $0x5a0] sm:$0xff]  ;;  %v7068_v24 = vcombine.high %v600_v15, %v604_v17 }
  0xe7   : > { %2739 = vmatprep.subr.bf16.mxu0 %v6962_v27  ;;  %2868 = vmatprep.subr.bf16.mxu1 %v6964_v28  ;;  %v556_v26 = vld [vmem:[#allocation5 + $0x468] sm:$0xff]  ;;  %v404_v27 = vrot.slane %v392_v61, 1  ;;  %v402_v28 = vrot.slane %v385_v9, 1  ;;  %v603_v13 = vld [vmem:[#allocation5 + $0x5e0] sm:$0xff] }
  0xe8   : > { %v560_v61 = vld [vmem:[#allocation5 + $0x488] sm:$0xff]  ;;  %v7019_v39 = vcombine.low %v552_v25, %v556_v26 }
  0xe9   : > { %v9253_v37 = vor.u32 %v402_v28, %v382_v62  ;;  %v7027_v46 = vcombine.low %v560_v61, %v564_v6  ;;  %v608_v23 = vld [vmem:[#allocation5 + $0x608] sm:$0xff] }
  0xea   : > { %2740 = vmatpush1.bf16.msra.mxu0 %v6961_v33  ;;  %2869 = vmatpush1.bf16.msra.mxu1 %v6963_v34  ;;  %v559_v33 = vld [vmem:[#allocation5 + $0x480] sm:$0xff]  ;;  %v9251_v34 = vor.u32 %v404_v27, %v389_v60  ;;  %v7067_v27 = vcombine.low %v600_v15, %v604_v17 }
  0xeb   : > { %2741 = vmatprep.subr.bf16.mxu0 %v6970_v35  ;;  %2870 = vmatprep.subr.bf16.mxu1 %v6972_v36  ;;  %v7020_v35 = vcombine.high %v552_v25, %v556_v26  ;;  %v563_v36 = vld [vmem:[#allocation5 + $0x4a0] sm:$0xff]  ;;  %v612_v25 = vld [vmem:[#allocation5 + $0x628] sm:$0xff] }
  0xec   : > { %v7026_v40 = vcombine.high %v559_v33, %v563_v36  ;;  %v571_v60 = vld [vmem:[#allocation5 + $0x4e0] sm:$0xff]  ;;  %v7025_v45 = vcombine.low %v559_v33, %v563_v36  ;;  %v7076_v33 = vcombine.high %v608_v23, %v612_v25 }
  0xee   : > { %2742 = vmatpush1.bf16.msra.mxu0 %v6969_v41  ;;  %2871 = vmatpush1.bf16.msra.mxu1 %v6971_v42  ;;  %v567_v41 = vld [vmem:[#allocation5 + $0x4c0] sm:$0xff]  ;;  %v568_v42 = vld [vmem:[#allocation5 + $0x4c8] sm:$0xff] }
  0xef   : > { %2743 = vmatprep.subr.bf16.mxu0 %v6978_v43  ;;  %2872 = vmatprep.subr.bf16.mxu1 %v6980_v44  ;;  %v7028_v43 = vcombine.high %v560_v61, %v564_v6  ;;  %v572_v44 = vld [vmem:[#allocation5 + $0x4e8] sm:$0xff]  ;;  %v7034_v47 = vcombine.high %v567_v41, %v571_v60  ;;  %v7033_v54 = vcombine.low %v567_v41, %v571_v60 }
  0xf0   : > { %v7035_v55 = vcombine.low %v568_v42, %v572_v44  ;;  %v7075_v61 = vcombine.low %v608_v23, %v612_v25  ;;  %v628_v60 = vld [vmem:[#allocation5 + $0x6a8] sm:$0xff] }
  0xf2   : > { %2744 = vmatpush1.bf16.msra.mxu0 %v6977_v49  ;;  %2873 = vmatpush1.bf16.msra.mxu1 %v6979_v51  ;;  %v579_v49 = vld [vmem:[#allocation5 + $0x520] sm:$0xff]  ;;  %v576_v51 = vld [vmem:[#allocation5 + $0x508] sm:$0xff] }
  0xf3   : > { %2745 = vmatprep.subr.bf16.mxu0 %v6986_v52  ;;  %2874 = vmatprep.subr.bf16.mxu1 %v6988_v53  ;;  %v7036_v52 = vcombine.high %v568_v42, %v572_v44  ;;  %v580_v53 = vld [vmem:[#allocation5 + $0x528] sm:$0xff]  ;;  %v7042_v57 = vcombine.high %v575_v48, %v579_v49 }
  0xf4   : > { %v7044_v62 = vcombine.high %v576_v51, %v580_v53 }
  0xf6   : > { %2746 = vmatpush1.bf16.msra.mxu0 %v6985_v59  ;;  %2875 = vmatpush1.bf16.msra.mxu1 %v6987_v63  ;;  %v584_v59 = vld [vmem:[#allocation5 + $0x548] sm:$0xff] }
  0xf7   : > { %2747 = vmatprep.subr.bf16.mxu0 %v6994_v0  ;;  %2876 = vmatprep.subr.bf16.mxu1 %v6996_v1  ;;  %v588_v63 = vld [vmem:[#allocation5 + $0x568] sm:$0xff]  ;;  %v7041_v0 = vcombine.low %v575_v48, %v579_v49  ;;  %v7043_v1 = vcombine.low %v576_v51, %v580_v53 }
  0xf8   : > { %v636_v49 = vld [vmem:[#allocation5 + $0x6e8] sm:$0xff] }
  0xfa   : > { %2748 = vmatpush1.bf16.msra.mxu0 %v6993_v7  ;;  %2877 = vmatpush1.bf16.msra.mxu1 %v6995_v10  ;;  %v7052_v7 = vcombine.high %v584_v59, %v588_v63  ;;  %v7051_v10 = vcombine.low %v584_v59, %v588_v63 }
  0xfb   : > { %2749 = vmatprep.subr.bf16.mxu0 %v7002_v11  ;;  %2878 = vmatprep.subr.bf16.mxu1 %v7004_v12  ;;  %v7058_v11 = vcombine.high %v591_v3, %v595_v4  ;;  %v599_v12 = vld [vmem:[#allocation5 + $0x5c0] sm:$0xff] }
  0xfc   : > { %v7065_v26 = vcombine.low %v599_v12, %v603_v13 }
  0xfe   : > { %2750 = vmatpush1.bf16.msra.mxu0 %v7001_v18  ;;  %2879 = vmatpush1.bf16.msra.mxu1 %v7003_v20  ;;  %v7057_v18 = vcombine.low %v591_v3, %v595_v4  ;;  %v7066_v20 = vcombine.high %v599_v12, %v603_v13  ;;  %v652_v4 = vld [vmem:[#allocation5 + $0x768] sm:$0xff] }
  0xff   : > { %2762 = vmatprep.subr.bf16.mxu0 %v7010_v21  ;;  %2891 = vmatprep.subr.bf16.mxu1 %v7012_v22  ;;  %v607_v21 = vld [vmem:[#allocation5 + $0x600] sm:$0xff]  ;;  %v660_v13 = vld [vmem:[#allocation5 + $0x7a8] sm:$0xff] }
 0x100   : > { %v611_v22 = vld [vmem:[#allocation5 + $0x620] sm:$0xff] }
 0x101   : > { %2752 = vmatmul.mubr.bf16.vlgmr.msra.gmra.mrb[0].mxu0 %v9247_v30  ;;  %2881 = vmatmul.mubr.bf16.vlgmr.msra.gmra.mrb[0].mxu1 %v9247_v30  ;;  %v7074_v28 = vcombine.high %v607_v21, %v611_v22  ;;  %v7073_v36 = vcombine.low %v607_v21, %v611_v22  ;;  %v668_v22 = vld [vmem:[#allocation5 + $0x7e8] sm:$0xff] }
 0x102   : > { %2763 = vmatpush1.bf16.msra.mxu0 %v7009_v29  ;;  %2892 = vmatpush1.bf16.msra.mxu1 %v7011_v31  ;;  %v615_v29 = vld [vmem:[#allocation5 + $0x640] sm:$0xff] }
 0x103   : > { %2764 = vmatprep.subr.bf16.mxu0 %v7018_v32  ;;  %2893 = vmatprep.subr.bf16.mxu1 %v7020_v35  ;;  %v619_v31 = vld [vmem:[#allocation5 + $0x660] sm:$0xff]  ;;  %v616_v32 = vld [vmem:[#allocation5 + $0x648] sm:$0xff] }
 0x104   : > { %2794 = vmatprep.mubr.bf16.mxu0 %v9219_v56  ;;  %2923 = vmatprep.mubr.bf16.mxu1 %v9219_v56  ;;  %v587_v56 = vld [vmem:[#allocation5 + $0x560] sm:$0xff]  ;;  %v620_v35 = vld [vmem:[#allocation5 + $0x668] sm:$0xff]  ;;  %v7082_v6 = vcombine.high %v615_v29, %v619_v31  ;;  %v7081_v42 = vcombine.low %v615_v29, %v619_v31 }
 0x105   : > { %v7050_v2 = vcombine.high %v583_v58, %v587_v56  ;;  %v7049_v9 = vcombine.low %v583_v58, %v587_v56  ;;  %v7084_v41 = vcombine.high %v616_v32, %v620_v35  ;;  %v644_v56 = vld [vmem:[#allocation5 + $0x728] sm:$0xff] }
 0x106   : > { %2765 = vmatpush1.bf16.msra.mxu0 %v7017_v38  ;;  %2894 = vmatpush1.bf16.msra.mxu1 %v7019_v39  ;;  %v623_v38 = vld [vmem:[#allocation5 + $0x680] sm:$0xff]  ;;  %v676_v31 = vld [vmem:[#allocation5 + $0x828] sm:$0xff] }
 0x107   : > { %2766 = vmatprep.subr.bf16.mxu0 %v7026_v40  ;;  %2895 = vmatprep.subr.bf16.mxu1 %v7028_v43  ;;  %v627_v39 = vld [vmem:[#allocation5 + $0x6a0] sm:$0xff]  ;;  %v624_v40 = vld [vmem:[#allocation5 + $0x688] sm:$0xff]  ;;  %v7083_v43 = vcombine.low %v616_v32, %v620_v35 }
 0x108   : > { %v7090_v44 = vcombine.high %v623_v38, %v627_v39  ;;  %v7092_v48 = vcombine.high %v624_v40, %v628_v60  ;;  %v7089_v51 = vcombine.low %v623_v38, %v627_v39  ;;  %v684_v38 = vld [vmem:[#allocation5 + $0x868] sm:$0xff] }
 0x10a   : > { %2767 = vmatpush1.bf16.msra.mxu0 %v7025_v45  ;;  %2896 = vmatpush1.bf16.msra.mxu1 %v7027_v46  ;;  %v631_v45 = vld [vmem:[#allocation5 + $0x6c0] sm:$0xff] }
 0x10b   : > { %2768 = vmatprep.subr.bf16.mxu0 %v7034_v47  ;;  %2897 = vmatprep.subr.bf16.mxu1 %v7036_v52  ;;  %v635_v46 = vld [vmem:[#allocation5 + $0x6e0] sm:$0xff]  ;;  %v632_v47 = vld [vmem:[#allocation5 + $0x6c8] sm:$0xff]  ;;  %v7091_v52 = vcombine.low %v624_v40, %v628_v60 }
 0x10c   : > { %v7098_v53 = vcombine.high %v631_v45, %v635_v46  ;;  %v7100_v58 = vcombine.high %v632_v47, %v636_v49  ;;  %v7097_v59 = vcombine.low %v631_v45, %v635_v46  ;;  %v688_v45 = vld [vmem:[#allocation5 + $0x888] sm:$0xff] }
 0x10e   : > { %2769 = vmatpush1.bf16.msra.mxu0 %v7033_v54  ;;  %2898 = vmatpush1.bf16.msra.mxu1 %v7035_v55  ;;  %v639_v54 = vld [vmem:[#allocation5 + $0x700] sm:$0xff] }
 0x10f   : > { %2770 = vmatprep.subr.bf16.mxu0 %v7042_v57  ;;  %2899 = vmatprep.subr.bf16.mxu1 %v7044_v62  ;;  %v643_v55 = vld [vmem:[#allocation5 + $0x720] sm:$0xff]  ;;  %v640_v57 = vld [vmem:[#allocation5 + $0x708] sm:$0xff]  ;;  %v7099_v62 = vcombine.low %v632_v47, %v636_v49 }
 0x110   : > { %v7106_v63 = vcombine.high %v639_v54, %v643_v55  ;;  %v7108_v3 = vcombine.high %v640_v57, %v644_v56  ;;  %v7105_v5 = vcombine.low %v639_v54, %v643_v55  ;;  %v692_v47 = vld [vmem:[#allocation5 + $0x8a8] sm:$0xff]  ;;  %v699_v54 = vld [vmem:[#allocation5 + $0x8e0] sm:$0xff] }
 0x111   : > { %v696_v55 = vld [vmem:[#allocation5 + $0x8c8] sm:$0xff] }
 0x112   : > { %2771 = vmatpush1.bf16.msra.mxu0 %v7041_v0  ;;  %2900 = vmatpush1.bf16.msra.mxu1 %v7043_v1  ;;  %v647_v0 = vld [vmem:[#allocation5 + $0x740] sm:$0xff] }
 0x113   : > { %2772 = vmatprep.subr.bf16.mxu0 %v7050_v2  ;;  %2901 = vmatprep.subr.bf16.mxu1 %v7052_v7  ;;  %v651_v1 = vld [vmem:[#allocation5 + $0x760] sm:$0xff]  ;;  %v648_v2 = vld [vmem:[#allocation5 + $0x748] sm:$0xff]  ;;  %v7107_v7 = vcombine.low %v640_v57, %v644_v56  ;;  %v7156_v57 = vcombine.high %v688_v45, %v692_v47 }
 0x114   : > { %v7114_v8 = vcombine.high %v647_v0, %v651_v1  ;;  %v7116_v12 = vcombine.high %v648_v2, %v652_v4  ;;  %v7113_v15 = vcombine.low %v647_v0, %v651_v1  ;;  %v708_v1 = vld [vmem:[#allocation5 + $0x928] sm:$0xff] }
 0x116   : > { %2773 = vmatpush1.bf16.msra.mxu0 %v7049_v9  ;;  %2902 = vmatpush1.bf16.msra.mxu1 %v7051_v10  ;;  %v655_v9 = vld [vmem:[#allocation5 + $0x780] sm:$0xff] }
 0x117   : > { %2774 = vmatprep.subr.bf16.mxu0 %v7058_v11  ;;  %2903 = vmatprep.subr.bf16.mxu1 %v7060_v16  ;;  %v659_v10 = vld [vmem:[#allocation5 + $0x7a0] sm:$0xff]  ;;  %v656_v11 = vld [vmem:[#allocation5 + $0x788] sm:$0xff]  ;;  %v7115_v16 = vcombine.low %v648_v2, %v652_v4 }
 0x118   : > { %v7122_v17 = vcombine.high %v655_v9, %v659_v10  ;;  %v7124_v21 = vcombine.high %v656_v11, %v660_v13  ;;  %v7121_v23 = vcombine.low %v655_v9, %v659_v10  ;;  %v716_v10 = vld [vmem:[#allocation5 + $0x968] sm:$0xff] }
 0x11a   : > { %2775 = vmatpush1.bf16.msra.mxu0 %v7057_v18  ;;  %2904 = vmatpush1.bf16.msra.mxu1 %v7059_v19  ;;  %v663_v18 = vld [vmem:[#allocation5 + $0x7c0] sm:$0xff] }
 0x11b   : > { %2776 = vmatprep.subr.bf16.mxu0 %v7066_v20  ;;  %2905 = vmatprep.subr.bf16.mxu1 %v7068_v24  ;;  %v667_v19 = vld [vmem:[#allocation5 + $0x7e0] sm:$0xff]  ;;  %v664_v20 = vld [vmem:[#allocation5 + $0x7c8] sm:$0xff]  ;;  %v7123_v24 = vcombine.low %v656_v11, %v660_v13 }
 0x11c   : > { %v7130_v25 = vcombine.high %v663_v18, %v667_v19  ;;  %v7132_v29 = vcombine.high %v664_v20, %v668_v22  ;;  %v7129_v32 = vcombine.low %v663_v18, %v667_v19  ;;  %v7131_v35 = vcombine.low %v664_v20, %v668_v22  ;;  %v724_v19 = vld [vmem:[#allocation5 + $0x9a8] sm:$0xff] }
 0x11e   : > { %2777 = vmatpush1.bf16.msra.mxu0 %v7065_v26  ;;  %2906 = vmatpush1.bf16.msra.mxu1 %v7067_v27  ;;  %v671_v26 = vld [vmem:[#allocation5 + $0x800] sm:$0xff] }
 0x11f   : > { %2778 = vmatprep.subr.bf16.mxu0 %v7074_v28  ;;  %2907 = vmatprep.subr.bf16.mxu1 %v7076_v33  ;;  %v675_v27 = vld [vmem:[#allocation5 + $0x820] sm:$0xff]  ;;  %v672_v28 = vld [vmem:[#allocation5 + $0x808] sm:$0xff] }
 0x120   : > { %v679_v33 = vld [vmem:[#allocation5 + $0x840] sm:$0xff]  ;;  %v7140_v39 = vcombine.high %v672_v28, %v676_v31  ;;  %v7139_v60 = vcombine.low %v672_v28, %v676_v31 }
 0x122   : > { %2779 = vmatpush1.bf16.msra.mxu0 %v7073_v36  ;;  %2908 = vmatpush1.bf16.msra.mxu1 %v7075_v61  ;;  %v7138_v36 = vcombine.high %v671_v26, %v675_v27  ;;  %v683_v61 = vld [vmem:[#allocation5 + $0x860] sm:$0xff] }
 0x123   : > { %2780 = vmatprep.subr.bf16.mxu0 %v7082_v6  ;;  %2909 = vmatprep.subr.bf16.mxu1 %v7084_v41  ;;  %v680_v6 = vld [vmem:[#allocation5 + $0x848] sm:$0xff]  ;;  %v7137_v41 = vcombine.low %v671_v26, %v675_v27  ;;  %v7145_v49 = vcombine.low %v679_v33, %v683_v61 }
 0x124   : > { %v7148_v46 = vcombine.high %v680_v6, %v684_v38  ;;  %v732_v27 = vld [vmem:[#allocation5 + $0x9e8] sm:$0xff] }
 0x126   : > { %2781 = vmatpush1.bf16.msra.mxu0 %v7081_v42  ;;  %2910 = vmatpush1.bf16.msra.mxu1 %v7083_v43  ;;  %v7146_v42 = vcombine.high %v679_v33, %v683_v61  ;;  %v687_v43 = vld [vmem:[#allocation5 + $0x880] sm:$0xff]  ;;  %v740_v61 = vld [vmem:[#allocation5 + $0xa28] sm:$0xff] }
 0x127   : > { %2782 = vmatprep.subr.bf16.mxu0 %v7090_v44  ;;  %2911 = vmatprep.subr.bf16.mxu1 %v7092_v48  ;;  %v691_v44 = vld [vmem:[#allocation5 + $0x8a0] sm:$0xff]  ;;  %v9267_v48 = vsel %vm9259_vm5, %v9251_v34, 0 }
 0x128   : > { %v7153_v34 = vcombine.low %v687_v43, %v691_v44  ;;  %v739_v33 = vld [vmem:[#allocation5 + $0xa20] sm:$0xff] }
 0x12a   : > { %2783 = vmatpush1.bf16.msra.mxu0 %v7089_v51  ;;  %2912 = vmatpush1.bf16.msra.mxu1 %v7091_v52  ;;  %v7147_v51 = vcombine.low %v680_v6, %v684_v38  ;;  %v7154_v52 = vcombine.high %v687_v43, %v691_v44  ;;  %v748_v44 = vld [vmem:[#allocation5 + $0xa68] sm:$0xff] }
 0x12b   : > { %2784 = vmatprep.subr.bf16.mxu0 %v7098_v53  ;;  %2913 = vmatprep.subr.bf16.mxu1 %v7100_v58  ;;  %v695_v53 = vld [vmem:[#allocation5 + $0x8c0] sm:$0xff]  ;;  %v700_v58 = vld [vmem:[#allocation5 + $0x8e8] sm:$0xff] }
 0x12c   : > { %v7162_v56 = vcombine.high %v695_v53, %v699_v54  ;;  %v7164_v0 = vcombine.high %v696_v55, %v700_v58  ;;  %v7161_v2 = vcombine.low %v695_v53, %v699_v54  ;;  %v756_v54 = vld [vmem:[#allocation5 + $0xaa8] sm:$0xff] }
 0x12e   : > { %2785 = vmatpush1.bf16.msra.mxu0 %v7097_v59  ;;  %2914 = vmatpush1.bf16.msra.mxu1 %v7099_v62  ;;  %v703_v59 = vld [vmem:[#allocation5 + $0x900] sm:$0xff] }
 0x12f   : > { %2786 = vmatprep.subr.bf16.mxu0 %v7106_v63  ;;  %2915 = vmatprep.subr.bf16.mxu1 %v7108_v3  ;;  %v707_v62 = vld [vmem:[#allocation5 + $0x920] sm:$0xff]  ;;  %v704_v63 = vld [vmem:[#allocation5 + $0x908] sm:$0xff]  ;;  %v7163_v3 = vcombine.low %v696_v55, %v700_v58 }
 0x130   : > { %v7170_v4 = vcombine.high %v703_v59, %v707_v62  ;;  %v7172_v9 = vcombine.high %v704_v63, %v708_v1  ;;  %v7169_v11 = vcombine.low %v703_v59, %v707_v62  ;;  %v764_v62 = vld [vmem:[#allocation5 + $0xae8] sm:$0xff] }
 0x132   : > { %2787 = vmatpush1.bf16.msra.mxu0 %v7105_v5  ;;  %2916 = vmatpush1.bf16.msra.mxu1 %v7107_v7  ;;  %v711_v5 = vld [vmem:[#allocation5 + $0x940] sm:$0xff] }
 0x133   : > { %2788 = vmatprep.subr.bf16.mxu0 %v7114_v8  ;;  %2917 = vmatprep.subr.bf16.mxu1 %v7116_v12  ;;  %v715_v7 = vld [vmem:[#allocation5 + $0x960] sm:$0xff]  ;;  %v712_v8 = vld [vmem:[#allocation5 + $0x948] sm:$0xff]  ;;  %v7171_v12 = vcombine.low %v704_v63, %v708_v1 }
 0x134   : > { %v7178_v13 = vcombine.high %v711_v5, %v715_v7  ;;  %v7180_v18 = vcombine.high %v712_v8, %v716_v10  ;;  %v7177_v20 = vcombine.low %v711_v5, %v715_v7  ;;  %v772_v7 = vld [vmem:[#allocation5 + $0xb28] sm:$0xff] }
 0x136   : > { %2789 = vmatpush1.bf16.msra.mxu0 %v7113_v15  ;;  %2918 = vmatpush1.bf16.msra.mxu1 %v7115_v16  ;;  %v719_v15 = vld [vmem:[#allocation5 + $0x980] sm:$0xff] }
 0x137   : > { %2790 = vmatprep.subr.bf16.mxu0 %v7122_v17  ;;  %2919 = vmatprep.subr.bf16.mxu1 %v7124_v21  ;;  %v723_v16 = vld [vmem:[#allocation5 + $0x9a0] sm:$0xff]  ;;  %v720_v17 = vld [vmem:[#allocation5 + $0x988] sm:$0xff]  ;;  %v7179_v21 = vcombine.low %v712_v8, %v716_v10 }
 0x138   : > { %v7186_v22 = vcombine.high %v719_v15, %v723_v16  ;;  %v7188_v26 = vcombine.high %v720_v17, %v724_v19  ;;  %v7185_v28 = vcombine.low %v719_v15, %v723_v16  ;;  %v780_v16 = vld [vmem:[#allocation5 + $0xb68] sm:$0xff] }
 0x13a   : > { %2791 = vmatpush1.bf16.msra.mxu0 %v7121_v23  ;;  %2920 = vmatpush1.bf16.msra.mxu1 %v7123_v24  ;;  %v727_v23 = vld [vmem:[#allocation5 + $0x9c0] sm:$0xff] }
 0x13b   : > { %2792 = vmatprep.subr.bf16.mxu0 %v7130_v25  ;;  %2921 = vmatprep.subr.bf16.mxu1 %v7132_v29  ;;  %v731_v24 = vld [vmem:[#allocation5 + $0x9e0] sm:$0xff]  ;;  %v728_v25 = vld [vmem:[#allocation5 + $0x9c8] sm:$0xff]  ;;  %v7187_v29 = vcombine.low %v720_v17, %v724_v19 }
 0x13c   : > { %v7194_v31 = vcombine.high %v727_v23, %v731_v24  ;;  %v7193_v6 = vcombine.low %v727_v23, %v731_v24  ;;  %v7195_v38 = vcombine.low %v728_v25, %v732_v27  ;;  %v788_v24 = vld [vmem:[#allocation5 + $0xba8] sm:$0xff] }
 0x13e   : > { %2793 = vmatpush1.bf16.msra.mxu0 %v7129_v32  ;;  %2922 = vmatpush1.bf16.msra.mxu1 %v7131_v35  ;;  %v735_v32 = vld [vmem:[#allocation5 + $0xa00] sm:$0xff]  ;;  %v736_v35 = vld [vmem:[#allocation5 + $0xa08] sm:$0xff] }
 0x13f   : > { %2805 = vmatprep.subr.bf16.mxu0 %v7138_v36  ;;  %2934 = vmatprep.subr.bf16.mxu1 %v7140_v39  ;;  %v7196_v36 = vcombine.high %v728_v25, %v732_v27  ;;  %v7202_v39 = vcombine.high %v735_v32, %v739_v33  ;;  %v7204_v43 = vcombine.high %v736_v35, %v740_v61 }
 0x141   : > { %2795 = vmatmul.mubr.bf16.vlgmr.msra.gmra.mrb[0].mxu0 %v9239_v50  ;;  %2924 = vmatmul.mubr.bf16.vlgmr.msra.gmra.mrb[0].mxu1 %v9239_v50  ;;  %v7155_v50 = vcombine.low %v688_v45, %v692_v47  ;;  %v7201_v45 = vcombine.low %v735_v32, %v739_v33  ;;  %v796_v33 = vld [vmem:[#allocation5 + $0xbe8] sm:$0xff] }
 0x142   : > { %2806 = vmatpush1.bf16.msra.mxu0 %v7137_v41  ;;  %2935 = vmatpush1.bf16.msra.mxu1 %v7139_v60  ;;  %v743_v41 = vld [vmem:[#allocation5 + $0xa40] sm:$0xff] }
 0x143   : > { %2807 = vmatprep.subr.bf16.mxu0 %v7146_v42  ;;  %2936 = vmatprep.subr.bf16.mxu1 %v7148_v46  ;;  %v747_v60 = vld [vmem:[#allocation5 + $0xa60] sm:$0xff]  ;;  %v744_v42 = vld [vmem:[#allocation5 + $0xa48] sm:$0xff]  ;;  %v7203_v46 = vcombine.low %v736_v35, %v740_v61 }
 0x144   : > { %2837 = vmatprep.mubr.bf16.mxu0 %v9267_v48  ;;  %2966 = vmatprep.mubr.bf16.mxu1 %v9267_v48  ;;  %v7210_v47 = vcombine.high %v743_v41, %v747_v60  ;;  %v7212_v53 = vcombine.high %v744_v42, %v748_v44  ;;  %v7209_v55 = vcombine.low %v743_v41, %v747_v60  ;;  %v422_v60 = vld [vmem:[#allocation5 + $0x38] sm:$0xff] }
 0x146   : > { %2808 = vmatpush1.bf16.msra.mxu0 %v7145_v49  ;;  %2937 = vmatpush1.bf16.msra.mxu1 %v7147_v51  ;;  %v751_v49 = vld [vmem:[#allocation5 + $0xa80] sm:$0xff] }
 0x147   : > { %2809 = vmatprep.subr.bf16.mxu0 %v7154_v52  ;;  %2938 = vmatprep.subr.bf16.mxu1 %v7156_v57  ;;  %v755_v51 = vld [vmem:[#allocation5 + $0xaa0] sm:$0xff]  ;;  %v752_v52 = vld [vmem:[#allocation5 + $0xa88] sm:$0xff]  ;;  %v7211_v57 = vcombine.low %v744_v42, %v748_v44 }
 0x148   : > { %v7218_v58 = vcombine.high %v751_v49, %v755_v51  ;;  %v7220_v59 = vcombine.high %v752_v52, %v756_v54  ;;  %v7217_v63 = vcombine.low %v751_v49, %v755_v51  ;;  %v430_v51 = vld [vmem:[#allocation5 + $0x78] sm:$0xff] }
 0x14a   : > { %2810 = vmatpush1.bf16.msra.mxu0 %v7153_v34  ;;  %2939 = vmatpush1.bf16.msra.mxu1 %v7155_v50  ;;  %v759_v34 = vld [vmem:[#allocation5 + $0xac0] sm:$0xff] }
 0x14b   : > { %2811 = vmatprep.subr.bf16.mxu0 %v7162_v56  ;;  %2940 = vmatprep.subr.bf16.mxu1 %v7164_v0  ;;  %v763_v50 = vld [vmem:[#allocation5 + $0xae0] sm:$0xff]  ;;  %v760_v56 = vld [vmem:[#allocation5 + $0xac8] sm:$0xff]  ;;  %v7219_v0 = vcombine.low %v752_v52, %v756_v54  ;;  %v9275_v52 = vsel %vm9259_vm5, %v9253_v37, 0 }
 0x14c   : > { %v7226_v1 = vcombine.high %v759_v34, %v763_v50  ;;  %v7228_v5 = vcombine.high %v760_v56, %v764_v62  ;;  %v7225_v8 = vcombine.low %v759_v34, %v763_v50  ;;  %v434_v34 = vld [vmem:[#allocation5 + $0x98] sm:$0xff] }
 0x14e   : > { %2812 = vmatpush1.bf16.msra.mxu0 %v7161_v2  ;;  %2941 = vmatpush1.bf16.msra.mxu1 %v7163_v3  ;;  %v767_v2 = vld [vmem:[#allocation5 + $0xb00] sm:$0xff] }
 0x14f   : > { %2813 = vmatprep.subr.bf16.mxu0 %v7170_v4  ;;  %2942 = vmatprep.subr.bf16.mxu1 %v7172_v9  ;;  %v771_v3 = vld [vmem:[#allocation5 + $0xb20] sm:$0xff]  ;;  %v768_v4 = vld [vmem:[#allocation5 + $0xb08] sm:$0xff]  ;;  %v7227_v9 = vcombine.low %v760_v56, %v764_v62  ;;  %v438_v56 = vld [vmem:[#allocation5 + $0xb8] sm:$0xff] }
 0x150   : > { %v7234_v10 = vcombine.high %v767_v2, %v771_v3  ;;  %v7236_v15 = vcombine.high %v768_v4, %v772_v7  ;;  %v7233_v17 = vcombine.low %v767_v2, %v771_v3  ;;  %v441_v62 = vld [vmem:[#allocation5 + $0xd0] sm:$0xff]  ;;  %v446_v2 = vld [vmem:[#allocation5 + $0xf8] sm:$0xff] }
 0x152   : > { %2814 = vmatpush1.bf16.msra.mxu0 %v7169_v11  ;;  %2943 = vmatpush1.bf16.msra.mxu1 %v7171_v12  ;;  %v775_v11 = vld [vmem:[#allocation5 + $0xb40] sm:$0xff] }
 0x153   : > { %2815 = vmatprep.subr.bf16.mxu0 %v7178_v13  ;;  %2944 = vmatprep.subr.bf16.mxu1 %v7180_v18  ;;  %v779_v12 = vld [vmem:[#allocation5 + $0xb60] sm:$0xff]  ;;  %v776_v13 = vld [vmem:[#allocation5 + $0xb48] sm:$0xff]  ;;  %v7235_v18 = vcombine.low %v768_v4, %v772_v7  ;;  %v6903_v4 = vcombine.low %v434_v34, %v438_v56  ;;  %v449_v7 = vld [vmem:[#allocation5 + $0x110] sm:$0xff] }
 0x154   : > { %v7242_v19 = vcombine.high %v775_v11, %v779_v12  ;;  %v7244_v23 = vcombine.high %v776_v13, %v780_v16  ;;  %v7241_v25 = vcombine.low %v775_v11, %v779_v12  ;;  %v454_v11 = vld [vmem:[#allocation5 + $0x138] sm:$0xff] }
 0x156   : > { %2816 = vmatpush1.bf16.msra.mxu0 %v7177_v20  ;;  %2945 = vmatpush1.bf16.msra.mxu1 %v7179_v21  ;;  %v783_v20 = vld [vmem:[#allocation5 + $0xb80] sm:$0xff] }
 0x157   : > { %2817 = vmatprep.subr.bf16.mxu0 %v7186_v22  ;;  %2946 = vmatprep.subr.bf16.mxu1 %v7188_v26  ;;  %v787_v21 = vld [vmem:[#allocation5 + $0xba0] sm:$0xff]  ;;  %v784_v22 = vld [vmem:[#allocation5 + $0xb88] sm:$0xff]  ;;  %v7243_v26 = vcombine.low %v776_v13, %v780_v16  ;;  %v457_v16 = vld [vmem:[#allocation5 + $0x150] sm:$0xff] }
 0x158   : > { %v7250_v27 = vcombine.high %v783_v20, %v787_v21  ;;  %v7252_v32 = vcombine.high %v784_v22, %v788_v24  ;;  %v7249_v35 = vcombine.low %v783_v20, %v787_v21 }
 0x15a   : > { %2818 = vmatpush1.bf16.msra.mxu0 %v7185_v28  ;;  %2947 = vmatpush1.bf16.msra.mxu1 %v7187_v29  ;;  %v791_v28 = vld [vmem:[#allocation5 + $0xbc0] sm:$0xff] }
 0x15b   : > { %2819 = vmatprep.subr.bf16.mxu0 %v7194_v31  ;;  %2948 = vmatprep.subr.bf16.mxu1 %v7196_v36  ;;  %v795_v29 = vld [vmem:[#allocation5 + $0xbe0] sm:$0xff]  ;;  %v792_v31 = vld [vmem:[#allocation5 + $0xbc8] sm:$0xff]  ;;  %v7251_v36 = vcombine.low %v784_v22, %v788_v24  ;;  %v469_v24 = vld [vmem:[#allocation5 + $0x1b0] sm:$0xff] }
 0x15c   : > { %v7258_v61 = vcombine.high %v791_v28, %v795_v29  ;;  %v7260_v41 = vcombine.high %v792_v31, %v796_v33  ;;  %v7257_v42 = vcombine.low %v791_v28, %v795_v29 }
 0x15e   : > { %2820 = vmatpush1.bf16.msra.mxu0 %v7193_v6  ;;  %2949 = vmatpush1.bf16.msra.mxu1 %v7195_v38  ;;  %v417_v6 = vld [vmem:[#allocation5 + $0x10] sm:$0xff] }
 0x15f   : > { %2821 = vmatprep.subr.bf16.mxu0 %v7202_v39  ;;  %2950 = vmatprep.subr.bf16.mxu1 %v7204_v43  ;;  %v421_v38 = vld [vmem:[#allocation5 + $0x30] sm:$0xff]  ;;  %v418_v39 = vld [vmem:[#allocation5 + $0x18] sm:$0xff]  ;;  %v7259_v43 = vcombine.low %v792_v31, %v796_v33 }
 0x160   : > { %v6886_v44 = vcombine.high %v417_v6, %v421_v38  ;;  %v6888_v49 = vcombine.high %v418_v39, %v422_v60  ;;  %v6887_v54 = vcombine.low %v418_v39, %v422_v60  ;;  %v477_v33 = vld [vmem:[#allocation5 + $0x1f0] sm:$0xff] }
 0x161   : > { %v485_v60 = vld [vmem:[#allocation5 + $0x230] sm:$0xff] }
 0x162   : > { %2822 = vmatpush1.bf16.msra.mxu0 %v7201_v45  ;;  %2951 = vmatpush1.bf16.msra.mxu1 %v7203_v46  ;;  %v425_v45 = vld [vmem:[#allocation5 + $0x50] sm:$0xff] }
 0x163   : > { %2823 = vmatprep.subr.bf16.mxu0 %v7210_v47  ;;  %2952 = vmatprep.subr.bf16.mxu1 %v7212_v53  ;;  %v429_v46 = vld [vmem:[#allocation5 + $0x70] sm:$0xff]  ;;  %v426_v47 = vld [vmem:[#allocation5 + $0x58] sm:$0xff]  ;;  %v6885_v53 = vcombine.low %v417_v6, %v421_v38 }
 0x164   : > { %v6896_v50 = vcombine.high %v426_v47, %v430_v51  ;;  %v6895_v37 = vcombine.low %v426_v47, %v430_v51  ;;  %v493_v51 = vld [vmem:[#allocation5 + $0x270] sm:$0xff] }
 0x166   : > { %2824 = vmatpush1.bf16.msra.mxu0 %v7209_v55  ;;  %2953 = vmatpush1.bf16.msra.mxu1 %v7211_v57  ;;  %v6894_v55 = vcombine.high %v425_v45, %v429_v46  ;;  %v433_v57 = vld [vmem:[#allocation5 + $0x90] sm:$0xff] }
 0x167   : > { %2825 = vmatprep.subr.bf16.mxu0 %v7218_v58  ;;  %2954 = vmatprep.subr.bf16.mxu1 %v7220_v59  ;;  %v437_v58 = vld [vmem:[#allocation5 + $0xb0] sm:$0xff]  ;;  %v6893_v59 = vcombine.low %v425_v45, %v429_v46 }
 0x168   : > { %v6902_v40 = vcombine.high %v433_v57, %v437_v58  ;;  %v6901_v3 = vcombine.low %v433_v57, %v437_v58 }
 0x16a   : > { %2826 = vmatpush1.bf16.msra.mxu0 %v7217_v63  ;;  %2955 = vmatpush1.bf16.msra.mxu1 %v7219_v0  ;;  %v445_v63 = vld [vmem:[#allocation5 + $0xf0] sm:$0xff]  ;;  %v442_v0 = vld [vmem:[#allocation5 + $0xd8] sm:$0xff] }
 0x16b   : > { %2827 = vmatprep.subr.bf16.mxu0 %v7226_v1  ;;  %2956 = vmatprep.subr.bf16.mxu1 %v7228_v5  ;;  %v6904_v1 = vcombine.high %v434_v34, %v438_v56  ;;  %v6910_v5 = vcombine.high %v441_v62, %v445_v63  ;;  %v6909_v12 = vcombine.low %v441_v62, %v445_v63  ;;  %v501_v56 = vld [vmem:[#allocation5 + $0x2b0] sm:$0xff] }
 0x16c   : > { %v6911_v13 = vcombine.low %v442_v0, %v446_v2 }
 0x16e   : > { %2828 = vmatpush1.bf16.msra.mxu0 %v7225_v8  ;;  %2957 = vmatpush1.bf16.msra.mxu1 %v7227_v9  ;;  %v453_v8 = vld [vmem:[#allocation5 + $0x130] sm:$0xff]  ;;  %v450_v9 = vld [vmem:[#allocation5 + $0x118] sm:$0xff] }
 0x16f   : > { %2829 = vmatprep.subr.bf16.mxu0 %v7234_v10  ;;  %2958 = vmatprep.subr.bf16.mxu1 %v7236_v15  ;;  %v6912_v10 = vcombine.high %v442_v0, %v446_v2  ;;  %v6918_v15 = vcombine.high %v449_v7, %v453_v8  ;;  %v6917_v20 = vcombine.low %v449_v7, %v453_v8  ;;  %v509_v2 = vld [vmem:[#allocation5 + $0x2f0] sm:$0xff] }
 0x170   : > { %v6919_v21 = vcombine.low %v450_v9, %v454_v11 }
 0x172   : > { %2830 = vmatpush1.bf16.msra.mxu0 %v7233_v17  ;;  %2959 = vmatpush1.bf16.msra.mxu1 %v7235_v18  ;;  %v458_v17 = vld [vmem:[#allocation5 + $0x158] sm:$0xff]  ;;  %v6920_v18 = vcombine.high %v450_v9, %v454_v11  ;;  %v517_v11 = vld [vmem:[#allocation5 + $0x330] sm:$0xff] }
 0x173   : > { %2831 = vmatprep.subr.bf16.mxu0 %v7242_v19  ;;  %2960 = vmatprep.subr.bf16.mxu1 %v7244_v23  ;;  %v462_v19 = vld [vmem:[#allocation5 + $0x178] sm:$0xff]  ;;  %v465_v23 = vld [vmem:[#allocation5 + $0x190] sm:$0xff] }
 0x174   : > { %v6927_v29 = vcombine.low %v458_v17, %v462_v19  ;;  %v6934_v31 = vcombine.high %v465_v23, %v469_v24  ;;  %v6933_v6 = vcombine.low %v465_v23, %v469_v24 }
 0x176   : > { %2832 = vmatpush1.bf16.msra.mxu0 %v7241_v25  ;;  %2961 = vmatpush1.bf16.msra.mxu1 %v7243_v26  ;;  %v466_v25 = vld [vmem:[#allocation5 + $0x198] sm:$0xff]  ;;  %v6928_v26 = vcombine.high %v458_v17, %v462_v19  ;;  %v525_v19 = vld [vmem:[#allocation5 + $0x370] sm:$0xff] }
 0x177   : > { %2833 = vmatprep.subr.bf16.mxu0 %v7250_v27  ;;  %2962 = vmatprep.subr.bf16.mxu1 %v7252_v32  ;;  %v470_v27 = vld [vmem:[#allocation5 + $0x1b8] sm:$0xff]  ;;  %v473_v32 = vld [vmem:[#allocation5 + $0x1d0] sm:$0xff] }
 0x178   : > { %v6935_v38 = vcombine.low %v466_v25, %v470_v27  ;;  %v6942_v39 = vcombine.high %v473_v32, %v477_v33  ;;  %v6941_v45 = vcombine.low %v473_v32, %v477_v33 }
 0x17a   : > { %2834 = vmatpush1.bf16.msra.mxu0 %v7249_v35  ;;  %2963 = vmatpush1.bf16.msra.mxu1 %v7251_v36  ;;  %v474_v35 = vld [vmem:[#allocation5 + $0x1d8] sm:$0xff]  ;;  %v6936_v36 = vcombine.high %v466_v25, %v470_v27  ;;  %v533_v27 = vld [vmem:[#allocation5 + $0x3b0] sm:$0xff] }
 0x17b   : > { %2835 = vmatprep.subr.bf16.mxu0 %v7258_v61  ;;  %2964 = vmatprep.subr.bf16.mxu1 %v7260_v41  ;;  %v478_v61 = vld [vmem:[#allocation5 + $0x1f8] sm:$0xff]  ;;  %v481_v41 = vld [vmem:[#allocation5 + $0x210] sm:$0xff] }
 0x17c   : > { %v6943_v46 = vcombine.low %v474_v35, %v478_v61  ;;  %v6950_v47 = vcombine.high %v481_v41, %v485_v60  ;;  %v6949_v57 = vcombine.low %v481_v41, %v485_v60 }
 0x17e   : > { %2836 = vmatpush1.bf16.msra.mxu0 %v7257_v42  ;;  %2965 = vmatpush1.bf16.msra.mxu1 %v7259_v43  ;;  %v482_v42 = vld [vmem:[#allocation5 + $0x218] sm:$0xff]  ;;  %v6944_v43 = vcombine.high %v474_v35, %v478_v61  ;;  %v541_v61 = vld [vmem:[#allocation5 + $0x3f0] sm:$0xff] }
 0x17f   : > { %2977 = vmatprep.subr.bf16.mxu0 %v6886_v44  ;;  %3106 = vmatprep.subr.bf16.mxu1 %v6888_v49  ;;  %v486_v44 = vld [vmem:[#allocation5 + $0x238] sm:$0xff]  ;;  %v489_v49 = vld [vmem:[#allocation5 + $0x250] sm:$0xff] }
 0x180   : > { %v6951_v58 = vcombine.low %v482_v42, %v486_v44  ;;  %v6958_v34 = vcombine.high %v489_v49, %v493_v51  ;;  %v6957_v62 = vcombine.low %v489_v49, %v493_v51 }
 0x181   : > { %2838 = vmatmul.mubr.bf16.vlgmr.msra.gmra.mrb[0].mxu0 %v9275_v52  ;;  %2967 = vmatmul.mubr.bf16.vlgmr.msra.gmra.mrb[0].mxu1 %v9275_v52 }
 0x182   : > { %2978 = vmatpush1.bf16.msra.mxu0 %v6885_v53  ;;  %3107 = vmatpush1.bf16.msra.mxu1 %v6887_v54  ;;  %v490_v53 = vld [vmem:[#allocation5 + $0x258] sm:$0xff]  ;;  %v6952_v54 = vcombine.high %v482_v42, %v486_v44  ;;  %v549_v44 = vld [vmem:[#allocation5 + $0x430] sm:$0xff] }
 0x183   : > { %2979 = vmatprep.subr.bf16.mxu0 %v6894_v55  ;;  %3108 = vmatprep.subr.bf16.mxu1 %v6896_v50  ;;  %v494_v55 = vld [vmem:[#allocation5 + $0x278] sm:$0xff]  ;;  %v497_v50 = vld [vmem:[#allocation5 + $0x290] sm:$0xff] }
 0x184   : > { %3009 = vmatprep.mubr.bf16.mxu0 %v9234_v14  ;;  %3138 = vmatprep.mubr.bf16.mxu1 %v9234_v14  ;;  %v461_v14 = vld [vmem:[#allocation5 + $0x170] sm:$0xff]  ;;  %v6959_v63 = vcombine.low %v490_v53, %v494_v55  ;;  %v6966_v0 = vcombine.high %v497_v50, %v501_v56  ;;  %v6965_v7 = vcombine.low %v497_v50, %v501_v56 }
 0x185   : > { %v6926_v22 = vcombine.high %v457_v16, %v461_v14  ;;  %v6925_v28 = vcombine.low %v457_v16, %v461_v14 }
 0x186   : > { %2980 = vmatpush1.bf16.msra.mxu0 %v6893_v59  ;;  %3109 = vmatpush1.bf16.msra.mxu1 %v6895_v37  ;;  %v498_v59 = vld [vmem:[#allocation5 + $0x298] sm:$0xff]  ;;  %v6960_v37 = vcombine.high %v490_v53, %v494_v55  ;;  %v557_v55 = vld [vmem:[#allocation5 + $0x470] sm:$0xff] }
 0x187   : > { %2981 = vmatprep.subr.bf16.mxu0 %v6902_v40  ;;  %3110 = vmatprep.subr.bf16.mxu1 %v6904_v1  ;;  %v502_v40 = vld [vmem:[#allocation5 + $0x2b8] sm:$0xff]  ;;  %v505_v1 = vld [vmem:[#allocation5 + $0x2d0] sm:$0xff] }
 0x188   : > { %v6967_v8 = vcombine.low %v498_v59, %v502_v40  ;;  %v6974_v9 = vcombine.high %v505_v1, %v509_v2  ;;  %v6973_v16 = vcombine.low %v505_v1, %v509_v2 }
 0x18a   : > { %2982 = vmatpush1.bf16.msra.mxu0 %v6901_v3  ;;  %3111 = vmatpush1.bf16.msra.mxu1 %v6903_v4  ;;  %v506_v3 = vld [vmem:[#allocation5 + $0x2d8] sm:$0xff]  ;;  %v6968_v4 = vcombine.high %v498_v59, %v502_v40  ;;  %v561_v40 = vld [vmem:[#allocation5 + $0x490] sm:$0xff] }
 0x18b   : > { %2983 = vmatprep.subr.bf16.mxu0 %v6910_v5  ;;  %3112 = vmatprep.subr.bf16.mxu1 %v6912_v10  ;;  %v510_v5 = vld [vmem:[#allocation5 + $0x2f8] sm:$0xff]  ;;  %v513_v10 = vld [vmem:[#allocation5 + $0x310] sm:$0xff] }
 0x18c   : > { %v6975_v14 = vcombine.low %v506_v3, %v510_v5  ;;  %v6982_v17 = vcombine.high %v513_v10, %v517_v11  ;;  %v6981_v23 = vcombine.low %v513_v10, %v517_v11  ;;  %v574_v10 = vld [vmem:[#allocation5 + $0x4f8] sm:$0xff] }
 0x18e   : > { %2984 = vmatpush1.bf16.msra.mxu0 %v6909_v12  ;;  %3113 = vmatpush1.bf16.msra.mxu1 %v6911_v13  ;;  %v514_v12 = vld [vmem:[#allocation5 + $0x318] sm:$0xff]  ;;  %v6976_v13 = vcombine.high %v506_v3, %v510_v5  ;;  %v569_v5 = vld [vmem:[#allocation5 + $0x4d0] sm:$0xff] }
 0x18f   : > { %2985 = vmatprep.subr.bf16.mxu0 %v6918_v15  ;;  %3114 = vmatprep.subr.bf16.mxu1 %v6920_v18  ;;  %v518_v15 = vld [vmem:[#allocation5 + $0x338] sm:$0xff]  ;;  %v521_v18 = vld [vmem:[#allocation5 + $0x350] sm:$0xff] }
 0x190   : > { %v6983_v24 = vcombine.low %v514_v12, %v518_v15  ;;  %v6990_v25 = vcombine.high %v521_v18, %v525_v19  ;;  %v6989_v32 = vcombine.low %v521_v18, %v525_v19 }
 0x192   : > { %2986 = vmatpush1.bf16.msra.mxu0 %v6917_v20  ;;  %3115 = vmatpush1.bf16.msra.mxu1 %v6919_v21  ;;  %v522_v20 = vld [vmem:[#allocation5 + $0x358] sm:$0xff]  ;;  %v6984_v21 = vcombine.high %v514_v12, %v518_v15  ;;  %v577_v15 = vld [vmem:[#allocation5 + $0x510] sm:$0xff] }
 0x193   : > { %2987 = vmatprep.subr.bf16.mxu0 %v6926_v22  ;;  %3116 = vmatprep.subr.bf16.mxu1 %v6928_v26  ;;  %v526_v22 = vld [vmem:[#allocation5 + $0x378] sm:$0xff]  ;;  %v529_v26 = vld [vmem:[#allocation5 + $0x390] sm:$0xff] }
 0x194   : > { %v6991_v33 = vcombine.low %v522_v20, %v526_v22  ;;  %v6998_v35 = vcombine.high %v529_v26, %v533_v27  ;;  %v6997_v41 = vcombine.low %v529_v26, %v533_v27 }
 0x196   : > { %2988 = vmatpush1.bf16.msra.mxu0 %v6925_v28  ;;  %3117 = vmatpush1.bf16.msra.mxu1 %v6927_v29  ;;  %v530_v28 = vld [vmem:[#allocation5 + $0x398] sm:$0xff]  ;;  %v6992_v29 = vcombine.high %v522_v20, %v526_v22  ;;  %v585_v22 = vld [vmem:[#allocation5 + $0x550] sm:$0xff] }
 0x197   : > { %2989 = vmatprep.subr.bf16.mxu0 %v6934_v31  ;;  %3118 = vmatprep.subr.bf16.mxu1 %v6936_v36  ;;  %v534_v31 = vld [vmem:[#allocation5 + $0x3b8] sm:$0xff]  ;;  %v537_v36 = vld [vmem:[#allocation5 + $0x3d0] sm:$0xff] }
 0x198   : > { %v6999_v60 = vcombine.low %v530_v28, %v534_v31  ;;  %v7006_v42 = vcombine.high %v537_v36, %v541_v61  ;;  %v7005_v49 = vcombine.low %v537_v36, %v541_v61 }
 0x19a   : > { %2990 = vmatpush1.bf16.msra.mxu0 %v6933_v6  ;;  %3119 = vmatpush1.bf16.msra.mxu1 %v6935_v38  ;;  %v538_v6 = vld [vmem:[#allocation5 + $0x3d8] sm:$0xff]  ;;  %v7000_v38 = vcombine.high %v530_v28, %v534_v31  ;;  %v593_v31 = vld [vmem:[#allocation5 + $0x590] sm:$0xff] }
 0x19b   : > { %2991 = vmatprep.subr.bf16.mxu0 %v6942_v39  ;;  %3120 = vmatprep.subr.bf16.mxu1 %v6944_v43  ;;  %v542_v39 = vld [vmem:[#allocation5 + $0x3f8] sm:$0xff]  ;;  %v545_v43 = vld [vmem:[#allocation5 + $0x410] sm:$0xff] }
 0x19c   : > { %v7007_v51 = vcombine.low %v538_v6, %v542_v39  ;;  %v7014_v53 = vcombine.high %v545_v43, %v549_v44  ;;  %v7013_v50 = vcombine.low %v545_v43, %v549_v44 }
 0x19e   : > { %2992 = vmatpush1.bf16.msra.mxu0 %v6941_v45  ;;  %3121 = vmatpush1.bf16.msra.mxu1 %v6943_v46  ;;  %v546_v45 = vld [vmem:[#allocation5 + $0x418] sm:$0xff]  ;;  %v7008_v46 = vcombine.high %v538_v6, %v542_v39  ;;  %v601_v39 = vld [vmem:[#allocation5 + $0x5d0] sm:$0xff] }
 0x19f   : > { %2993 = vmatprep.subr.bf16.mxu0 %v6950_v47  ;;  %3122 = vmatprep.subr.bf16.mxu1 %v6952_v54  ;;  %v550_v47 = vld [vmem:[#allocation5 + $0x438] sm:$0xff]  ;;  %v553_v54 = vld [vmem:[#allocation5 + $0x450] sm:$0xff] }
 0x1a0   : > { %v7015_v56 = vcombine.low %v546_v45, %v550_v47  ;;  %v7022_v59 = vcombine.high %v553_v54, %v557_v55  ;;  %v7021_v1 = vcombine.low %v553_v54, %v557_v55 }
 0x1a2   : > { %2994 = vmatpush1.bf16.msra.mxu0 %v6949_v57  ;;  %3123 = vmatpush1.bf16.msra.mxu1 %v6951_v58  ;;  %v554_v57 = vld [vmem:[#allocation5 + $0x458] sm:$0xff]  ;;  %v7016_v58 = vcombine.high %v546_v45, %v550_v47  ;;  %v609_v47 = vld [vmem:[#allocation5 + $0x610] sm:$0xff] }
 0x1a3   : > { %2995 = vmatprep.subr.bf16.mxu0 %v6958_v34  ;;  %3124 = vmatprep.subr.bf16.mxu1 %v6960_v37  ;;  %v558_v34 = vld [vmem:[#allocation5 + $0x478] sm:$0xff] }
 0x1a4   : > { %v7024_v37 = vcombine.high %v554_v57, %v558_v34  ;;  %v7023_v2 = vcombine.low %v554_v57, %v558_v34  ;;  %v617_v34 = vld [vmem:[#allocation5 + $0x650] sm:$0xff] }
 0x1a6   : > { %2996 = vmatpush1.bf16.msra.mxu0 %v6957_v62  ;;  %3125 = vmatpush1.bf16.msra.mxu1 %v6959_v63  ;;  %v565_v62 = vld [vmem:[#allocation5 + $0x4b0] sm:$0xff]  ;;  %v562_v63 = vld [vmem:[#allocation5 + $0x498] sm:$0xff] }
 0x1a7   : > { %2997 = vmatprep.subr.bf16.mxu0 %v6966_v0  ;;  %3126 = vmatprep.subr.bf16.mxu1 %v6968_v4  ;;  %v566_v0 = vld [vmem:[#allocation5 + $0x4b8] sm:$0xff]  ;;  %v7030_v3 = vcombine.high %v561_v40, %v565_v62  ;;  %v7029_v11 = vcombine.low %v561_v40, %v565_v62 }
 0x1a8   : > { %v7032_v4 = vcombine.high %v562_v63, %v566_v0  ;;  %v7031_v12 = vcombine.low %v562_v63, %v566_v0  ;;  %v625_v0 = vld [vmem:[#allocation5 + $0x690] sm:$0xff] }
 0x1aa   : > { %2998 = vmatpush1.bf16.msra.mxu0 %v6965_v7  ;;  %3127 = vmatpush1.bf16.msra.mxu1 %v6967_v8  ;;  %v573_v7 = vld [vmem:[#allocation5 + $0x4f0] sm:$0xff] }
 0x1ab   : > { %2999 = vmatprep.subr.bf16.mxu0 %v6974_v9  ;;  %3128 = vmatprep.subr.bf16.mxu1 %v6976_v13  ;;  %v8645_v8 = vld [vmem:[%s9200_s28 + $0x4] ss:$8 sps:$4 sm:$0xff]   ;;  %v7037_v18 = vcombine.low %v569_v5, %v573_v7 }
 0x1ac   : > { %v570_v9 = vld [vmem:[#allocation5 + $0x4d8] sm:$0xff] }
 0x1ad   : > { %v7040_v13 = vcombine.high %v570_v9, %v574_v10  ;;  %v7039_v19 = vcombine.low %v570_v9, %v574_v10  ;;  %v633_v9 = vld [vmem:[#allocation5 + $0x6d0] sm:$0xff] }
 0x1ae   : > { %3000 = vmatpush1.bf16.msra.mxu0 %v6973_v16  ;;  %3129 = vmatpush1.bf16.msra.mxu1 %v6975_v14  ;;  %v581_v16 = vld [vmem:[#allocation5 + $0x530] sm:$0xff]  ;;  %v578_v14 = vld [vmem:[#allocation5 + $0x518] sm:$0xff] }
 0x1af   : > { %3001 = vmatprep.subr.bf16.mxu0 %v6982_v17  ;;  %3130 = vmatprep.subr.bf16.mxu1 %v6984_v21  ;;  %v582_v17 = vld [vmem:[#allocation5 + $0x538] sm:$0xff]  ;;  %v7046_v20 = vcombine.high %v577_v15, %v581_v16  ;;  %v7045_v26 = vcombine.low %v577_v15, %v581_v16  ;;  %v637_v10 = vld [vmem:[#allocation5 + $0x6f0] sm:$0xff] }
 0x1b0   : > { %v7048_v21 = vcombine.high %v578_v14, %v582_v17  ;;  %v7047_v27 = vcombine.low %v578_v14, %v582_v17  ;;  %v7102_v15 = vcombine.high %v633_v9, %v637_v10  ;;  %v641_v14 = vld [vmem:[#allocation5 + $0x710] sm:$0xff] }
 0x1b1   : > { %v645_v17 = vld [vmem:[#allocation5 + $0x730] sm:$0xff] }
 0x1b2   : > { %3002 = vmatpush1.bf16.msra.mxu0 %v6981_v23  ;;  %3131 = vmatpush1.bf16.msra.mxu1 %v6983_v24  ;;  %v589_v23 = vld [vmem:[#allocation5 + $0x570] sm:$0xff]  ;;  %v586_v24 = vld [vmem:[#allocation5 + $0x558] sm:$0xff] }
 0x1b3   : > { %3003 = vmatprep.subr.bf16.mxu0 %v6990_v25  ;;  %3132 = vmatprep.subr.bf16.mxu1 %v6992_v29  ;;  %v590_v25 = vld [vmem:[#allocation5 + $0x578] sm:$0xff]  ;;  %v7054_v28 = vcombine.high %v585_v22, %v589_v23  ;;  %v7053_v36 = vcombine.low %v585_v22, %v589_v23  ;;  %v7110_v22 = vcombine.high %v641_v14, %v645_v17 }
 0x1b4   : > { %v7056_v29 = vcombine.high %v586_v24, %v590_v25  ;;  %v7055_v61 = vcombine.low %v586_v24, %v590_v25  ;;  %v649_v24 = vld [vmem:[#allocation5 + $0x750] sm:$0xff] }
 0x1b5   : > { %v653_v25 = vld [vmem:[#allocation5 + $0x770] sm:$0xff] }
 0x1b6   : > { %3004 = vmatpush1.bf16.msra.mxu0 %v6989_v32  ;;  %3133 = vmatpush1.bf16.msra.mxu1 %v6991_v33  ;;  %v597_v32 = vld [vmem:[#allocation5 + $0x5b0] sm:$0xff]  ;;  %v594_v33 = vld [vmem:[#allocation5 + $0x598] sm:$0xff] }
 0x1b7   : > { %3005 = vmatprep.subr.bf16.mxu0 %v6998_v35  ;;  %3134 = vmatprep.subr.bf16.mxu1 %v7000_v38  ;;  %v598_v35 = vld [vmem:[#allocation5 + $0x5b8] sm:$0xff]  ;;  %v7062_v6 = vcombine.high %v593_v31, %v597_v32  ;;  %v7061_v43 = vcombine.low %v593_v31, %v597_v32  ;;  %v7118_v31 = vcombine.high %v649_v24, %v653_v25 }
 0x1b8   : > { %v7064_v38 = vcombine.high %v594_v33, %v598_v35  ;;  %v7063_v44 = vcombine.low %v594_v33, %v598_v35  ;;  %v657_v33 = vld [vmem:[#allocation5 + $0x790] sm:$0xff] }
 0x1b9   : > { %v661_v35 = vld [vmem:[#allocation5 + $0x7b0] sm:$0xff] }
 0x1ba   : > { %3006 = vmatpush1.bf16.msra.mxu0 %v6997_v41  ;;  %3135 = vmatpush1.bf16.msra.mxu1 %v6999_v60  ;;  %v605_v41 = vld [vmem:[#allocation5 + $0x5f0] sm:$0xff]  ;;  %v602_v60 = vld [vmem:[#allocation5 + $0x5d8] sm:$0xff] }
 0x1bb   : > { %3007 = vmatprep.subr.bf16.mxu0 %v7006_v42  ;;  %3136 = vmatprep.subr.bf16.mxu1 %v7008_v46  ;;  %v606_v42 = vld [vmem:[#allocation5 + $0x5f8] sm:$0xff]  ;;  %v7070_v45 = vcombine.high %v601_v39, %v605_v41  ;;  %v7069_v54 = vcombine.low %v601_v39, %v605_v41  ;;  %v7126_v39 = vcombine.high %v657_v33, %v661_v35 }
 0x1bc   : > { %v7072_v46 = vcombine.high %v602_v60, %v606_v42  ;;  %v7071_v55 = vcombine.low %v602_v60, %v606_v42  ;;  %v665_v60 = vld [vmem:[#allocation5 + $0x7d0] sm:$0xff] }
 0x1bd   : > { %v669_v42 = vld [vmem:[#allocation5 + $0x7f0] sm:$0xff] }
 0x1be   : > { %3008 = vmatpush1.bf16.msra.mxu0 %v7005_v49  ;;  %3137 = vmatpush1.bf16.msra.mxu1 %v7007_v51  ;;  %v613_v49 = vld [vmem:[#allocation5 + $0x630] sm:$0xff]  ;;  %v610_v51 = vld [vmem:[#allocation5 + $0x618] sm:$0xff] }
 0x1bf   : > { %3020 = vmatprep.subr.bf16.mxu0 %v7014_v53  ;;  %3149 = vmatprep.subr.bf16.mxu1 %v7016_v58  ;;  %v614_v53 = vld [vmem:[#allocation5 + $0x638] sm:$0xff]  ;;  %v7078_v57 = vcombine.high %v609_v47, %v613_v49 }
 0x1c0   : > { %v7080_v58 = vcombine.high %v610_v51, %v614_v53  ;;  %v7079_v40 = vcombine.low %v610_v51, %v614_v53  ;;  %v673_v51 = vld [vmem:[#allocation5 + $0x810] sm:$0xff] }
 0x1c1   : > { %3010 = vmatmul.mubr.bf16.vlgmr.msra.gmra.mrb[4].mxu0 %v9247_v30  ;;  %3139 = vmatmul.mubr.bf16.vlgmr.msra.gmra.mrb[4].mxu1 %v9247_v30  ;;  %v7038_v30 = vcombine.high %v569_v5, %v573_v7  ;;  %v677_v53 = vld [vmem:[#allocation5 + $0x830] sm:$0xff] }
 0x1c2   : > { %3021 = vmatpush1.bf16.msra.mxu0 %v7013_v50  ;;  %3150 = vmatpush1.bf16.msra.mxu1 %v7015_v56  ;;  %v621_v50 = vld [vmem:[#allocation5 + $0x670] sm:$0xff]  ;;  %v618_v56 = vld [vmem:[#allocation5 + $0x658] sm:$0xff] }
 0x1c3   : > { %3022 = vmatprep.subr.bf16.mxu0 %v7022_v59  ;;  %3151 = vmatprep.subr.bf16.mxu1 %v7024_v37  ;;  %v622_v59 = vld [vmem:[#allocation5 + $0x678] sm:$0xff]  ;;  %v7077_v37 = vcombine.low %v609_v47, %v613_v49  ;;  %v7086_v62 = vcombine.high %v617_v34, %v621_v50  ;;  %v7134_v47 = vcombine.high %v665_v60, %v669_v42 }
 0x1c4   : > { %3052 = vmatprep.mubr.bf16.mxu0 %v8645_v8  ;;  %3181 = vmatprep.mubr.bf16.mxu1 %v8645_v8  ;;  %v7088_v63 = vcombine.high %v618_v56, %v622_v59  ;;  %v7087_v5 = vcombine.low %v618_v56, %v622_v59  ;;  %v681_v56 = vld [vmem:[#allocation5 + $0x850] sm:$0xff] }
 0x1c5   : > { %v685_v59 = vld [vmem:[#allocation5 + $0x870] sm:$0xff] }
 0x1c6   : > { %3023 = vmatpush1.bf16.msra.mxu0 %v7021_v1  ;;  %3152 = vmatpush1.bf16.msra.mxu1 %v7023_v2  ;;  %v629_v1 = vld [vmem:[#allocation5 + $0x6b0] sm:$0xff]  ;;  %v626_v2 = vld [vmem:[#allocation5 + $0x698] sm:$0xff] }
 0x1c7   : > { %3024 = vmatprep.subr.bf16.mxu0 %v7030_v3  ;;  %3153 = vmatprep.subr.bf16.mxu1 %v7032_v4  ;;  %v630_v3 = vld [vmem:[#allocation5 + $0x6b8] sm:$0xff]  ;;  %v7085_v4 = vcombine.low %v617_v34, %v621_v50  ;;  %v7094_v7 = vcombine.high %v625_v0, %v629_v1  ;;  %v7142_v34 = vcombine.high %v673_v51, %v677_v53 }
 0x1c8   : > { %v7096_v8 = vcombine.high %v626_v2, %v630_v3 }
 0x1ca   : > { %3025 = vmatpush1.bf16.msra.mxu0 %v7029_v11  ;;  %3154 = vmatpush1.bf16.msra.mxu1 %v7031_v12  ;;  %v634_v11 = vld [vmem:[#allocation5 + $0x6d8] sm:$0xff] }
 0x1cb   : > { %3026 = vmatprep.subr.bf16.mxu0 %v7038_v30  ;;  %3155 = vmatprep.subr.bf16.mxu1 %v7040_v13  ;;  %v638_v12 = vld [vmem:[#allocation5 + $0x6f8] sm:$0xff]  ;;  %v7093_v30 = vcombine.low %v625_v0, %v629_v1  ;;  %v7095_v13 = vcombine.low %v626_v2, %v630_v3  ;;  %v7150_v0 = vcombine.high %v681_v56, %v685_v59  ;;  %v689_v2 = vld [vmem:[#allocation5 + $0x890] sm:$0xff] }
 0x1cc   : > { %v7104_v16 = vcombine.high %v634_v11, %v638_v12  ;;  %v693_v3 = vld [vmem:[#allocation5 + $0x8b0] sm:$0xff] }
 0x1ce   : > { %3027 = vmatpush1.bf16.msra.mxu0 %v7037_v18  ;;  %3156 = vmatpush1.bf16.msra.mxu1 %v7039_v19  ;;  %v642_v18 = vld [vmem:[#allocation5 + $0x718] sm:$0xff] }
 0x1cf   : > { %3028 = vmatprep.subr.bf16.mxu0 %v7046_v20  ;;  %3157 = vmatprep.subr.bf16.mxu1 %v7048_v21  ;;  %v646_v19 = vld [vmem:[#allocation5 + $0x738] sm:$0xff]  ;;  %v7101_v20 = vcombine.low %v633_v9, %v637_v10  ;;  %v7103_v21 = vcombine.low %v634_v11, %v638_v12  ;;  %v7158_v10 = vcombine.high %v689_v2, %v693_v3  ;;  %v697_v12 = vld [vmem:[#allocation5 + $0x8d0] sm:$0xff] }
 0x1d0   : > { %v7112_v23 = vcombine.high %v642_v18, %v646_v19 }
 0x1d2   : > { %3029 = vmatpush1.bf16.msra.mxu0 %v7045_v26  ;;  %3158 = vmatpush1.bf16.msra.mxu1 %v7047_v27  ;;  %v650_v26 = vld [vmem:[#allocation5 + $0x758] sm:$0xff] }
 0x1d3   : > { %3030 = vmatprep.subr.bf16.mxu0 %v7054_v28  ;;  %3159 = vmatprep.subr.bf16.mxu1 %v7056_v29  ;;  %v654_v27 = vld [vmem:[#allocation5 + $0x778] sm:$0xff]  ;;  %v7109_v28 = vcombine.low %v641_v14, %v645_v17  ;;  %v7111_v29 = vcombine.low %v642_v18, %v646_v19  ;;  %v705_v19 = vld [vmem:[#allocation5 + $0x910] sm:$0xff] }
 0x1d4   : > { %v7120_v32 = vcombine.high %v650_v26, %v654_v27 }
 0x1d6   : > { %3031 = vmatpush1.bf16.msra.mxu0 %v7053_v36  ;;  %3160 = vmatpush1.bf16.msra.mxu1 %v7055_v61  ;;  %v658_v36 = vld [vmem:[#allocation5 + $0x798] sm:$0xff] }
 0x1d7   : > { %3032 = vmatprep.subr.bf16.mxu0 %v7062_v6  ;;  %3161 = vmatprep.subr.bf16.mxu1 %v7064_v38  ;;  %v662_v61 = vld [vmem:[#allocation5 + $0x7b8] sm:$0xff]  ;;  %v7117_v6 = vcombine.low %v649_v24, %v653_v25  ;;  %v7119_v38 = vcombine.low %v650_v26, %v654_v27  ;;  %v713_v26 = vld [vmem:[#allocation5 + $0x950] sm:$0xff] }
 0x1d8   : > { %v7128_v41 = vcombine.high %v658_v36, %v662_v61  ;;  %v717_v27 = vld [vmem:[#allocation5 + $0x970] sm:$0xff] }
 0x1da   : > { %3033 = vmatpush1.bf16.msra.mxu0 %v7061_v43  ;;  %3162 = vmatpush1.bf16.msra.mxu1 %v7063_v44  ;;  %v666_v43 = vld [vmem:[#allocation5 + $0x7d8] sm:$0xff] }
 0x1db   : > { %3034 = vmatprep.subr.bf16.mxu0 %v7070_v45  ;;  %3163 = vmatprep.subr.bf16.mxu1 %v7072_v46  ;;  %v670_v44 = vld [vmem:[#allocation5 + $0x7f8] sm:$0xff]  ;;  %v7125_v45 = vcombine.low %v657_v33, %v661_v35  ;;  %v7127_v46 = vcombine.low %v658_v36, %v662_v61  ;;  %v7182_v33 = vcombine.high %v713_v26, %v717_v27  ;;  %v721_v36 = vld [vmem:[#allocation5 + $0x990] sm:$0xff] }
 0x1dc   : > { %v7136_v49 = vcombine.high %v666_v43, %v670_v44  ;;  %v725_v61 = vld [vmem:[#allocation5 + $0x9b0] sm:$0xff] }
 0x1de   : > { %3035 = vmatpush1.bf16.msra.mxu0 %v7069_v54  ;;  %3164 = vmatpush1.bf16.msra.mxu1 %v7071_v55  ;;  %v674_v54 = vld [vmem:[#allocation5 + $0x818] sm:$0xff] }
 0x1df   : > { %3036 = vmatprep.subr.bf16.mxu0 %v7078_v57  ;;  %3165 = vmatprep.subr.bf16.mxu1 %v7080_v58  ;;  %v678_v55 = vld [vmem:[#allocation5 + $0x838] sm:$0xff]  ;;  %v7133_v57 = vcombine.low %v665_v60, %v669_v42  ;;  %v7135_v58 = vcombine.low %v666_v43, %v670_v44  ;;  %v7190_v60 = vcombine.high %v721_v36, %v725_v61  ;;  %v729_v43 = vld [vmem:[#allocation5 + $0x9d0] sm:$0xff] }
 0x1e0   : > { %v7144_v50 = vcombine.high %v674_v54, %v678_v55  ;;  %v733_v44 = vld [vmem:[#allocation5 + $0x9f0] sm:$0xff] }
 0x1e2   : > { %3037 = vmatpush1.bf16.msra.mxu0 %v7077_v37  ;;  %3166 = vmatpush1.bf16.msra.mxu1 %v7079_v40  ;;  %v682_v37 = vld [vmem:[#allocation5 + $0x858] sm:$0xff] }
 0x1e3   : > { %3038 = vmatprep.subr.bf16.mxu0 %v7086_v62  ;;  %3167 = vmatprep.subr.bf16.mxu1 %v7088_v63  ;;  %v686_v40 = vld [vmem:[#allocation5 + $0x878] sm:$0xff]  ;;  %v7141_v62 = vcombine.low %v673_v51, %v677_v53  ;;  %v7143_v63 = vcombine.low %v674_v54, %v678_v55  ;;  %v7198_v51 = vcombine.high %v729_v43, %v733_v44  ;;  %v737_v54 = vld [vmem:[#allocation5 + $0xa10] sm:$0xff] }
 0x1e4   : > { %v7152_v1 = vcombine.high %v682_v37, %v686_v40  ;;  %v7151_v9 = vcombine.low %v682_v37, %v686_v40  ;;  %v741_v55 = vld [vmem:[#allocation5 + $0xa30] sm:$0xff] }
 0x1e5   : > { %v745_v37 = vld [vmem:[#allocation5 + $0xa50] sm:$0xff] }
 0x1e6   : > { %3039 = vmatpush1.bf16.msra.mxu0 %v7085_v4  ;;  %3168 = vmatpush1.bf16.msra.mxu1 %v7087_v5  ;;  %v8646_v4 = vld [vmem:[%s9200_s28] ss:$8 sps:$4 sm:$0xff]  }
 0x1e7   : > { %3040 = vmatprep.subr.bf16.mxu0 %v7094_v7  ;;  %3169 = vmatprep.subr.bf16.mxu1 %v7096_v8  ;;  %v690_v5 = vld [vmem:[#allocation5 + $0x898] sm:$0xff]  ;;  %v7149_v8 = vcombine.low %v681_v56, %v685_v59  ;;  %v7206_v56 = vcombine.high %v737_v54, %v741_v55  ;;  %v749_v40 = vld [vmem:[#allocation5 + $0xa70] sm:$0xff] }
 0x1e8   : > { %v694_v7 = vld [vmem:[#allocation5 + $0x8b8] sm:$0xff] }
 0x1e9   : > { %v7160_v11 = vcombine.high %v690_v5, %v694_v7  ;;  %v7159_v14 = vcombine.low %v690_v5, %v694_v7  ;;  %v757_v5 = vld [vmem:[#allocation5 + $0xab0] sm:$0xff]  ;;  %v754_v7 = vld [vmem:[#allocation5 + $0xa98] sm:$0xff] }
 0x1ea   : > { %3041 = vmatpush1.bf16.msra.mxu0 %v7093_v30  ;;  %3170 = vmatpush1.bf16.msra.mxu1 %v7095_v13  ;;  %v701_v30 = vld [vmem:[#allocation5 + $0x8f0] sm:$0xff]  ;;  %v698_v13 = vld [vmem:[#allocation5 + $0x8d8] sm:$0xff] }
 0x1eb   : > { %3042 = vmatprep.subr.bf16.mxu0 %v7102_v15  ;;  %3171 = vmatprep.subr.bf16.mxu1 %v7104_v16  ;;  %v702_v15 = vld [vmem:[#allocation5 + $0x8f8] sm:$0xff]  ;;  %v7157_v16 = vcombine.low %v689_v2, %v693_v3  ;;  %v7166_v17 = vcombine.high %v697_v12, %v701_v30  ;;  %v7214_v2 = vcombine.high %v745_v37, %v749_v40 }
 0x1ec   : > { %v7168_v18 = vcombine.high %v698_v13, %v702_v15  ;;  %v7167_v24 = vcombine.low %v698_v13, %v702_v15  ;;  %v765_v13 = vld [vmem:[#allocation5 + $0xaf0] sm:$0xff]  ;;  %v762_v15 = vld [vmem:[#allocation5 + $0xad8] sm:$0xff] }
 0x1ee   : > { %3043 = vmatpush1.bf16.msra.mxu0 %v7101_v20  ;;  %3172 = vmatpush1.bf16.msra.mxu1 %v7103_v21  ;;  %v709_v20 = vld [vmem:[#allocation5 + $0x930] sm:$0xff]  ;;  %v706_v21 = vld [vmem:[#allocation5 + $0x918] sm:$0xff] }
 0x1ef   : > { %3044 = vmatprep.subr.bf16.mxu0 %v7110_v22  ;;  %3173 = vmatprep.subr.bf16.mxu1 %v7112_v23  ;;  %v710_v22 = vld [vmem:[#allocation5 + $0x938] sm:$0xff]  ;;  %v7165_v23 = vcombine.low %v697_v12, %v701_v30  ;;  %v7174_v25 = vcombine.high %v705_v19, %v709_v20  ;;  %v761_v30 = vld [vmem:[#allocation5 + $0xad0] sm:$0xff] }
 0x1f2   : > { %3045 = vmatpush1.bf16.msra.mxu0 %v7109_v28  ;;  %3174 = vmatpush1.bf16.msra.mxu1 %v7111_v29  ;;  %v714_v28 = vld [vmem:[#allocation5 + $0x958] sm:$0xff] }
 0x1f3   : > { %3046 = vmatprep.subr.bf16.mxu0 %v7118_v31  ;;  %3175 = vmatprep.subr.bf16.mxu1 %v7120_v32  ;;  %v718_v29 = vld [vmem:[#allocation5 + $0x978] sm:$0xff]  ;;  %v7173_v31 = vcombine.low %v705_v19, %v709_v20  ;;  %v7175_v32 = vcombine.low %v706_v21, %v710_v22  ;;  %v769_v20 = vld [vmem:[#allocation5 + $0xb10] sm:$0xff] }
 0x1f4   : > { %v7184_v35 = vcombine.high %v714_v28, %v718_v29 }
 0x1f6   : > { %3047 = vmatpush1.bf16.msra.mxu0 %v7117_v6  ;;  %3176 = vmatpush1.bf16.msra.mxu1 %v7119_v38  ;;  %v722_v6 = vld [vmem:[#allocation5 + $0x998] sm:$0xff] }
 0x1f7   : > { %3048 = vmatprep.subr.bf16.mxu0 %v7126_v39  ;;  %3177 = vmatprep.subr.bf16.mxu1 %v7128_v41  ;;  %v726_v38 = vld [vmem:[#allocation5 + $0x9b8] sm:$0xff]  ;;  %v7181_v39 = vcombine.low %v713_v26, %v717_v27  ;;  %v7183_v41 = vcombine.low %v714_v28, %v718_v29  ;;  %v777_v27 = vld [vmem:[#allocation5 + $0xb50] sm:$0xff] }
 0x1f8   : > { %v7192_v42 = vcombine.high %v722_v6, %v726_v38  ;;  %v781_v28 = vld [vmem:[#allocation5 + $0xb70] sm:$0xff]  ;;  %v778_v29 = vld [vmem:[#allocation5 + $0xb58] sm:$0xff] }
 0x1fa   : > { %3049 = vmatpush1.bf16.msra.mxu0 %v7125_v45  ;;  %3178 = vmatpush1.bf16.msra.mxu1 %v7127_v46  ;;  %v730_v45 = vld [vmem:[#allocation5 + $0x9d8] sm:$0xff] }
 0x1fb   : > { %3050 = vmatprep.subr.bf16.mxu0 %v7134_v47  ;;  %3179 = vmatprep.subr.bf16.mxu1 %v7136_v49  ;;  %v734_v46 = vld [vmem:[#allocation5 + $0x9f8] sm:$0xff]  ;;  %v7189_v47 = vcombine.low %v721_v36, %v725_v61  ;;  %v7191_v49 = vcombine.low %v722_v6, %v726_v38  ;;  %v785_v61 = vld [vmem:[#allocation5 + $0xb90] sm:$0xff] }
 0x1fc   : > { %v7200_v53 = vcombine.high %v730_v45, %v734_v46  ;;  %v789_v6 = vld [vmem:[#allocation5 + $0xbb0] sm:$0xff]  ;;  %v786_v38 = vld [vmem:[#allocation5 + $0xb98] sm:$0xff] }
 0x1fe   : > { %3051 = vmatpush1.bf16.msra.mxu0 %v7133_v57  ;;  %3180 = vmatpush1.bf16.msra.mxu1 %v7135_v58  ;;  %v738_v57 = vld [vmem:[#allocation5 + $0xa18] sm:$0xff] }
 0x1ff   : > { %3063 = vmatprep.subr.bf16.mxu0 %v7142_v34  ;;  %3192 = vmatprep.subr.bf16.mxu1 %v7144_v50  ;;  %v742_v58 = vld [vmem:[#allocation5 + $0xa38] sm:$0xff]  ;;  %v7197_v34 = vcombine.low %v729_v43, %v733_v44  ;;  %v7199_v50 = vcombine.low %v730_v45, %v734_v46  ;;  %v793_v44 = vld [vmem:[#allocation5 + $0xbd0] sm:$0xff] }
 0x200   : > { %v7208_v59 = vcombine.high %v738_v57, %v742_v58  ;;  %v797_v45 = vld [vmem:[#allocation5 + $0xbf0] sm:$0xff]  ;;  %v794_v46 = vld [vmem:[#allocation5 + $0xbd8] sm:$0xff] }
 0x201   : > { %3053 = vmatmul.mubr.bf16.vlgmr.msra.gmra.mrb[4].mxu0 %v8646_v4  ;;  %3182 = vmatmul.mubr.bf16.vlgmr.msra.gmra.mrb[4].mxu1 %v8646_v4  ;;  %v753_v4 = vld [vmem:[#allocation5 + $0xa90] sm:$0xff] }
 0x202   : > { %3064 = vmatpush1.bf16.msra.mxu0 %v7141_v62  ;;  %3193 = vmatpush1.bf16.msra.mxu1 %v7143_v63  ;;  %v746_v62 = vld [vmem:[#allocation5 + $0xa58] sm:$0xff] }
 0x203   : > { %3065 = vmatprep.subr.bf16.mxu0 %v7150_v0  ;;  %3194 = vmatprep.subr.bf16.mxu1 %v7152_v1  ;;  %v750_v63 = vld [vmem:[#allocation5 + $0xa78] sm:$0xff]  ;;  %v7205_v0 = vcombine.low %v737_v54, %v741_v55  ;;  %v7207_v1 = vcombine.low %v738_v57, %v742_v58  ;;  %v7261_v55 = vcombine.low %v793_v44, %v797_v45  ;;  %v8067_v58 = vld [vmem:[#allocation7 + $0x4] ss:$16 sps:$4 sm:$0xff]  }
 0x204   : > { %3095 = vmatprep.mubr.bf16.mxu0 %v9267_v48  ;;  %3224 = vmatprep.mubr.bf16.mxu1 %v9267_v48  ;;  %v7176_v48 = vcombine.high %v706_v21, %v710_v22  ;;  %v7216_v3 = vcombine.high %v746_v62, %v750_v63  ;;  %v773_v21 = vld [vmem:[#allocation5 + $0xb30] sm:$0xff]  ;;  %v770_v22 = vld [vmem:[#allocation5 + $0xb18] sm:$0xff] }
 0x206   : > { %3066 = vmatpush1.bf16.msra.mxu0 %v7149_v8  ;;  %3195 = vmatpush1.bf16.msra.mxu1 %v7151_v9  ;;  %v758_v8 = vld [vmem:[#allocation5 + $0xab8] sm:$0xff]  ;;  %v7213_v9 = vcombine.low %v745_v37, %v749_v40  ;;  %v8071_v40 = vld [vmem:[#allocation7 + $0x20] ss:$16 sps:$4 sm:$0xff]  }
 0x207   : > { %3067 = vmatprep.subr.bf16.mxu0 %v7158_v10  ;;  %3196 = vmatprep.subr.bf16.mxu1 %v7160_v11  ;;  %v7215_v10 = vcombine.low %v746_v62, %v750_v63  ;;  %v7222_v11 = vcombine.high %v753_v4, %v757_v5  ;;  %v7224_v12 = vcombine.high %v754_v7, %v758_v8  ;;  %v8076_v37 = vld [vmem:[#allocation7 + $0x2c] ss:$16 sps:$4 sm:$0xff]   ;;  %v8074_v62 = vld [vmem:[#allocation7 + $0x28] ss:$16 sps:$4 sm:$0xff]   ;;  %v8079_v63 = vld [vmem:[#allocation7 + $0x44] ss:$16 sps:$4 sm:$0xff]  }
 0x20a   : > { %3068 = vmatpush1.bf16.msra.mxu0 %v7157_v16  ;;  %3197 = vmatpush1.bf16.msra.mxu1 %v7159_v14  ;;  %v766_v16 = vld [vmem:[#allocation5 + $0xaf8] sm:$0xff]  ;;  %v7221_v14 = vcombine.low %v753_v4, %v757_v5  ;;  %v8085_v4 = vld [vmem:[#allocation7 + $0x64] ss:$16 sps:$4 sm:$0xff]  }
 0x20b   : > { %3069 = vmatprep.subr.bf16.mxu0 %v7166_v17  ;;  %3198 = vmatprep.subr.bf16.mxu1 %v7168_v18  ;;  %v7223_v17 = vcombine.low %v754_v7, %v758_v8  ;;  %v7230_v18 = vcombine.high %v761_v30, %v765_v13  ;;  %v7232_v19 = vcombine.high %v762_v15, %v766_v16  ;;  %v8088_v5 = vld [vmem:[#allocation7 + $0x6c] ss:$16 sps:$4 sm:$0xff]   ;;  %v8086_v8 = vld [vmem:[#allocation7 + $0x68] ss:$16 sps:$4 sm:$0xff]  }
 0x20e   : > { %3070 = vmatpush1.bf16.msra.mxu0 %v7165_v23  ;;  %3199 = vmatpush1.bf16.msra.mxu1 %v7167_v24  ;;  %v774_v23 = vld [vmem:[#allocation5 + $0xb38] sm:$0xff]  ;;  %v7229_v24 = vcombine.low %v761_v30, %v765_v13  ;;  %v367_v13 = vld [vmem:[#allocation11] sm:$0xff] }
 0x20f   : > { %3071 = vmatprep.subr.bf16.mxu0 %v7174_v25  ;;  %3200 = vmatprep.subr.bf16.mxu1 %v7176_v48  ;;  %v7231_v25 = vcombine.low %v762_v15, %v766_v16  ;;  %v7238_v48 = vcombine.high %v769_v20, %v773_v21  ;;  %v7240_v26 = vcombine.high %v770_v22, %v774_v23  ;;  %v8092_v30 = vld [vmem:[#allocation7 + $0x88] ss:$16 sps:$4 sm:$0xff]  }
 0x210   : > { %v369_v15 = vld [vmem:[#allocation11 + $0x10] sm:$0xff]  ;;  %v368_v16 = vld [vmem:[#allocation11 + $0x8] sm:$0xff] }
 0x212   : > { %3072 = vmatpush1.bf16.msra.mxu0 %v7173_v31  ;;  %3201 = vmatpush1.bf16.msra.mxu1 %v7175_v32  ;;  %v782_v31 = vld [vmem:[#allocation5 + $0xb78] sm:$0xff]  ;;  %v7237_v32 = vcombine.low %v769_v20, %v773_v21 }
 0x213   : > { %3073 = vmatprep.subr.bf16.mxu0 %v7182_v33  ;;  %3202 = vmatprep.subr.bf16.mxu1 %v7184_v35  ;;  %v7239_v33 = vcombine.low %v770_v22, %v774_v23  ;;  %v7246_v35 = vcombine.high %v777_v27, %v781_v28  ;;  %v7248_v36 = vcombine.high %v778_v29, %v782_v31  ;;  %v8095_v22 = vld [vmem:[#allocation7 + $0xa0] ss:$16 sps:$4 sm:$0xff]  }
 0x216   : > { %3074 = vmatpush1.bf16.msra.mxu0 %v7181_v39  ;;  %3203 = vmatpush1.bf16.msra.mxu1 %v7183_v41  ;;  %v790_v39 = vld [vmem:[#allocation5 + $0xbb8] sm:$0xff]  ;;  %v7245_v41 = vcombine.low %v777_v27, %v781_v28 }
 0x217   : > { %3075 = vmatprep.subr.bf16.mxu0 %v7190_v60  ;;  %3204 = vmatprep.subr.bf16.mxu1 %v7192_v42  ;;  %v7247_v60 = vcombine.low %v778_v29, %v782_v31  ;;  %v7254_v42 = vcombine.high %v785_v61, %v789_v6  ;;  %v7256_v43 = vcombine.high %v786_v38, %v790_v39 }
 0x21a   : > { %3076 = vmatpush1.bf16.msra.mxu0 %v7189_v47  ;;  %3205 = vmatpush1.bf16.msra.mxu1 %v7191_v49  ;;  %v798_v47 = vld [vmem:[#allocation5 + $0xbf8] sm:$0xff]  ;;  %v7253_v49 = vcombine.low %v785_v61, %v789_v6 }
 0x21b   : > { %3077 = vmatprep.subr.bf16.mxu0 %v7198_v51  ;;  %3206 = vmatprep.subr.bf16.mxu1 %v7200_v53  ;;  %v7255_v51 = vcombine.low %v786_v38, %v790_v39  ;;  %v7262_v53 = vcombine.high %v793_v44, %v797_v45  ;;  %v7264_v54 = vcombine.high %v794_v46, %v798_v47  ;;  %v8104_v61 = vld [vmem:[#allocation7 + $0xc8] ss:$16 sps:$4 sm:$0xff]  }
 0x21c   : > { %v7263_v57 = vcombine.low %v794_v46, %v798_v47  ;;  %v8112_v47 = vld [vmem:[#allocation7 + $0xec] ss:$16 sps:$4 sm:$0xff]  }
 0x21e   : > { %3078 = vmatpush1.bf16.msra.mxu0 %v7197_v34  ;;  %3207 = vmatpush1.bf16.msra.mxu1 %v7199_v50  ;;  %v8070_v34 = vld [vmem:[#allocation7 + $0xc] ss:$16 sps:$4 sm:$0xff]   ;;  %v8065_v50 = vld [vmem:[#allocation7] ss:$16 sps:$4 sm:$0xff]  }
 0x21f   : > { %3079 = vmatprep.subr.bf16.mxu0 %v7206_v56  ;;  %3208 = vmatprep.subr.bf16.mxu1 %v7208_v59  ;;  %v8068_v56 = vld [vmem:[#allocation7 + $0x8] ss:$16 sps:$4 sm:$0xff]   ;;  %v8073_v59 = vld [vmem:[#allocation7 + $0x24] ss:$16 sps:$4 sm:$0xff]  }
 0x222   : > { %3080 = vmatpush1.bf16.msra.mxu0 %v7205_v0  ;;  %3209 = vmatpush1.bf16.msra.mxu1 %v7207_v1  ;;  %v8082_v0 = vld [vmem:[#allocation7 + $0x4c] ss:$16 sps:$4 sm:$0xff]   ;;  %v3235_v1 = vlaneseq }
 0x223   : > { %3081 = vmatprep.subr.bf16.mxu0 %v7214_v2  ;;  %3210 = vmatprep.subr.bf16.mxu1 %v7216_v3  ;;  %v8077_v2 = vld [vmem:[#allocation7 + $0x40] ss:$16 sps:$4 sm:$0xff]   ;;  %v8080_v3 = vld [vmem:[#allocation7 + $0x48] ss:$16 sps:$4 sm:$0xff]  }
 0x224   : > { %v9289_v7 = vshrl.u32 %v3235_v1, 7  ;;  %v8118_v1 = vld [vmem:[#allocation7 + $0x10c] ss:$16 sps:$4 sm:$0xff]  }
 0x226   : > { %3082 = vmatpush1.bf16.msra.mxu0 %v7213_v9  ;;  %3211 = vmatpush1.bf16.msra.mxu1 %v7215_v10  ;;  %v8091_v9 = vld [vmem:[#allocation7 + $0x84] ss:$16 sps:$4 sm:$0xff]   ;;  %v8094_v10 = vld [vmem:[#allocation7 + $0x8c] ss:$16 sps:$4 sm:$0xff]  }
 0x227   : > { %3083 = vmatprep.subr.bf16.mxu0 %v7222_v11  ;;  %3212 = vmatprep.subr.bf16.mxu1 %v7224_v12  ;;  %v9292_v11 = vsub.s32 0, %v9289_v7  ;;  %v8089_v12 = vld [vmem:[#allocation7 + $0x80] ss:$16 sps:$4 sm:$0xff]  }
 0x229   : > { %v3246_v20 = vrot.slane %v369_v15, %v9292_v11  ;;  %v3242_v21 = vrot.slane %v368_v16, %v9292_v11 }
 0x22a   : > { %3084 = vmatpush1.bf16.msra.mxu0 %v7221_v14  ;;  %3213 = vmatpush1.bf16.msra.mxu1 %v7223_v17  ;;  %v8097_v14 = vld [vmem:[#allocation7 + $0xa4] ss:$16 sps:$4 sm:$0xff]   ;;  %v370_v17 = vld [vmem:[#allocation11 + $0x18] sm:$0xff] }
 0x22b   : > { %3085 = vmatprep.subr.bf16.mxu0 %v7230_v18  ;;  %3214 = vmatprep.subr.bf16.mxu1 %v7232_v19  ;;  %v8100_v18 = vld [vmem:[#allocation7 + $0xac] ss:$16 sps:$4 sm:$0xff]   ;;  %v3238_v19 = vrot.slane %v367_v13, %v9292_v11  ;;  %v3250_v23 = vrot.slane %v370_v17, %v9292_v11  ;;  %v8173_v17 = vld [vmem:[#allocation7 + $0x240] ss:$16 sps:$4 sm:$0xff]  }
 0x22e   : > { %3086 = vmatpush1.bf16.msra.mxu0 %v7229_v24  ;;  %3215 = vmatpush1.bf16.msra.mxu1 %v7231_v25  ;;  %v8098_v24 = vld [vmem:[#allocation7 + $0xa8] ss:$16 sps:$4 sm:$0xff]   ;;  %v8103_v25 = vld [vmem:[#allocation7 + $0xc4] ss:$16 sps:$4 sm:$0xff]  }
 0x22f   : > { %3087 = vmatprep.subr.bf16.mxu0 %v7238_v48  ;;  %3216 = vmatprep.subr.bf16.mxu1 %v7240_v26  ;;  %v8106_v26 = vld [vmem:[#allocation7 + $0xcc] ss:$16 sps:$4 sm:$0xff]  }
 0x232   : > { %3088 = vmatpush1.bf16.msra.mxu0 %v7237_v32  ;;  %3217 = vmatpush1.bf16.msra.mxu1 %v7239_v33 }
 0x233   : > { %3089 = vmatprep.subr.bf16.mxu0 %v7246_v35  ;;  %3218 = vmatprep.subr.bf16.mxu1 %v7248_v36  ;;  %v8101_v36 = vld [vmem:[#allocation7 + $0xc0] ss:$16 sps:$4 sm:$0xff]  }
 0x236   : > { %3090 = vmatpush1.bf16.msra.mxu0 %v7245_v41  ;;  %3219 = vmatpush1.bf16.msra.mxu1 %v7247_v60 }
 0x237   : > { %3091 = vmatprep.subr.bf16.mxu0 %v7254_v42  ;;  %3220 = vmatprep.subr.bf16.mxu1 %v7256_v43  ;;  %v8109_v42 = vld [vmem:[#allocation7 + $0xe4] ss:$16 sps:$4 sm:$0xff]  }
 0x23a   : > { %3092 = vmatpush1.bf16.msra.mxu0 %v7253_v49  ;;  %3221 = vmatpush1.bf16.msra.mxu1 %v7255_v51 }
 0x23b   : > { %3093 = vmatprep.subr.bf16.mxu0 %v7262_v53  ;;  %3222 = vmatprep.subr.bf16.mxu1 %v7264_v54  ;;  %v8107_v53 = vld [vmem:[#allocation7 + $0xe0] ss:$16 sps:$4 sm:$0xff]  }
 0x23e   : > { %3094 = vmatpush1.bf16.msra.mxu0 %v7261_v55  ;;  %3223 = vmatpush1.bf16.msra.mxu1 %v7263_v57 }
 0x23f   : > { %5681 = vmatprep.subr.bf16.mxu0 %v8067_v58  ;;  %5939 = vmatprep.subr.bf16.mxu1 %v8070_v34  ;;  %v8110_v58 = vld [vmem:[#allocation7 + $0xe8] ss:$16 sps:$4 sm:$0xff]  }
 0x241   : > { %3096 = vmatmul.mubr.bf16.vlgmr.msra.gmra.mrb[4].mxu0 %v9275_v52  ;;  %3225 = vmatmul.mubr.bf16.vlgmr.msra.gmra.mrb[4].mxu1 %v9275_v52  ;;  %v8083_v52 = vld [vmem:[#allocation7 + $0x60] ss:$16 sps:$4 sm:$0xff]  }
 0x242   : > { %5682 = vmatpush1.bf16.msra.mxu0 %v8065_v50  ;;  %5940 = vmatpush1.bf16.msra.mxu1 %v8068_v56 }
 0x243   : > { %5683 = vmatprep.subr.bf16.mxu0 %v8073_v59  ;;  %5941 = vmatprep.subr.bf16.mxu1 %v8076_v37  ;;  %v8115_v37 = vld [vmem:[#allocation7 + $0x104] ss:$16 sps:$4 sm:$0xff]  }
 0x246   : > { %5684 = vmatpush1.bf16.msra.mxu0 %v8071_v40  ;;  %5942 = vmatpush1.bf16.msra.mxu1 %v8074_v62 }
 0x247   : > { %5685 = vmatprep.subr.bf16.mxu0 %v8079_v63  ;;  %5943 = vmatprep.subr.bf16.mxu1 %v8082_v0 }
 0x24a   : > { %5686 = vmatpush1.bf16.msra.mxu0 %v8077_v2  ;;  %5944 = vmatpush1.bf16.msra.mxu1 %v8080_v3 }
 0x24b   : > { %5687 = vmatprep.subr.bf16.mxu0 %v8085_v4  ;;  %5945 = vmatprep.subr.bf16.mxu1 %v8088_v5 }
 0x24e   : > { %5688 = vmatpush1.bf16.msra.mxu0 %v8083_v52  ;;  %5946 = vmatpush1.bf16.msra.mxu1 %v8086_v8 }
 0x24f   : > { %5689 = vmatprep.subr.bf16.mxu0 %v8091_v9  ;;  %5947 = vmatprep.subr.bf16.mxu1 %v8094_v10 }
 0x252   : > { %5690 = vmatpush1.bf16.msra.mxu0 %v8089_v12  ;;  %5948 = vmatpush1.bf16.msra.mxu1 %v8092_v30  ;;  %v8113_v12 = vld [vmem:[#allocation7 + $0x100] ss:$16 sps:$4 sm:$0xff]   ;;  %v8116_v30 = vld [vmem:[#allocation7 + $0x108] ss:$16 sps:$4 sm:$0xff]  }
 0x253   : > { %5691 = vmatprep.subr.bf16.mxu0 %v8097_v14  ;;  %5949 = vmatprep.subr.bf16.mxu1 %v8100_v18  ;;  %v8121_v18 = vld [vmem:[#allocation7 + $0x124] ss:$16 sps:$4 sm:$0xff]  }
 0x254   : > { %v2839_v48 = vpop.f32.mrb[0].mxu0  ;;  %v2968_v28 = vpop.f32.mrb[0].mxu1 }
 0x255   : > { %v3251_v27 = vadd.f32 %v3238_v19, %v2839_v48  ;;  %v2841_v29 = vpop.f32.mrb[1].mxu0  ;;  %v3253_v31 = vadd.f32 %v3246_v20, %v2968_v28  ;;  %v2970_v33 = vpop.f32.mrb[1].mxu1 }
 0x256   : > { %v3252_v32 = vadd.f32 %v3242_v21, %v2841_v29  ;;  %v2843_v35 = vpop.f32.mrb[2].mxu0  ;;  %5692 = vmatpush1.bf16.msra.mxu0 %v8095_v22  ;;  %v3254_v38 = vadd.f32 %v3250_v23, %v2970_v33  ;;  %v2972_v41 = vpop.f32.mrb[2].mxu1  ;;  %5950 = vmatpush1.bf16.msra.mxu1 %v8098_v24  ;;  %v8124_v22 = vld [vmem:[#allocation7 + $0x12c] ss:$16 sps:$4 sm:$0xff]   ;;  %v8275_v29 = vld [vmem:[#allocation7 + $0x460] ss:$16 sps:$4 sm:$0xff]  }
 0x257   : > { %v3259_v6 = vmax.f32 %v3251_v27, 0.0  ;;  %v3255_v39 = vadd.f32 %v3238_v19, %v2843_v35  ;;  %v2845_v60 = vpop.f32.mrb[3].mxu0  ;;  %5693 = vmatprep.subr.bf16.mxu0 %v8103_v25  ;;  %v3261_v43 = vmax.f32 %v3253_v31, 0.0  ;;  %v3257_v44 = vadd.f32 %v3246_v20, %v2972_v41  ;;  %v2974_v46 = vpop.f32.mrb[3].mxu1  ;;  %5951 = vmatprep.subr.bf16.mxu1 %v8106_v26  ;;  %v8119_v31 = vld [vmem:[#allocation7 + $0x120] ss:$16 sps:$4 sm:$0xff]  }
 0x258   : > { %v3256_v45 = vadd.f32 %v3242_v21, %v2845_v60  ;;  %v3260_v49 = vmax.f32 %v3252_v32, 0.0  ;;  %v9298_v57 = vmax.f32 %v3254_v38, 0.0  ;;  %v3258_v0 = vadd.f32 %v3250_v23, %v2974_v46  ;;  %v8136_v46 = vld [vmem:[#allocation7 + $0x16c] ss:$16 sps:$4 sm:$0xff]  }
 0x259   : > { %v3263_v51 = vmax.f32 %v3255_v39, 0.0  ;;  %v3300_v54 = vrot.slane %v3259_v6, 7  ;;  %v3325_v55 = vrot.slane %v3259_v6, 1  ;;  %v3302_v34 = vrot.slane %v3261_v43, 7  ;;  %v8130_v39 = vld [vmem:[#allocation7 + $0x14c] ss:$16 sps:$4 sm:$0xff]  }
 0x25a   : > { %5694 = vmatpush1.bf16.msra.mxu0 %v8101_v36  ;;  %v3331_v50 = vrot.slane %v3261_v43, 1  ;;  %5952 = vmatpush1.bf16.msra.mxu1 %v8104_v61  ;;  %v3265_v62 = vmax.f32 %v3257_v44, 0.0  ;;  %v3264_v63 = vmax.f32 %v3256_v45, 0.0  ;;  %v3301_v2 = vrot.slane %v3260_v49, 7  ;;  %v8122_v36 = vld [vmem:[#allocation7 + $0x128] ss:$16 sps:$4 sm:$0xff]  }
 0x25b   : > { %v3304_v56 = vrot.slane %v3263_v51, 7  ;;  %v3326_v59 = vrot.slane %v3263_v51, 1  ;;  %5695 = vmatprep.subr.bf16.mxu0 %v8109_v42  ;;  %v9300_v40 = vpack.c.bf16 %v3263_v51, %v3259_v6  ;;  %5953 = vmatprep.subr.bf16.mxu1 %v8112_v47  ;;  %v3328_v3 = vrot.slane %v3260_v49, 1  ;;  %v8127_v61 = vld [vmem:[#allocation7 + $0x144] ss:$16 sps:$4 sm:$0xff]  }
 0x25c   : > { %v3308_v9 = vrot.slane %v3265_v62, 7  ;;  %v3332_v10 = vrot.slane %v3265_v62, 1  ;;  %v9308_v13 = vpack.c.bf16 %v3265_v62, %v3261_v43  ;;  %v3306_v15 = vrot.slane %v3264_v63, 7  ;;  %v8125_v43 = vld [vmem:[#allocation7 + $0x140] ss:$16 sps:$4 sm:$0xff]  }
 0x25d   : > { %v3305_v4 = vsel %vm397_vm0, %v3300_v54, %v3304_v56  ;;  %v3327_v5 = vsel %vm3324_vm6, %v3325_v55, %v3326_v59  ;;  %v3329_v16 = vrot.slane %v3264_v63, 1  ;;  %v3266_v14 = vmax.f32 %v3258_v0, 0.0  ;;  %v8128_v44 = vld [vmem:[#allocation7 + $0x148] ss:$16 sps:$4 sm:$0xff]   ;;  %v8133_v45 = vld [vmem:[#allocation7 + $0x164] ss:$16 sps:$4 sm:$0xff]  }
 0x25e   : > { %v9304_v52 = vpack.c.bf16 %v3305_v4, %v3300_v54  ;;  %v9306_v8 = vpack.c.bf16 %v3326_v59, %v3327_v5  ;;  %5696 = vmatpush1.bf16.msra.mxu0 %v8107_v53  ;;  %5954 = vmatpush1.bf16.msra.mxu1 %v8110_v58  ;;  %v3303_v19 = vrot.slane %v9298_v57, 7  ;;  %v3309_v20 = vsel %vm397_vm0, %v3302_v34, %v3308_v9  ;;  %v8131_v47 = vld [vmem:[#allocation7 + $0x160] ss:$16 sps:$4 sm:$0xff]   ;;  %v8139_v51 = vld [vmem:[#allocation7 + $0x184] ss:$16 sps:$4 sm:$0xff]  }
 0x25f   : > { %5697 = vmatprep.subr.bf16.mxu0 %v8115_v37  ;;  %v3333_v21 = vsel %vm3324_vm6, %v3331_v50, %v3332_v10  ;;  %5955 = vmatprep.subr.bf16.mxu1 %v8118_v1  ;;  %v9318_v23 = vpack.c.bf16 %v3264_v63, %v3260_v49  ;;  %v9320_v24 = vpack.c.bf16 %v3309_v20, %v3302_v34  ;;  %v3310_v48 = vrot.slane %v3266_v14, 7  ;;  %v8134_v49 = vld [vmem:[#allocation7 + $0x168] ss:$16 sps:$4 sm:$0xff]   ;;  %v8142_v53 = vld [vmem:[#allocation7 + $0x18c] ss:$16 sps:$4 sm:$0xff]  }
 0x260   : > { %v9322_v25 = vpack.c.bf16 %v3332_v10, %v3333_v21  ;;  %v3335_v26 = vrot.slane %v3266_v14, 1  ;;  %v3334_v27 = vrot.slane %v9298_v57, 1  ;;  %v3307_v28 = vsel %vm397_vm0, %v3301_v2, %v3306_v15  ;;  %v8137_v54 = vld [vmem:[#allocation7 + $0x180] ss:$16 sps:$4 sm:$0xff]   ;;  %v8140_v55 = vld [vmem:[#allocation7 + $0x188] ss:$16 sps:$4 sm:$0xff]  }
 0x261   : > { %v9334_v32 = vpack.c.bf16 %v3266_v14, %v9298_v57  ;;  %v3330_v33 = vsel %vm3324_vm6, %v3328_v3, %v3329_v16  ;;  %v7651_v35 = vpack.c.bf16 %v3307_v28, %v3301_v2  ;;  %v3311_v6 = vsel %vm397_vm0, %v3303_v19, %v3310_v48  ;;  %v8145_v57 = vld [vmem:[#allocation7 + $0x1a4] ss:$16 sps:$4 sm:$0xff]   ;;  %v8148_v58 = vld [vmem:[#allocation7 + $0x1ac] ss:$16 sps:$4 sm:$0xff]   ;;  %v8143_v34 = vld [vmem:[#allocation7 + $0x1a0] ss:$16 sps:$4 sm:$0xff]  }
 0x262   : > { %5698 = vmatpush1.bf16.msra.mxu0 %v8113_v12  ;;  %5956 = vmatpush1.bf16.msra.mxu1 %v8116_v30  ;;  %v9338_v38 = vpack.c.bf16 %v3329_v16, %v3330_v33  ;;  %v9340_v41 = vpack.c.bf16 %v3311_v6, %v3303_v19  ;;  %v3336_v60 = vsel %vm3324_vm6, %v3334_v27, %v3335_v26  ;;  %v8146_v50 = vld [vmem:[#allocation7 + $0x1a8] ss:$16 sps:$4 sm:$0xff]   ;;  %v8151_v56 = vld [vmem:[#allocation7 + $0x1c4] ss:$16 sps:$4 sm:$0xff]   ;;  %v8154_v59 = vld [vmem:[#allocation7 + $0x1cc] ss:$16 sps:$4 sm:$0xff]  }
 0x263   : > { %5699 = vmatprep.subr.bf16.mxu0 %v8121_v18  ;;  %5957 = vmatprep.subr.bf16.mxu1 %v8124_v22  ;;  %v9347_v42 = vpack.c.bf16 %v3335_v26, %v3336_v60  ;;  %v8149_v37 = vld [vmem:[#allocation7 + $0x1c0] ss:$16 sps:$4 sm:$0xff]   ;;  %v8152_v62 = vld [vmem:[#allocation7 + $0x1c8] ss:$16 sps:$4 sm:$0xff]   ;;  %v8157_v63 = vld [vmem:[#allocation7 + $0x1e4] ss:$16 sps:$4 sm:$0xff]  }
 0x264   : > { %7652 = vmatprep.mubr.msk.bf16.mxu0 %vm9329_vm9, %v7651_v35  ;;  %7680 = vmatprep.mubr.msk.bf16.mxu1 %vm9329_vm9, %v7651_v35  ;;  %v8160_v0 = vld [vmem:[#allocation7 + $0x1ec] ss:$16 sps:$4 sm:$0xff]   ;;  %v8155_v1 = vld [vmem:[#allocation7 + $0x1e0] ss:$16 sps:$4 sm:$0xff]   ;;  %v8158_v2 = vld [vmem:[#allocation7 + $0x1e8] ss:$16 sps:$4 sm:$0xff]  }
 0x265   : > { %v8163_v3 = vld [vmem:[#allocation7 + $0x204] ss:$16 sps:$4 sm:$0xff]   ;;  %v8166_v4 = vld [vmem:[#allocation7 + $0x20c] ss:$16 sps:$4 sm:$0xff]   ;;  %v8161_v5 = vld [vmem:[#allocation7 + $0x200] ss:$16 sps:$4 sm:$0xff]  }
 0x266   : > { %5700 = vmatpush1.bf16.msra.mxu0 %v8119_v31  ;;  %5958 = vmatpush1.bf16.msra.mxu1 %v8122_v36  ;;  %v8164_v9 = vld [vmem:[#allocation7 + $0x208] ss:$16 sps:$4 sm:$0xff]   ;;  %v8169_v10 = vld [vmem:[#allocation7 + $0x224] ss:$16 sps:$4 sm:$0xff]   ;;  %v8172_v12 = vld [vmem:[#allocation7 + $0x22c] ss:$16 sps:$4 sm:$0xff]  }
 0x267   : > { %5701 = vmatprep.subr.bf16.mxu0 %v8127_v61  ;;  %5959 = vmatprep.subr.bf16.mxu1 %v8130_v39  ;;  %v8167_v30 = vld [vmem:[#allocation7 + $0x220] ss:$16 sps:$4 sm:$0xff]   ;;  %v8170_v15 = vld [vmem:[#allocation7 + $0x228] ss:$16 sps:$4 sm:$0xff]   ;;  %v8175_v16 = vld [vmem:[#allocation7 + $0x244] ss:$16 sps:$4 sm:$0xff]  }
 0x268   : > { %v8178_v14 = vld [vmem:[#allocation7 + $0x24c] ss:$16 sps:$4 sm:$0xff]   ;;  %v8181_v18 = vld [vmem:[#allocation7 + $0x264] ss:$16 sps:$4 sm:$0xff]   ;;  %v8179_v20 = vld [vmem:[#allocation7 + $0x260] ss:$16 sps:$4 sm:$0xff]  }
 0x269   : > { %v8184_v19 = vld [vmem:[#allocation7 + $0x26c] ss:$16 sps:$4 sm:$0xff]   ;;  %v8182_v21 = vld [vmem:[#allocation7 + $0x268] ss:$16 sps:$4 sm:$0xff]   ;;  %v8187_v22 = vld [vmem:[#allocation7 + $0x284] ss:$16 sps:$4 sm:$0xff]  }
 0x26a   : > { %5702 = vmatpush1.bf16.msra.mxu0 %v8125_v43  ;;  %5960 = vmatpush1.bf16.msra.mxu1 %v8128_v44  ;;  %v8190_v48 = vld [vmem:[#allocation7 + $0x28c] ss:$16 sps:$4 sm:$0xff]   ;;  %v8185_v26 = vld [vmem:[#allocation7 + $0x280] ss:$16 sps:$4 sm:$0xff]   ;;  %v8188_v27 = vld [vmem:[#allocation7 + $0x288] ss:$16 sps:$4 sm:$0xff]  }
 0x26b   : > { %5703 = vmatprep.subr.bf16.mxu0 %v8133_v45  ;;  %5961 = vmatprep.subr.bf16.mxu1 %v8136_v46  ;;  %v8193_v28 = vld [vmem:[#allocation7 + $0x2a4] ss:$16 sps:$4 sm:$0xff]   ;;  %v8196_v31 = vld [vmem:[#allocation7 + $0x2ac] ss:$16 sps:$4 sm:$0xff]   ;;  %v8191_v33 = vld [vmem:[#allocation7 + $0x2a0] ss:$16 sps:$4 sm:$0xff]  }
 0x26c   : > { %v8194_v35 = vld [vmem:[#allocation7 + $0x2a8] ss:$16 sps:$4 sm:$0xff]   ;;  %v8199_v36 = vld [vmem:[#allocation7 + $0x2c4] ss:$16 sps:$4 sm:$0xff]   ;;  %v8202_v61 = vld [vmem:[#allocation7 + $0x2cc] ss:$16 sps:$4 sm:$0xff]  }
 0x26d   : > { %v8197_v6 = vld [vmem:[#allocation7 + $0x2c0] ss:$16 sps:$4 sm:$0xff]   ;;  %v8200_v39 = vld [vmem:[#allocation7 + $0x2c8] ss:$16 sps:$4 sm:$0xff]   ;;  %v8208_v60 = vld [vmem:[#allocation7 + $0x2ec] ss:$16 sps:$4 sm:$0xff]  }
 0x26e   : > { %5704 = vmatpush1.bf16.msra.mxu0 %v8131_v47  ;;  %5962 = vmatpush1.bf16.msra.mxu1 %v8134_v49  ;;  %v8203_v43 = vld [vmem:[#allocation7 + $0x2e0] ss:$16 sps:$4 sm:$0xff]   ;;  %v8206_v44 = vld [vmem:[#allocation7 + $0x2e8] ss:$16 sps:$4 sm:$0xff]   ;;  %v8211_v45 = vld [vmem:[#allocation7 + $0x304] ss:$16 sps:$4 sm:$0xff]  }
 0x26f   : > { %5705 = vmatprep.subr.bf16.mxu0 %v8139_v51  ;;  %5963 = vmatprep.subr.bf16.mxu1 %v8142_v53  ;;  %v8214_v46 = vld [vmem:[#allocation7 + $0x30c] ss:$16 sps:$4 sm:$0xff]   ;;  %v8209_v47 = vld [vmem:[#allocation7 + $0x300] ss:$16 sps:$4 sm:$0xff]   ;;  %v8212_v49 = vld [vmem:[#allocation7 + $0x308] ss:$16 sps:$4 sm:$0xff]  }
 0x270   : > { %v8217_v51 = vld [vmem:[#allocation7 + $0x324] ss:$16 sps:$4 sm:$0xff]   ;;  %v8220_v53 = vld [vmem:[#allocation7 + $0x32c] ss:$16 sps:$4 sm:$0xff]  }
 0x272   : > { %5706 = vmatpush1.bf16.msra.mxu0 %v8137_v54  ;;  %5964 = vmatpush1.bf16.msra.mxu1 %v8140_v55  ;;  %v8215_v54 = vld [vmem:[#allocation7 + $0x320] ss:$16 sps:$4 sm:$0xff]   ;;  %v8218_v55 = vld [vmem:[#allocation7 + $0x328] ss:$16 sps:$4 sm:$0xff]  }
 0x273   : > { %5707 = vmatprep.subr.bf16.mxu0 %v8145_v57  ;;  %5965 = vmatprep.subr.bf16.mxu1 %v8148_v58  ;;  %v8223_v57 = vld [vmem:[#allocation7 + $0x344] ss:$16 sps:$4 sm:$0xff]   ;;  %v8226_v58 = vld [vmem:[#allocation7 + $0x34c] ss:$16 sps:$4 sm:$0xff]  }
 0x276   : > { %5708 = vmatpush1.bf16.msra.mxu0 %v8143_v34  ;;  %5966 = vmatpush1.bf16.msra.mxu1 %v8146_v50  ;;  %v8221_v34 = vld [vmem:[#allocation7 + $0x340] ss:$16 sps:$4 sm:$0xff]   ;;  %v8224_v50 = vld [vmem:[#allocation7 + $0x348] ss:$16 sps:$4 sm:$0xff]  }
 0x277   : > { %5709 = vmatprep.subr.bf16.mxu0 %v8151_v56  ;;  %5967 = vmatprep.subr.bf16.mxu1 %v8154_v59  ;;  %v8229_v56 = vld [vmem:[#allocation7 + $0x364] ss:$16 sps:$4 sm:$0xff]   ;;  %v8232_v59 = vld [vmem:[#allocation7 + $0x36c] ss:$16 sps:$4 sm:$0xff]  }
 0x27a   : > { %5710 = vmatpush1.bf16.msra.mxu0 %v8149_v37  ;;  %5968 = vmatpush1.bf16.msra.mxu1 %v8152_v62  ;;  %v8227_v37 = vld [vmem:[#allocation7 + $0x360] ss:$16 sps:$4 sm:$0xff]   ;;  %v8230_v62 = vld [vmem:[#allocation7 + $0x368] ss:$16 sps:$4 sm:$0xff]  }
 0x27b   : > { %5711 = vmatprep.subr.bf16.mxu0 %v8157_v63  ;;  %5969 = vmatprep.subr.bf16.mxu1 %v8160_v0  ;;  %v8235_v63 = vld [vmem:[#allocation7 + $0x384] ss:$16 sps:$4 sm:$0xff]   ;;  %v8238_v0 = vld [vmem:[#allocation7 + $0x38c] ss:$16 sps:$4 sm:$0xff]  }
 0x27e   : > { %5712 = vmatpush1.bf16.msra.mxu0 %v8155_v1  ;;  %5970 = vmatpush1.bf16.msra.mxu1 %v8158_v2  ;;  %v8233_v1 = vld [vmem:[#allocation7 + $0x380] ss:$16 sps:$4 sm:$0xff]   ;;  %v8236_v2 = vld [vmem:[#allocation7 + $0x388] ss:$16 sps:$4 sm:$0xff]  }
 0x27f   : > { %5724 = vmatprep.subr.bf16.mxu0 %v8163_v3  ;;  %5982 = vmatprep.subr.bf16.mxu1 %v8166_v4  ;;  %v8241_v3 = vld [vmem:[#allocation7 + $0x3a4] ss:$16 sps:$4 sm:$0xff]   ;;  %v8244_v4 = vld [vmem:[#allocation7 + $0x3ac] ss:$16 sps:$4 sm:$0xff]  }
 0x281   : > { %7656 = vmatmul.mubr.msk.bf16.vlgmr.msra.gmra.mrb[8].mxu0 %vm9329_vm9, %v9304_v52  ;;  %7684 = vmatmul.mubr.msk.bf16.vlgmr.msra.gmra.mrb[8].mxu1 %vm9329_vm9, %v9304_v52  ;;  %v8176_v52 = vld [vmem:[#allocation7 + $0x248] ss:$16 sps:$4 sm:$0xff]  }
 0x282   : > { %5725 = vmatpush1.bf16.msra.mxu0 %v8161_v5  ;;  %7660 = vmatprep.mubr.msk.bf16.mxu0 %vm9329_vm9, %v9340_v41  ;;  %v8239_v5 = vld [vmem:[#allocation7 + $0x3a0] ss:$16 sps:$4 sm:$0xff]  }
 0x283   : > { %5983 = vmatpush1.bf16.msra.mxu1 %v8164_v9  ;;  %7688 = vmatprep.mubr.msk.bf16.mxu1 %vm9329_vm9, %v9340_v41  ;;  %v8205_v41 = vld [vmem:[#allocation7 + $0x2e4] ss:$16 sps:$4 sm:$0xff]   ;;  %v8242_v9 = vld [vmem:[#allocation7 + $0x3a8] ss:$16 sps:$4 sm:$0xff]  }
 0x284   : > { %5726 = vmatprep.subr.bf16.mxu0 %v8169_v10  ;;  %5984 = vmatprep.subr.bf16.mxu1 %v8172_v12  ;;  %v8247_v10 = vld [vmem:[#allocation7 + $0x3c4] ss:$16 sps:$4 sm:$0xff]   ;;  %v8250_v12 = vld [vmem:[#allocation7 + $0x3cc] ss:$16 sps:$4 sm:$0xff]  }
 0x286   : > { %5727 = vmatpush1.bf16.msra.mxu0 %v8167_v30  ;;  %v8245_v30 = vld [vmem:[#allocation7 + $0x3c0] ss:$16 sps:$4 sm:$0xff]  }
 0x287   : > { %5985 = vmatpush1.bf16.msra.mxu1 %v8170_v15  ;;  %5728 = vmatprep.subr.bf16.mxu0 %v8175_v16  ;;  %v8248_v15 = vld [vmem:[#allocation7 + $0x3c8] ss:$16 sps:$4 sm:$0xff]   ;;  %v8253_v16 = vld [vmem:[#allocation7 + $0x3e4] ss:$16 sps:$4 sm:$0xff]  }
 0x288   : > { %5986 = vmatprep.subr.bf16.mxu1 %v8178_v14  ;;  %v8256_v14 = vld [vmem:[#allocation7 + $0x3ec] ss:$16 sps:$4 sm:$0xff]  }
 0x28a   : > { %5729 = vmatpush1.bf16.msra.mxu0 %v8173_v17  ;;  %v8251_v17 = vld [vmem:[#allocation7 + $0x3e0] ss:$16 sps:$4 sm:$0xff]  }
 0x28b   : > { %5987 = vmatpush1.bf16.msra.mxu1 %v8176_v52  ;;  %5730 = vmatprep.subr.bf16.mxu0 %v8181_v18  ;;  %v8254_v52 = vld [vmem:[#allocation7 + $0x3e8] ss:$16 sps:$4 sm:$0xff]   ;;  %v8259_v18 = vld [vmem:[#allocation7 + $0x404] ss:$16 sps:$4 sm:$0xff]  }
 0x28c   : > { %5988 = vmatprep.subr.bf16.mxu1 %v8184_v19  ;;  %v8262_v19 = vld [vmem:[#allocation7 + $0x40c] ss:$16 sps:$4 sm:$0xff]  }
 0x28e   : > { %5731 = vmatpush1.bf16.msra.mxu0 %v8179_v20  ;;  %v8257_v20 = vld [vmem:[#allocation7 + $0x400] ss:$16 sps:$4 sm:$0xff]  }
 0x28f   : > { %5989 = vmatpush1.bf16.msra.mxu1 %v8182_v21  ;;  %5732 = vmatprep.subr.bf16.mxu0 %v8187_v22  ;;  %v8260_v21 = vld [vmem:[#allocation7 + $0x408] ss:$16 sps:$4 sm:$0xff]   ;;  %v8265_v22 = vld [vmem:[#allocation7 + $0x424] ss:$16 sps:$4 sm:$0xff]  }
 0x290   : > { %5990 = vmatprep.subr.bf16.mxu1 %v8190_v48  ;;  %v8268_v48 = vld [vmem:[#allocation7 + $0x42c] ss:$16 sps:$4 sm:$0xff]  }
 0x292   : > { %5733 = vmatpush1.bf16.msra.mxu0 %v8185_v26  ;;  %v8263_v26 = vld [vmem:[#allocation7 + $0x420] ss:$16 sps:$4 sm:$0xff]  }
 0x293   : > { %5991 = vmatpush1.bf16.msra.mxu1 %v8188_v27  ;;  %5734 = vmatprep.subr.bf16.mxu0 %v8193_v28  ;;  %v8266_v27 = vld [vmem:[#allocation7 + $0x428] ss:$16 sps:$4 sm:$0xff]   ;;  %v8271_v28 = vld [vmem:[#allocation7 + $0x444] ss:$16 sps:$4 sm:$0xff]  }
 0x294   : > { %5992 = vmatprep.subr.bf16.mxu1 %v8196_v31  ;;  %v8274_v31 = vld [vmem:[#allocation7 + $0x44c] ss:$16 sps:$4 sm:$0xff]  }
 0x296   : > { %5735 = vmatpush1.bf16.msra.mxu0 %v8191_v33  ;;  %v8269_v33 = vld [vmem:[#allocation7 + $0x440] ss:$16 sps:$4 sm:$0xff]  }
 0x297   : > { %5993 = vmatpush1.bf16.msra.mxu1 %v8194_v35  ;;  %5736 = vmatprep.subr.bf16.mxu0 %v8199_v36  ;;  %v8272_v35 = vld [vmem:[#allocation7 + $0x448] ss:$16 sps:$4 sm:$0xff]   ;;  %v8277_v36 = vld [vmem:[#allocation7 + $0x464] ss:$16 sps:$4 sm:$0xff]  }
 0x298   : > { %5994 = vmatprep.subr.bf16.mxu1 %v8202_v61  ;;  %v8278_v61 = vld [vmem:[#allocation7 + $0x468] ss:$16 sps:$4 sm:$0xff]  }
 0x29a   : > { %5737 = vmatpush1.bf16.msra.mxu0 %v8197_v6  ;;  %v8283_v6 = vld [vmem:[#allocation7 + $0x484] ss:$16 sps:$4 sm:$0xff]  }
 0x29b   : > { %5995 = vmatpush1.bf16.msra.mxu1 %v8200_v39  ;;  %5738 = vmatprep.subr.bf16.mxu0 %v8205_v41  ;;  %v8286_v39 = vld [vmem:[#allocation7 + $0x48c] ss:$16 sps:$4 sm:$0xff]   ;;  %v8284_v41 = vld [vmem:[#allocation7 + $0x488] ss:$16 sps:$4 sm:$0xff]  }
 0x29c   : > { %5996 = vmatprep.subr.bf16.mxu1 %v8208_v60  ;;  %v8289_v60 = vld [vmem:[#allocation7 + $0x4a4] ss:$16 sps:$4 sm:$0xff]  }
 0x29e   : > { %5739 = vmatpush1.bf16.msra.mxu0 %v8203_v43  ;;  %v8292_v43 = vld [vmem:[#allocation7 + $0x4ac] ss:$16 sps:$4 sm:$0xff]  }
 0x29f   : > { %5997 = vmatpush1.bf16.msra.mxu1 %v8206_v44  ;;  %5740 = vmatprep.subr.bf16.mxu0 %v8211_v45  ;;  %v8287_v44 = vld [vmem:[#allocation7 + $0x4a0] ss:$16 sps:$4 sm:$0xff]   ;;  %v8290_v45 = vld [vmem:[#allocation7 + $0x4a8] ss:$16 sps:$4 sm:$0xff]  }
 0x2a0   : > { %5998 = vmatprep.subr.bf16.mxu1 %v8214_v46  ;;  %v8295_v46 = vld [vmem:[#allocation7 + $0x4c4] ss:$16 sps:$4 sm:$0xff]  }
 0x2a2   : > { %5741 = vmatpush1.bf16.msra.mxu0 %v8209_v47  ;;  %v8298_v47 = vld [vmem:[#allocation7 + $0x4cc] ss:$16 sps:$4 sm:$0xff]  }
 0x2a3   : > { %5999 = vmatpush1.bf16.msra.mxu1 %v8212_v49  ;;  %5742 = vmatprep.subr.bf16.mxu0 %v8217_v51  ;;  %v8293_v49 = vld [vmem:[#allocation7 + $0x4c0] ss:$16 sps:$4 sm:$0xff]   ;;  %v8296_v51 = vld [vmem:[#allocation7 + $0x4c8] ss:$16 sps:$4 sm:$0xff]  }
 0x2a4   : > { %6000 = vmatprep.subr.bf16.mxu1 %v8220_v53  ;;  %v8301_v53 = vld [vmem:[#allocation7 + $0x4e4] ss:$16 sps:$4 sm:$0xff]  }
 0x2a6   : > { %5743 = vmatpush1.bf16.msra.mxu0 %v8215_v54  ;;  %v8304_v54 = vld [vmem:[#allocation7 + $0x4ec] ss:$16 sps:$4 sm:$0xff]  }
 0x2a7   : > { %6001 = vmatpush1.bf16.msra.mxu1 %v8218_v55  ;;  %5744 = vmatprep.subr.bf16.mxu0 %v8223_v57  ;;  %v8299_v55 = vld [vmem:[#allocation7 + $0x4e0] ss:$16 sps:$4 sm:$0xff]   ;;  %v8302_v57 = vld [vmem:[#allocation7 + $0x4e8] ss:$16 sps:$4 sm:$0xff]  }
 0x2a8   : > { %6002 = vmatprep.subr.bf16.mxu1 %v8226_v58  ;;  %v8307_v58 = vld [vmem:[#allocation7 + $0x504] ss:$16 sps:$4 sm:$0xff]  }
 0x2aa   : > { %5745 = vmatpush1.bf16.msra.mxu0 %v8221_v34  ;;  %v8310_v34 = vld [vmem:[#allocation7 + $0x50c] ss:$16 sps:$4 sm:$0xff]  }
 0x2ab   : > { %6003 = vmatpush1.bf16.msra.mxu1 %v8224_v50  ;;  %5746 = vmatprep.subr.bf16.mxu0 %v8229_v56  ;;  %v8305_v50 = vld [vmem:[#allocation7 + $0x500] ss:$16 sps:$4 sm:$0xff]   ;;  %v8308_v56 = vld [vmem:[#allocation7 + $0x508] ss:$16 sps:$4 sm:$0xff]  }
 0x2ac   : > { %6004 = vmatprep.subr.bf16.mxu1 %v8232_v59  ;;  %v8313_v59 = vld [vmem:[#allocation7 + $0x524] ss:$16 sps:$4 sm:$0xff]  }
 0x2ae   : > { %5747 = vmatpush1.bf16.msra.mxu0 %v8227_v37  ;;  %v8316_v37 = vld [vmem:[#allocation7 + $0x52c] ss:$16 sps:$4 sm:$0xff]  }
 0x2af   : > { %6005 = vmatpush1.bf16.msra.mxu1 %v8230_v62  ;;  %5748 = vmatprep.subr.bf16.mxu0 %v8235_v63  ;;  %v8311_v62 = vld [vmem:[#allocation7 + $0x520] ss:$16 sps:$4 sm:$0xff]   ;;  %v8314_v63 = vld [vmem:[#allocation7 + $0x528] ss:$16 sps:$4 sm:$0xff]  }
 0x2b0   : > { %6006 = vmatprep.subr.bf16.mxu1 %v8238_v0  ;;  %v8319_v0 = vld [vmem:[#allocation7 + $0x544] ss:$16 sps:$4 sm:$0xff]  }
 0x2b2   : > { %5749 = vmatpush1.bf16.msra.mxu0 %v8233_v1  ;;  %v8322_v1 = vld [vmem:[#allocation7 + $0x54c] ss:$16 sps:$4 sm:$0xff]  }
 0x2b3   : > { %6007 = vmatpush1.bf16.msra.mxu1 %v8236_v2  ;;  %5750 = vmatprep.subr.bf16.mxu0 %v8241_v3  ;;  %v8317_v2 = vld [vmem:[#allocation7 + $0x540] ss:$16 sps:$4 sm:$0xff]   ;;  %v8320_v3 = vld [vmem:[#allocation7 + $0x548] ss:$16 sps:$4 sm:$0xff]  }
 0x2b4   : > { %6008 = vmatprep.subr.bf16.mxu1 %v8244_v4  ;;  %v8325_v4 = vld [vmem:[#allocation7 + $0x564] ss:$16 sps:$4 sm:$0xff]  }
 0x2b6   : > { %5751 = vmatpush1.bf16.msra.mxu0 %v8239_v5  ;;  %v8328_v5 = vld [vmem:[#allocation7 + $0x56c] ss:$16 sps:$4 sm:$0xff]  }
 0x2b7   : > { %6009 = vmatpush1.bf16.msra.mxu1 %v8242_v9  ;;  %5752 = vmatprep.subr.bf16.mxu0 %v8247_v10  ;;  %v8323_v9 = vld [vmem:[#allocation7 + $0x560] ss:$16 sps:$4 sm:$0xff]   ;;  %v8326_v10 = vld [vmem:[#allocation7 + $0x568] ss:$16 sps:$4 sm:$0xff]  }
 0x2b8   : > { %6010 = vmatprep.subr.bf16.mxu1 %v8250_v12  ;;  %v8331_v12 = vld [vmem:[#allocation7 + $0x584] ss:$16 sps:$4 sm:$0xff]  }
 0x2ba   : > { %5753 = vmatpush1.bf16.msra.mxu0 %v8245_v30  ;;  %v8334_v30 = vld [vmem:[#allocation7 + $0x58c] ss:$16 sps:$4 sm:$0xff]  }
 0x2bb   : > { %6011 = vmatpush1.bf16.msra.mxu1 %v8248_v15  ;;  %5754 = vmatprep.subr.bf16.mxu0 %v8253_v16  ;;  %v8329_v15 = vld [vmem:[#allocation7 + $0x580] ss:$16 sps:$4 sm:$0xff]   ;;  %v8332_v16 = vld [vmem:[#allocation7 + $0x588] ss:$16 sps:$4 sm:$0xff]  }
 0x2bc   : > { %6012 = vmatprep.subr.bf16.mxu1 %v8256_v14  ;;  %v8337_v14 = vld [vmem:[#allocation7 + $0x5a4] ss:$16 sps:$4 sm:$0xff]  }
 0x2be   : > { %5755 = vmatpush1.bf16.msra.mxu0 %v8251_v17  ;;  %v8340_v17 = vld [vmem:[#allocation7 + $0x5ac] ss:$16 sps:$4 sm:$0xff]  }
 0x2bf   : > { %6013 = vmatpush1.bf16.msra.mxu1 %v8254_v52  ;;  %5767 = vmatprep.subr.bf16.mxu0 %v8259_v18  ;;  %v8335_v52 = vld [vmem:[#allocation7 + $0x5a0] ss:$16 sps:$4 sm:$0xff]   ;;  %v8338_v18 = vld [vmem:[#allocation7 + $0x5a8] ss:$16 sps:$4 sm:$0xff]  }
 0x2c0   : > { %6025 = vmatprep.subr.bf16.mxu1 %v8262_v19  ;;  %v8343_v19 = vld [vmem:[#allocation7 + $0x5c4] ss:$16 sps:$4 sm:$0xff]  }
 0x2c1   : > { %7664 = vmatmul.mubr.msk.bf16.vlgmr.msra.gmra.mrb[8].mxu0 %vm9329_vm9, %v9320_v24 }
 0x2c2   : > { %7692 = vmatmul.mubr.msk.bf16.vlgmr.msra.gmra.mrb[8].mxu1 %vm9329_vm9, %v9320_v24  ;;  %5768 = vmatpush1.bf16.msra.mxu0 %v8257_v20  ;;  %v8280_v24 = vld [vmem:[#allocation7 + $0x46c] ss:$16 sps:$4 sm:$0xff]  }
 0x2c3   : > { %5799 = vmatprep.mubr.bf16.mxu0 %v9318_v23  ;;  %6026 = vmatpush1.bf16.msra.mxu1 %v8260_v21  ;;  %v8346_v20 = vld [vmem:[#allocation7 + $0x5cc] ss:$16 sps:$4 sm:$0xff]   ;;  %v8341_v21 = vld [vmem:[#allocation7 + $0x5c0] ss:$16 sps:$4 sm:$0xff]  }
 0x2c4   : > { %6057 = vmatprep.mubr.bf16.mxu1 %v9318_v23  ;;  %5769 = vmatprep.subr.bf16.mxu0 %v8265_v22  ;;  %v8281_v23 = vld [vmem:[#allocation7 + $0x480] ss:$16 sps:$4 sm:$0xff]   ;;  %v8344_v22 = vld [vmem:[#allocation7 + $0x5c8] ss:$16 sps:$4 sm:$0xff]  }
 0x2c5   : > { %6027 = vmatprep.subr.bf16.mxu1 %v8268_v48  ;;  %v8349_v48 = vld [vmem:[#allocation7 + $0x5e4] ss:$16 sps:$4 sm:$0xff]  }
 0x2c6   : > { %5770 = vmatpush1.bf16.msra.mxu0 %v8263_v26  ;;  %v8352_v26 = vld [vmem:[#allocation7 + $0x5ec] ss:$16 sps:$4 sm:$0xff]  }
 0x2c7   : > { %6028 = vmatpush1.bf16.msra.mxu1 %v8266_v27  ;;  %5771 = vmatprep.subr.bf16.mxu0 %v8271_v28  ;;  %v8347_v27 = vld [vmem:[#allocation7 + $0x5e0] ss:$16 sps:$4 sm:$0xff]   ;;  %v8350_v28 = vld [vmem:[#allocation7 + $0x5e8] ss:$16 sps:$4 sm:$0xff]  }
 0x2c8   : > { %6029 = vmatprep.subr.bf16.mxu1 %v8274_v31  ;;  %v8355_v31 = vld [vmem:[#allocation7 + $0x604] ss:$16 sps:$4 sm:$0xff]  }
 0x2ca   : > { %5772 = vmatpush1.bf16.msra.mxu0 %v8269_v33  ;;  %v8358_v33 = vld [vmem:[#allocation7 + $0x60c] ss:$16 sps:$4 sm:$0xff]  }
 0x2cb   : > { %6030 = vmatpush1.bf16.msra.mxu1 %v8272_v35  ;;  %5773 = vmatprep.subr.bf16.mxu0 %v8277_v36  ;;  %v8353_v35 = vld [vmem:[#allocation7 + $0x600] ss:$16 sps:$4 sm:$0xff]   ;;  %v8356_v36 = vld [vmem:[#allocation7 + $0x608] ss:$16 sps:$4 sm:$0xff]  }
 0x2cc   : > { %6031 = vmatprep.subr.bf16.mxu1 %v8280_v24  ;;  %v8361_v24 = vld [vmem:[#allocation7 + $0x624] ss:$16 sps:$4 sm:$0xff]  }
 0x2ce   : > { %5774 = vmatpush1.bf16.msra.mxu0 %v8275_v29  ;;  %v8364_v29 = vld [vmem:[#allocation7 + $0x62c] ss:$16 sps:$4 sm:$0xff]  }
 0x2cf   : > { %6032 = vmatpush1.bf16.msra.mxu1 %v8278_v61  ;;  %5775 = vmatprep.subr.bf16.mxu0 %v8283_v6  ;;  %v8359_v61 = vld [vmem:[#allocation7 + $0x620] ss:$16 sps:$4 sm:$0xff]   ;;  %v8362_v6 = vld [vmem:[#allocation7 + $0x628] ss:$16 sps:$4 sm:$0xff]  }
 0x2d0   : > { %6033 = vmatprep.subr.bf16.mxu1 %v8286_v39  ;;  %v8367_v39 = vld [vmem:[#allocation7 + $0x644] ss:$16 sps:$4 sm:$0xff]  }
 0x2d2   : > { %5776 = vmatpush1.bf16.msra.mxu0 %v8281_v23  ;;  %v8370_v23 = vld [vmem:[#allocation7 + $0x64c] ss:$16 sps:$4 sm:$0xff]  }
 0x2d3   : > { %6034 = vmatpush1.bf16.msra.mxu1 %v8284_v41  ;;  %5777 = vmatprep.subr.bf16.mxu0 %v8289_v60  ;;  %v8365_v41 = vld [vmem:[#allocation7 + $0x640] ss:$16 sps:$4 sm:$0xff]   ;;  %v8368_v60 = vld [vmem:[#allocation7 + $0x648] ss:$16 sps:$4 sm:$0xff]  }
 0x2d4   : > { %6035 = vmatprep.subr.bf16.mxu1 %v8292_v43  ;;  %v8373_v43 = vld [vmem:[#allocation7 + $0x664] ss:$16 sps:$4 sm:$0xff]  }
 0x2d6   : > { %5778 = vmatpush1.bf16.msra.mxu0 %v8287_v44  ;;  %v8371_v44 = vld [vmem:[#allocation7 + $0x660] ss:$16 sps:$4 sm:$0xff]  }
 0x2d7   : > { %6036 = vmatpush1.bf16.msra.mxu1 %v8290_v45  ;;  %5779 = vmatprep.subr.bf16.mxu0 %v8295_v46  ;;  %v8374_v45 = vld [vmem:[#allocation7 + $0x668] ss:$16 sps:$4 sm:$0xff]   ;;  %v8379_v46 = vld [vmem:[#allocation7 + $0x684] ss:$16 sps:$4 sm:$0xff]  }
 0x2d8   : > { %6037 = vmatprep.subr.bf16.mxu1 %v8298_v47  ;;  %v8382_v47 = vld [vmem:[#allocation7 + $0x68c] ss:$16 sps:$4 sm:$0xff]  }
 0x2da   : > { %5780 = vmatpush1.bf16.msra.mxu0 %v8293_v49  ;;  %v8380_v49 = vld [vmem:[#allocation7 + $0x688] ss:$16 sps:$4 sm:$0xff]  }
 0x2db   : > { %6038 = vmatpush1.bf16.msra.mxu1 %v8296_v51  ;;  %5781 = vmatprep.subr.bf16.mxu0 %v8301_v53  ;;  %v8385_v51 = vld [vmem:[#allocation7 + $0x6a4] ss:$16 sps:$4 sm:$0xff]   ;;  %v8388_v53 = vld [vmem:[#allocation7 + $0x6ac] ss:$16 sps:$4 sm:$0xff]  }
 0x2dc   : > { %6039 = vmatprep.subr.bf16.mxu1 %v8304_v54  ;;  %v8383_v54 = vld [vmem:[#allocation7 + $0x6a0] ss:$16 sps:$4 sm:$0xff]  }
 0x2de   : > { %5782 = vmatpush1.bf16.msra.mxu0 %v8299_v55  ;;  %v8386_v55 = vld [vmem:[#allocation7 + $0x6a8] ss:$16 sps:$4 sm:$0xff]  }
 0x2df   : > { %6040 = vmatpush1.bf16.msra.mxu1 %v8302_v57  ;;  %5783 = vmatprep.subr.bf16.mxu0 %v8307_v58  ;;  %v8391_v57 = vld [vmem:[#allocation7 + $0x6c4] ss:$16 sps:$4 sm:$0xff]  }
 0x2e0   : > { %6041 = vmatprep.subr.bf16.mxu1 %v8310_v34  ;;  %v8394_v34 = vld [vmem:[#allocation7 + $0x6cc] ss:$16 sps:$4 sm:$0xff]  }
 0x2e2   : > { %5784 = vmatpush1.bf16.msra.mxu0 %v8305_v50 }
 0x2e3   : > { %6042 = vmatpush1.bf16.msra.mxu1 %v8308_v56  ;;  %5785 = vmatprep.subr.bf16.mxu0 %v8313_v59 }
 0x2e4   : > { %6043 = vmatprep.subr.bf16.mxu1 %v8316_v37 }
 0x2e6   : > { %5786 = vmatpush1.bf16.msra.mxu0 %v8311_v62  ;;  %v8389_v62 = vld [vmem:[#allocation7 + $0x6c0] ss:$16 sps:$4 sm:$0xff]  }
 0x2e7   : > { %6044 = vmatpush1.bf16.msra.mxu1 %v8314_v63  ;;  %5787 = vmatprep.subr.bf16.mxu0 %v8319_v0 }
 0x2e8   : > { %6045 = vmatprep.subr.bf16.mxu1 %v8322_v1  ;;  %v8392_v1 = vld [vmem:[#allocation7 + $0x6c8] ss:$16 sps:$4 sm:$0xff]  }
 0x2ea   : > { %5788 = vmatpush1.bf16.msra.mxu0 %v8317_v2  ;;  %v8397_v2 = vld [vmem:[#allocation7 + $0x6e4] ss:$16 sps:$4 sm:$0xff]  }
 0x2eb   : > { %6046 = vmatpush1.bf16.msra.mxu1 %v8320_v3  ;;  %5789 = vmatprep.subr.bf16.mxu0 %v8325_v4  ;;  %v8400_v4 = vld [vmem:[#allocation7 + $0x6ec] ss:$16 sps:$4 sm:$0xff]  }
 0x2ec   : > { %6047 = vmatprep.subr.bf16.mxu1 %v8328_v5  ;;  %v8395_v5 = vld [vmem:[#allocation7 + $0x6e0] ss:$16 sps:$4 sm:$0xff]  }
 0x2ee   : > { %5790 = vmatpush1.bf16.msra.mxu0 %v8323_v9  ;;  %v8398_v9 = vld [vmem:[#allocation7 + $0x6e8] ss:$16 sps:$4 sm:$0xff]  }
 0x2ef   : > { %6048 = vmatpush1.bf16.msra.mxu1 %v8326_v10  ;;  %5791 = vmatprep.subr.bf16.mxu0 %v8331_v12  ;;  %v8403_v10 = vld [vmem:[#allocation7 + $0x704] ss:$16 sps:$4 sm:$0xff]   ;;  %v8406_v12 = vld [vmem:[#allocation7 + $0x70c] ss:$16 sps:$4 sm:$0xff]  }
 0x2f0   : > { %6049 = vmatprep.subr.bf16.mxu1 %v8334_v30  ;;  %v8401_v30 = vld [vmem:[#allocation7 + $0x700] ss:$16 sps:$4 sm:$0xff]  }
 0x2f2   : > { %5792 = vmatpush1.bf16.msra.mxu0 %v8329_v15  ;;  %v8404_v15 = vld [vmem:[#allocation7 + $0x708] ss:$16 sps:$4 sm:$0xff]  }
 0x2f3   : > { %6050 = vmatpush1.bf16.msra.mxu1 %v8332_v16  ;;  %5793 = vmatprep.subr.bf16.mxu0 %v8337_v14  ;;  %v8409_v16 = vld [vmem:[#allocation7 + $0x724] ss:$16 sps:$4 sm:$0xff]   ;;  %v8412_v14 = vld [vmem:[#allocation7 + $0x72c] ss:$16 sps:$4 sm:$0xff]  }
 0x2f4   : > { %6051 = vmatprep.subr.bf16.mxu1 %v8340_v17  ;;  %v8407_v17 = vld [vmem:[#allocation7 + $0x720] ss:$16 sps:$4 sm:$0xff]  }
 0x2f6   : > { %5794 = vmatpush1.bf16.msra.mxu0 %v8335_v52  ;;  %v8410_v52 = vld [vmem:[#allocation7 + $0x728] ss:$16 sps:$4 sm:$0xff]  }
 0x2f7   : > { %6052 = vmatpush1.bf16.msra.mxu1 %v8338_v18  ;;  %5795 = vmatprep.subr.bf16.mxu0 %v8343_v19  ;;  %v8415_v18 = vld [vmem:[#allocation7 + $0x744] ss:$16 sps:$4 sm:$0xff]   ;;  %v8418_v19 = vld [vmem:[#allocation7 + $0x74c] ss:$16 sps:$4 sm:$0xff]  }
 0x2f8   : > { %6053 = vmatprep.subr.bf16.mxu1 %v8346_v20  ;;  %v8413_v20 = vld [vmem:[#allocation7 + $0x740] ss:$16 sps:$4 sm:$0xff]  }
 0x2fa   : > { %5796 = vmatpush1.bf16.msra.mxu0 %v8341_v21  ;;  %v8416_v21 = vld [vmem:[#allocation7 + $0x748] ss:$16 sps:$4 sm:$0xff]  }
 0x2fb   : > { %6054 = vmatpush1.bf16.msra.mxu1 %v8344_v22  ;;  %5797 = vmatprep.subr.bf16.mxu0 %v8349_v48  ;;  %v8421_v22 = vld [vmem:[#allocation7 + $0x764] ss:$16 sps:$4 sm:$0xff]   ;;  %v8424_v48 = vld [vmem:[#allocation7 + $0x76c] ss:$16 sps:$4 sm:$0xff]  }
 0x2fc   : > { %6055 = vmatprep.subr.bf16.mxu1 %v8352_v26  ;;  %v8419_v26 = vld [vmem:[#allocation7 + $0x760] ss:$16 sps:$4 sm:$0xff]  }
 0x2fe   : > { %5798 = vmatpush1.bf16.msra.mxu0 %v8347_v27  ;;  %v8422_v27 = vld [vmem:[#allocation7 + $0x768] ss:$16 sps:$4 sm:$0xff]  }
 0x2ff   : > { %6056 = vmatpush1.bf16.msra.mxu1 %v8350_v28  ;;  %5810 = vmatprep.subr.bf16.mxu0 %v8355_v31  ;;  %v8427_v28 = vld [vmem:[#allocation7 + $0x784] ss:$16 sps:$4 sm:$0xff]   ;;  %v8430_v31 = vld [vmem:[#allocation7 + $0x78c] ss:$16 sps:$4 sm:$0xff]  }
 0x300   : > { %6068 = vmatprep.subr.bf16.mxu1 %v8358_v33  ;;  %v8425_v33 = vld [vmem:[#allocation7 + $0x780] ss:$16 sps:$4 sm:$0xff]  }
 0x301   : > { %5800 = vmatmul.mubr.bf16.vlgmr.msra.gmra.mrb[8].mxu0 %v9300_v40 }
 0x302   : > { %6058 = vmatmul.mubr.bf16.vlgmr.msra.gmra.mrb[8].mxu1 %v9300_v40  ;;  %5811 = vmatpush1.bf16.msra.mxu0 %v8353_v35  ;;  %v8376_v40 = vld [vmem:[#allocation7 + $0x66c] ss:$16 sps:$4 sm:$0xff]   ;;  %v8428_v35 = vld [vmem:[#allocation7 + $0x788] ss:$16 sps:$4 sm:$0xff]  }
 0x303   : > { %5842 = vmatprep.mubr.bf16.mxu0 %v9334_v32  ;;  %6069 = vmatpush1.bf16.msra.mxu1 %v8356_v36  ;;  %v8433_v36 = vld [vmem:[#allocation7 + $0x7a4] ss:$16 sps:$4 sm:$0xff]  }
 0x304   : > { %6100 = vmatprep.mubr.bf16.mxu1 %v9334_v32  ;;  %5812 = vmatprep.subr.bf16.mxu0 %v8361_v24  ;;  %v8377_v32 = vld [vmem:[#allocation7 + $0x680] ss:$16 sps:$4 sm:$0xff]   ;;  %v8436_v24 = vld [vmem:[#allocation7 + $0x7ac] ss:$16 sps:$4 sm:$0xff]  }
 0x305   : > { %6070 = vmatprep.subr.bf16.mxu1 %v8364_v29  ;;  %v8431_v29 = vld [vmem:[#allocation7 + $0x7a0] ss:$16 sps:$4 sm:$0xff]  }
 0x306   : > { %5813 = vmatpush1.bf16.msra.mxu0 %v8359_v61  ;;  %v8434_v61 = vld [vmem:[#allocation7 + $0x7a8] ss:$16 sps:$4 sm:$0xff]  }
 0x307   : > { %6071 = vmatpush1.bf16.msra.mxu1 %v8362_v6  ;;  %5814 = vmatprep.subr.bf16.mxu0 %v8367_v39  ;;  %v8439_v6 = vld [vmem:[#allocation7 + $0x7c4] ss:$16 sps:$4 sm:$0xff]   ;;  %v8442_v39 = vld [vmem:[#allocation7 + $0x7cc] ss:$16 sps:$4 sm:$0xff]  }
 0x308   : > { %6072 = vmatprep.subr.bf16.mxu1 %v8370_v23  ;;  %v8437_v23 = vld [vmem:[#allocation7 + $0x7c0] ss:$16 sps:$4 sm:$0xff]  }
 0x30a   : > { %5815 = vmatpush1.bf16.msra.mxu0 %v8365_v41  ;;  %v8440_v41 = vld [vmem:[#allocation7 + $0x7c8] ss:$16 sps:$4 sm:$0xff]  }
 0x30b   : > { %6073 = vmatpush1.bf16.msra.mxu1 %v8368_v60  ;;  %5816 = vmatprep.subr.bf16.mxu0 %v8373_v43  ;;  %v8445_v60 = vld [vmem:[#allocation7 + $0x7e4] ss:$16 sps:$4 sm:$0xff]   ;;  %v8448_v43 = vld [vmem:[#allocation7 + $0x7ec] ss:$16 sps:$4 sm:$0xff]  }
 0x30c   : > { %6074 = vmatprep.subr.bf16.mxu1 %v8376_v40  ;;  %v8443_v40 = vld [vmem:[#allocation7 + $0x7e0] ss:$16 sps:$4 sm:$0xff]  }
 0x30e   : > { %5817 = vmatpush1.bf16.msra.mxu0 %v8371_v44  ;;  %v8446_v44 = vld [vmem:[#allocation7 + $0x7e8] ss:$16 sps:$4 sm:$0xff]  }
 0x30f   : > { %6075 = vmatpush1.bf16.msra.mxu1 %v8374_v45  ;;  %5818 = vmatprep.subr.bf16.mxu0 %v8379_v46  ;;  %v8451_v45 = vld [vmem:[#allocation7 + $0x804] ss:$16 sps:$4 sm:$0xff]   ;;  %v8454_v46 = vld [vmem:[#allocation7 + $0x80c] ss:$16 sps:$4 sm:$0xff]  }
 0x310   : > { %6076 = vmatprep.subr.bf16.mxu1 %v8382_v47  ;;  %v8449_v47 = vld [vmem:[#allocation7 + $0x800] ss:$16 sps:$4 sm:$0xff]  }
 0x312   : > { %5819 = vmatpush1.bf16.msra.mxu0 %v8377_v32  ;;  %v8452_v32 = vld [vmem:[#allocation7 + $0x808] ss:$16 sps:$4 sm:$0xff]  }
 0x313   : > { %6077 = vmatpush1.bf16.msra.mxu1 %v8380_v49  ;;  %5820 = vmatprep.subr.bf16.mxu0 %v8385_v51  ;;  %v8457_v51 = vld [vmem:[#allocation7 + $0x824] ss:$16 sps:$4 sm:$0xff]   ;;  %v6262_v49 = vld [vmem:[%s9729_s3 + $0x128] sm:$0xff] }
 0x314   : > { %v9373_v58 = vpop.f32.mrb[4].mxu0  ;;  %6078 = vmatprep.subr.bf16.mxu1 %v8388_v53  ;;  %v9375_v50 = vpop.f32.mrb[4].mxu1  ;;  %v8460_v53 = vld [vmem:[#allocation7 + $0x82c] ss:$16 sps:$4 sm:$0xff]  }
 0x315   : > { %v9377_v56 = vpop.f32.mrb[5].mxu0  ;;  %v9379_v59 = vpop.f32.mrb[5].mxu1 }
 0x316   : > { %v9381_v37 = vpop.f32.mrb[6].mxu0  ;;  %5821 = vmatpush1.bf16.msra.mxu0 %v8383_v54  ;;  %v9383_v63 = vpop.f32.mrb[6].mxu1  ;;  %v8455_v54 = vld [vmem:[#allocation7 + $0x820] ss:$16 sps:$4 sm:$0xff]  }
 0x317   : > { %6079 = vmatpush1.bf16.msra.mxu1 %v8386_v55  ;;  %v9385_v0 = vpop.f32.mrb[7].mxu0  ;;  %5822 = vmatprep.subr.bf16.mxu0 %v8391_v57  ;;  %v9387_v3 = vpop.f32.mrb[7].mxu1  ;;  %v8458_v55 = vld [vmem:[#allocation7 + $0x828] ss:$16 sps:$4 sm:$0xff]   ;;  %v8463_v57 = vld [vmem:[#allocation7 + $0x844] ss:$16 sps:$4 sm:$0xff]  }
 0x318   : > { %6080 = vmatprep.subr.bf16.mxu1 %v8394_v34  ;;  %v8466_v34 = vld [vmem:[#allocation7 + $0x84c] ss:$16 sps:$4 sm:$0xff]  }
 0x31a   : > { %5823 = vmatpush1.bf16.msra.mxu0 %v8389_v62  ;;  %v8461_v62 = vld [vmem:[#allocation7 + $0x840] ss:$16 sps:$4 sm:$0xff]  }
 0x31b   : > { %6081 = vmatpush1.bf16.msra.mxu1 %v8392_v1  ;;  %5824 = vmatprep.subr.bf16.mxu0 %v8397_v2  ;;  %v8469_v1 = vld [vmem:[#allocation7 + $0x864] ss:$16 sps:$4 sm:$0xff]   ;;  %v8472_v2 = vld [vmem:[#allocation7 + $0x86c] ss:$16 sps:$4 sm:$0xff]  }
 0x31c   : > { %6082 = vmatprep.subr.bf16.mxu1 %v8400_v4  ;;  %v8467_v4 = vld [vmem:[#allocation7 + $0x860] ss:$16 sps:$4 sm:$0xff]  }
 0x31e   : > { %5825 = vmatpush1.bf16.msra.mxu0 %v8395_v5  ;;  %v8470_v5 = vld [vmem:[#allocation7 + $0x868] ss:$16 sps:$4 sm:$0xff]  }
 0x31f   : > { %6083 = vmatpush1.bf16.msra.mxu1 %v8398_v9  ;;  %5826 = vmatprep.subr.bf16.mxu0 %v8403_v10  ;;  %v8475_v9 = vld [vmem:[#allocation7 + $0x884] ss:$16 sps:$4 sm:$0xff]   ;;  %v8478_v10 = vld [vmem:[#allocation7 + $0x88c] ss:$16 sps:$4 sm:$0xff]  }
 0x320   : > { %6084 = vmatprep.subr.bf16.mxu1 %v8406_v12  ;;  %v8476_v12 = vld [vmem:[#allocation7 + $0x888] ss:$16 sps:$4 sm:$0xff]  }
 0x322   : > { %5827 = vmatpush1.bf16.msra.mxu0 %v8401_v30  ;;  %v8481_v30 = vld [vmem:[#allocation7 + $0x8a4] ss:$16 sps:$4 sm:$0xff]  }
 0x323   : > { %6085 = vmatpush1.bf16.msra.mxu1 %v8404_v15  ;;  %5828 = vmatprep.subr.bf16.mxu0 %v8409_v16  ;;  %v8484_v15 = vld [vmem:[#allocation7 + $0x8ac] ss:$16 sps:$4 sm:$0xff]   ;;  %v8479_v16 = vld [vmem:[#allocation7 + $0x8a0] ss:$16 sps:$4 sm:$0xff]  }
 0x324   : > { %6086 = vmatprep.subr.bf16.mxu1 %v8412_v14  ;;  %v8482_v14 = vld [vmem:[#allocation7 + $0x8a8] ss:$16 sps:$4 sm:$0xff]  }
 0x326   : > { %5829 = vmatpush1.bf16.msra.mxu0 %v8407_v17  ;;  %v8487_v17 = vld [vmem:[#allocation7 + $0x8c4] ss:$16 sps:$4 sm:$0xff]  }
 0x327   : > { %6087 = vmatpush1.bf16.msra.mxu1 %v8410_v52  ;;  %5830 = vmatprep.subr.bf16.mxu0 %v8415_v18  ;;  %v8490_v52 = vld [vmem:[#allocation7 + $0x8cc] ss:$16 sps:$4 sm:$0xff]   ;;  %v8485_v18 = vld [vmem:[#allocation7 + $0x8c0] ss:$16 sps:$4 sm:$0xff]  }
 0x328   : > { %6088 = vmatprep.subr.bf16.mxu1 %v8418_v19  ;;  %v8488_v19 = vld [vmem:[#allocation7 + $0x8c8] ss:$16 sps:$4 sm:$0xff]  }
 0x32a   : > { %5831 = vmatpush1.bf16.msra.mxu0 %v8413_v20  ;;  %v8493_v20 = vld [vmem:[#allocation7 + $0x8e4] ss:$16 sps:$4 sm:$0xff]  }
 0x32b   : > { %6089 = vmatpush1.bf16.msra.mxu1 %v8416_v21  ;;  %5832 = vmatprep.subr.bf16.mxu0 %v8421_v22  ;;  %v8496_v21 = vld [vmem:[#allocation7 + $0x8ec] ss:$16 sps:$4 sm:$0xff]   ;;  %v8491_v22 = vld [vmem:[#allocation7 + $0x8e0] ss:$16 sps:$4 sm:$0xff]  }
 0x32c   : > { %6090 = vmatprep.subr.bf16.mxu1 %v8424_v48  ;;  %v8494_v48 = vld [vmem:[#allocation7 + $0x8e8] ss:$16 sps:$4 sm:$0xff]  }
 0x32e   : > { %5833 = vmatpush1.bf16.msra.mxu0 %v8419_v26  ;;  %v8499_v26 = vld [vmem:[#allocation7 + $0x904] ss:$16 sps:$4 sm:$0xff]  }
 0x32f   : > { %6091 = vmatpush1.bf16.msra.mxu1 %v8422_v27  ;;  %5834 = vmatprep.subr.bf16.mxu0 %v8427_v28  ;;  %v8502_v27 = vld [vmem:[#allocation7 + $0x90c] ss:$16 sps:$4 sm:$0xff]   ;;  %v8497_v28 = vld [vmem:[#allocation7 + $0x900] ss:$16 sps:$4 sm:$0xff]  }
 0x330   : > { %6092 = vmatprep.subr.bf16.mxu1 %v8430_v31  ;;  %v8500_v31 = vld [vmem:[#allocation7 + $0x908] ss:$16 sps:$4 sm:$0xff]  }
 0x332   : > { %5835 = vmatpush1.bf16.msra.mxu0 %v8425_v33  ;;  %v8505_v33 = vld [vmem:[#allocation7 + $0x924] ss:$16 sps:$4 sm:$0xff]  }
 0x333   : > { %6093 = vmatpush1.bf16.msra.mxu1 %v8428_v35  ;;  %5836 = vmatprep.subr.bf16.mxu0 %v8433_v36  ;;  %v8508_v35 = vld [vmem:[#allocation7 + $0x92c] ss:$16 sps:$4 sm:$0xff]   ;;  %v8503_v36 = vld [vmem:[#allocation7 + $0x920] ss:$16 sps:$4 sm:$0xff]  }
 0x334   : > { %6094 = vmatprep.subr.bf16.mxu1 %v8436_v24  ;;  %v8506_v24 = vld [vmem:[#allocation7 + $0x928] ss:$16 sps:$4 sm:$0xff]  }
 0x336   : > { %5837 = vmatpush1.bf16.msra.mxu0 %v8431_v29  ;;  %v8511_v29 = vld [vmem:[#allocation7 + $0x944] ss:$16 sps:$4 sm:$0xff]  }
 0x337   : > { %6095 = vmatpush1.bf16.msra.mxu1 %v8434_v61  ;;  %5838 = vmatprep.subr.bf16.mxu0 %v8439_v6  ;;  %v8514_v61 = vld [vmem:[#allocation7 + $0x94c] ss:$16 sps:$4 sm:$0xff]   ;;  %v8509_v6 = vld [vmem:[#allocation7 + $0x940] ss:$16 sps:$4 sm:$0xff]  }
 0x338   : > { %6096 = vmatprep.subr.bf16.mxu1 %v8442_v39  ;;  %v8512_v39 = vld [vmem:[#allocation7 + $0x948] ss:$16 sps:$4 sm:$0xff]  }
 0x33a   : > { %5839 = vmatpush1.bf16.msra.mxu0 %v8437_v23  ;;  %v8517_v23 = vld [vmem:[#allocation7 + $0x964] ss:$16 sps:$4 sm:$0xff]  }
 0x33b   : > { %6097 = vmatpush1.bf16.msra.mxu1 %v8440_v41  ;;  %5840 = vmatprep.subr.bf16.mxu0 %v8445_v60  ;;  %v8520_v41 = vld [vmem:[#allocation7 + $0x96c] ss:$16 sps:$4 sm:$0xff]   ;;  %v8515_v60 = vld [vmem:[#allocation7 + $0x960] ss:$16 sps:$4 sm:$0xff]  }
 0x33c   : > { %6098 = vmatprep.subr.bf16.mxu1 %v8448_v43  ;;  %v8518_v43 = vld [vmem:[#allocation7 + $0x968] ss:$16 sps:$4 sm:$0xff]  }
 0x33e   : > { %5841 = vmatpush1.bf16.msra.mxu0 %v8443_v40  ;;  %v8523_v40 = vld [vmem:[#allocation7 + $0x984] ss:$16 sps:$4 sm:$0xff]  }
 0x33f   : > { %6099 = vmatpush1.bf16.msra.mxu1 %v8446_v44  ;;  %5853 = vmatprep.subr.bf16.mxu0 %v8451_v45  ;;  %v8526_v44 = vld [vmem:[#allocation7 + $0x98c] ss:$16 sps:$4 sm:$0xff]   ;;  %v8521_v45 = vld [vmem:[#allocation7 + $0x980] ss:$16 sps:$4 sm:$0xff]  }
 0x340   : > { %6111 = vmatprep.subr.bf16.mxu1 %v8454_v46  ;;  %v8524_v46 = vld [vmem:[#allocation7 + $0x988] ss:$16 sps:$4 sm:$0xff]  }
 0x341   : > { %5843 = vmatmul.mubr.bf16.vlgmr.msra.gmra.mrb[8].mxu0 %v9308_v13 }
 0x342   : > { %6101 = vmatmul.mubr.bf16.vlgmr.msra.gmra.mrb[8].mxu1 %v9308_v13  ;;  %5854 = vmatpush1.bf16.msra.mxu0 %v8449_v47  ;;  %v8464_v13 = vld [vmem:[#allocation7 + $0x848] ss:$16 sps:$4 sm:$0xff]   ;;  %v8529_v47 = vld [vmem:[#allocation7 + $0x9a4] ss:$16 sps:$4 sm:$0xff]  }
 0x343   : > { %7667 = vmatprep.mubr.msk.bf16.mxu0 %vm9391_vm10, %v9338_v38  ;;  %6112 = vmatpush1.bf16.msra.mxu1 %v8452_v32  ;;  %v8532_v32 = vld [vmem:[#allocation7 + $0x9ac] ss:$16 sps:$4 sm:$0xff]  }
 0x344   : > { %7695 = vmatprep.mubr.msk.bf16.mxu1 %vm9391_vm10, %v9338_v38  ;;  %5855 = vmatprep.subr.bf16.mxu0 %v8457_v51  ;;  %v8473_v38 = vld [vmem:[#allocation7 + $0x880] ss:$16 sps:$4 sm:$0xff]  }
 0x345   : > { %6113 = vmatprep.subr.bf16.mxu1 %v8460_v53  ;;  %v8527_v51 = vld [vmem:[#allocation7 + $0x9a0] ss:$16 sps:$4 sm:$0xff]   ;;  %v8530_v53 = vld [vmem:[#allocation7 + $0x9a8] ss:$16 sps:$4 sm:$0xff]  }
 0x346   : > { %5856 = vmatpush1.bf16.msra.mxu0 %v8455_v54  ;;  %v8535_v54 = vld [vmem:[#allocation7 + $0x9c4] ss:$16 sps:$4 sm:$0xff]  }
 0x347   : > { %6114 = vmatpush1.bf16.msra.mxu1 %v8458_v55  ;;  %5857 = vmatprep.subr.bf16.mxu0 %v8463_v57  ;;  %v8538_v55 = vld [vmem:[#allocation7 + $0x9cc] ss:$16 sps:$4 sm:$0xff]   ;;  %v8533_v57 = vld [vmem:[#allocation7 + $0x9c0] ss:$16 sps:$4 sm:$0xff]  }
 0x348   : > { %6115 = vmatprep.subr.bf16.mxu1 %v8466_v34  ;;  %v8536_v34 = vld [vmem:[#allocation7 + $0x9c8] ss:$16 sps:$4 sm:$0xff]  }
 0x34a   : > { %5858 = vmatpush1.bf16.msra.mxu0 %v8461_v62  ;;  %v8541_v62 = vld [vmem:[#allocation7 + $0x9e4] ss:$16 sps:$4 sm:$0xff]  }
 0x34b   : > { %6116 = vmatpush1.bf16.msra.mxu1 %v8464_v13  ;;  %5859 = vmatprep.subr.bf16.mxu0 %v8469_v1  ;;  %v8544_v13 = vld [vmem:[#allocation7 + $0x9ec] ss:$16 sps:$4 sm:$0xff]   ;;  %v8539_v1 = vld [vmem:[#allocation7 + $0x9e0] ss:$16 sps:$4 sm:$0xff]  }
 0x34c   : > { %6117 = vmatprep.subr.bf16.mxu1 %v8472_v2  ;;  %v8542_v2 = vld [vmem:[#allocation7 + $0x9e8] ss:$16 sps:$4 sm:$0xff]  }
 0x34e   : > { %5860 = vmatpush1.bf16.msra.mxu0 %v8467_v4  ;;  %v8547_v4 = vld [vmem:[#allocation7 + $0xa04] ss:$16 sps:$4 sm:$0xff]  }
 0x34f   : > { %6118 = vmatpush1.bf16.msra.mxu1 %v8470_v5  ;;  %5861 = vmatprep.subr.bf16.mxu0 %v8475_v9  ;;  %v8550_v5 = vld [vmem:[#allocation7 + $0xa0c] ss:$16 sps:$4 sm:$0xff]   ;;  %v8545_v9 = vld [vmem:[#allocation7 + $0xa00] ss:$16 sps:$4 sm:$0xff]  }
 0x350   : > { %6119 = vmatprep.subr.bf16.mxu1 %v8478_v10  ;;  %v8548_v10 = vld [vmem:[#allocation7 + $0xa08] ss:$16 sps:$4 sm:$0xff]  }
 0x352   : > { %5862 = vmatpush1.bf16.msra.mxu0 %v8473_v38  ;;  %v8553_v38 = vld [vmem:[#allocation7 + $0xa24] ss:$16 sps:$4 sm:$0xff]  }
 0x353   : > { %6120 = vmatpush1.bf16.msra.mxu1 %v8476_v12  ;;  %5863 = vmatprep.subr.bf16.mxu0 %v8481_v30  ;;  %v8556_v12 = vld [vmem:[#allocation7 + $0xa2c] ss:$16 sps:$4 sm:$0xff]   ;;  %v8551_v30 = vld [vmem:[#allocation7 + $0xa20] ss:$16 sps:$4 sm:$0xff]  }
 0x354   : > { %6121 = vmatprep.subr.bf16.mxu1 %v8484_v15  ;;  %v8554_v15 = vld [vmem:[#allocation7 + $0xa28] ss:$16 sps:$4 sm:$0xff]  }
 0x356   : > { %5864 = vmatpush1.bf16.msra.mxu0 %v8479_v16  ;;  %v8559_v16 = vld [vmem:[#allocation7 + $0xa44] ss:$16 sps:$4 sm:$0xff]  }
 0x357   : > { %6122 = vmatpush1.bf16.msra.mxu1 %v8482_v14  ;;  %5865 = vmatprep.subr.bf16.mxu0 %v8487_v17  ;;  %v8562_v14 = vld [vmem:[#allocation7 + $0xa4c] ss:$16 sps:$4 sm:$0xff]   ;;  %v8557_v17 = vld [vmem:[#allocation7 + $0xa40] ss:$16 sps:$4 sm:$0xff]  }
 0x358   : > { %6123 = vmatprep.subr.bf16.mxu1 %v8490_v52  ;;  %v8565_v52 = vld [vmem:[#allocation7 + $0xa64] ss:$16 sps:$4 sm:$0xff]  }
 0x35a   : > { %5866 = vmatpush1.bf16.msra.mxu0 %v8485_v18  ;;  %v8568_v18 = vld [vmem:[#allocation7 + $0xa6c] ss:$16 sps:$4 sm:$0xff]  }
 0x35b   : > { %6124 = vmatpush1.bf16.msra.mxu1 %v8488_v19  ;;  %5867 = vmatprep.subr.bf16.mxu0 %v8493_v20  ;;  %v8563_v19 = vld [vmem:[#allocation7 + $0xa60] ss:$16 sps:$4 sm:$0xff]   ;;  %v8566_v20 = vld [vmem:[#allocation7 + $0xa68] ss:$16 sps:$4 sm:$0xff]  }
 0x35c   : > { %6125 = vmatprep.subr.bf16.mxu1 %v8496_v21  ;;  %v8571_v21 = vld [vmem:[#allocation7 + $0xa84] ss:$16 sps:$4 sm:$0xff]  }
 0x35e   : > { %5868 = vmatpush1.bf16.msra.mxu0 %v8491_v22  ;;  %v8574_v22 = vld [vmem:[#allocation7 + $0xa8c] ss:$16 sps:$4 sm:$0xff]  }
 0x35f   : > { %6126 = vmatpush1.bf16.msra.mxu1 %v8494_v48  ;;  %5869 = vmatprep.subr.bf16.mxu0 %v8499_v26  ;;  %v8572_v48 = vld [vmem:[#allocation7 + $0xa88] ss:$16 sps:$4 sm:$0xff]   ;;  %v8577_v26 = vld [vmem:[#allocation7 + $0xaa4] ss:$16 sps:$4 sm:$0xff]  }
 0x360   : > { %6127 = vmatprep.subr.bf16.mxu1 %v8502_v27  ;;  %v8580_v27 = vld [vmem:[#allocation7 + $0xaac] ss:$16 sps:$4 sm:$0xff]  }
 0x362   : > { %5870 = vmatpush1.bf16.msra.mxu0 %v8497_v28  ;;  %v8575_v28 = vld [vmem:[#allocation7 + $0xaa0] ss:$16 sps:$4 sm:$0xff]  }
 0x363   : > { %6128 = vmatpush1.bf16.msra.mxu1 %v8500_v31  ;;  %5871 = vmatprep.subr.bf16.mxu0 %v8505_v33  ;;  %v8578_v31 = vld [vmem:[#allocation7 + $0xaa8] ss:$16 sps:$4 sm:$0xff]   ;;  %v8583_v33 = vld [vmem:[#allocation7 + $0xac4] ss:$16 sps:$4 sm:$0xff]  }
 0x364   : > { %6129 = vmatprep.subr.bf16.mxu1 %v8508_v35  ;;  %v8586_v35 = vld [vmem:[#allocation7 + $0xacc] ss:$16 sps:$4 sm:$0xff]  }
 0x366   : > { %5872 = vmatpush1.bf16.msra.mxu0 %v8503_v36  ;;  %v8581_v36 = vld [vmem:[#allocation7 + $0xac0] ss:$16 sps:$4 sm:$0xff]  }
 0x367   : > { %6130 = vmatpush1.bf16.msra.mxu1 %v8506_v24  ;;  %5873 = vmatprep.subr.bf16.mxu0 %v8511_v29  ;;  %v8584_v24 = vld [vmem:[#allocation7 + $0xac8] ss:$16 sps:$4 sm:$0xff]   ;;  %v8589_v29 = vld [vmem:[#allocation7 + $0xae4] ss:$16 sps:$4 sm:$0xff]  }
 0x368   : > { %6131 = vmatprep.subr.bf16.mxu1 %v8514_v61  ;;  %v8592_v61 = vld [vmem:[#allocation7 + $0xaec] ss:$16 sps:$4 sm:$0xff]  }
 0x36a   : > { %5874 = vmatpush1.bf16.msra.mxu0 %v8509_v6  ;;  %v8587_v6 = vld [vmem:[#allocation7 + $0xae0] ss:$16 sps:$4 sm:$0xff]  }
 0x36b   : > { %6132 = vmatpush1.bf16.msra.mxu1 %v8512_v39  ;;  %5875 = vmatprep.subr.bf16.mxu0 %v8517_v23  ;;  %v8590_v39 = vld [vmem:[#allocation7 + $0xae8] ss:$16 sps:$4 sm:$0xff]   ;;  %v8595_v23 = vld [vmem:[#allocation7 + $0xb04] ss:$16 sps:$4 sm:$0xff]  }
 0x36c   : > { %6133 = vmatprep.subr.bf16.mxu1 %v8520_v41  ;;  %v8598_v41 = vld [vmem:[#allocation7 + $0xb0c] ss:$16 sps:$4 sm:$0xff]  }
 0x36e   : > { %5876 = vmatpush1.bf16.msra.mxu0 %v8515_v60  ;;  %v8593_v60 = vld [vmem:[#allocation7 + $0xb00] ss:$16 sps:$4 sm:$0xff]  }
 0x36f   : > { %6134 = vmatpush1.bf16.msra.mxu1 %v8518_v43  ;;  %5877 = vmatprep.subr.bf16.mxu0 %v8523_v40  ;;  %v8596_v43 = vld [vmem:[#allocation7 + $0xb08] ss:$16 sps:$4 sm:$0xff]   ;;  %v8601_v40 = vld [vmem:[#allocation7 + $0xb24] ss:$16 sps:$4 sm:$0xff]  }
 0x370   : > { %6135 = vmatprep.subr.bf16.mxu1 %v8526_v44  ;;  %v8604_v44 = vld [vmem:[#allocation7 + $0xb2c] ss:$16 sps:$4 sm:$0xff]  }
 0x372   : > { %5878 = vmatpush1.bf16.msra.mxu0 %v8521_v45  ;;  %v8599_v45 = vld [vmem:[#allocation7 + $0xb20] ss:$16 sps:$4 sm:$0xff]  }
 0x373   : > { %6136 = vmatpush1.bf16.msra.mxu1 %v8524_v46  ;;  %5879 = vmatprep.subr.bf16.mxu0 %v8529_v47  ;;  %v8602_v46 = vld [vmem:[#allocation7 + $0xb28] ss:$16 sps:$4 sm:$0xff]   ;;  %v8607_v47 = vld [vmem:[#allocation7 + $0xb44] ss:$16 sps:$4 sm:$0xff]  }
 0x374   : > { %6137 = vmatprep.subr.bf16.mxu1 %v8532_v32  ;;  %v8610_v32 = vld [vmem:[#allocation7 + $0xb4c] ss:$16 sps:$4 sm:$0xff]  }
 0x376   : > { %5880 = vmatpush1.bf16.msra.mxu0 %v8527_v51  ;;  %v8605_v51 = vld [vmem:[#allocation7 + $0xb40] ss:$16 sps:$4 sm:$0xff]  }
 0x377   : > { %6138 = vmatpush1.bf16.msra.mxu1 %v8530_v53  ;;  %5881 = vmatprep.subr.bf16.mxu0 %v8535_v54  ;;  %v8608_v53 = vld [vmem:[#allocation7 + $0xb48] ss:$16 sps:$4 sm:$0xff]   ;;  %v8613_v54 = vld [vmem:[#allocation7 + $0xb64] ss:$16 sps:$4 sm:$0xff]  }
 0x378   : > { %6139 = vmatprep.subr.bf16.mxu1 %v8538_v55  ;;  %v8616_v55 = vld [vmem:[#allocation7 + $0xb6c] ss:$16 sps:$4 sm:$0xff]  }
 0x37a   : > { %5882 = vmatpush1.bf16.msra.mxu0 %v8533_v57  ;;  %v8611_v57 = vld [vmem:[#allocation7 + $0xb60] ss:$16 sps:$4 sm:$0xff]  }
 0x37b   : > { %6140 = vmatpush1.bf16.msra.mxu1 %v8536_v34  ;;  %5883 = vmatprep.subr.bf16.mxu0 %v8541_v62  ;;  %v8614_v34 = vld [vmem:[#allocation7 + $0xb68] ss:$16 sps:$4 sm:$0xff]   ;;  %v8619_v62 = vld [vmem:[#allocation7 + $0xb84] ss:$16 sps:$4 sm:$0xff]  }
 0x37c   : > { %6141 = vmatprep.subr.bf16.mxu1 %v8544_v13  ;;  %v8622_v13 = vld [vmem:[#allocation7 + $0xb8c] ss:$16 sps:$4 sm:$0xff]  }
 0x37e   : > { %5884 = vmatpush1.bf16.msra.mxu0 %v8539_v1  ;;  %v8617_v1 = vld [vmem:[#allocation7 + $0xb80] ss:$16 sps:$4 sm:$0xff]  }
 0x37f   : > { %6142 = vmatpush1.bf16.msra.mxu1 %v8542_v2  ;;  %5896 = vmatprep.subr.bf16.mxu0 %v8547_v4  ;;  %v8620_v2 = vld [vmem:[#allocation7 + $0xb88] ss:$16 sps:$4 sm:$0xff]   ;;  %v8625_v4 = vld [vmem:[#allocation7 + $0xba4] ss:$16 sps:$4 sm:$0xff]  }
 0x380   : > { %6154 = vmatprep.subr.bf16.mxu1 %v8550_v5  ;;  %v8628_v5 = vld [vmem:[#allocation7 + $0xbac] ss:$16 sps:$4 sm:$0xff]  }
 0x381   : > { %7670 = vmatmul.mubr.msk.bf16.vlgmr.msra.gmra.mrb[8].mxu0 %vm9391_vm10, %v9306_v8 }
 0x382   : > { %7698 = vmatmul.mubr.msk.bf16.vlgmr.msra.gmra.mrb[8].mxu1 %vm9391_vm10, %v9306_v8  ;;  %5897 = vmatpush1.bf16.msra.mxu0 %v8545_v9  ;;  %v8560_v8 = vld [vmem:[#allocation7 + $0xa48] ss:$16 sps:$4 sm:$0xff]   ;;  %v8623_v9 = vld [vmem:[#allocation7 + $0xba0] ss:$16 sps:$4 sm:$0xff]  }
 0x383   : > { %7673 = vmatprep.mubr.msk.bf16.mxu0 %vm9391_vm10, %v9347_v42  ;;  %6155 = vmatpush1.bf16.msra.mxu1 %v8548_v10  ;;  %v8626_v10 = vld [vmem:[#allocation7 + $0xba8] ss:$16 sps:$4 sm:$0xff]  }
 0x384   : > { %7701 = vmatprep.mubr.msk.bf16.mxu1 %vm9391_vm10, %v9347_v42  ;;  %5898 = vmatprep.subr.bf16.mxu0 %v8553_v38  ;;  %v8569_v42 = vld [vmem:[#allocation7 + $0xa80] ss:$16 sps:$4 sm:$0xff]   ;;  %v8631_v38 = vld [vmem:[#allocation7 + $0xbc4] ss:$16 sps:$4 sm:$0xff]  }
 0x385   : > { %6156 = vmatprep.subr.bf16.mxu1 %v8556_v12  ;;  %v8634_v12 = vld [vmem:[#allocation7 + $0xbcc] ss:$16 sps:$4 sm:$0xff]  }
 0x386   : > { %5899 = vmatpush1.bf16.msra.mxu0 %v8551_v30  ;;  %v8629_v30 = vld [vmem:[#allocation7 + $0xbc0] ss:$16 sps:$4 sm:$0xff]  }
 0x387   : > { %6157 = vmatpush1.bf16.msra.mxu1 %v8554_v15  ;;  %5900 = vmatprep.subr.bf16.mxu0 %v8559_v16  ;;  %v8632_v15 = vld [vmem:[#allocation7 + $0xbc8] ss:$16 sps:$4 sm:$0xff]   ;;  %v8637_v16 = vld [vmem:[#allocation7 + $0xbe4] ss:$16 sps:$4 sm:$0xff]  }
 0x388   : > { %6158 = vmatprep.subr.bf16.mxu1 %v8562_v14  ;;  %v8640_v14 = vld [vmem:[#allocation7 + $0xbec] ss:$16 sps:$4 sm:$0xff]  }
 0x38a   : > { %5901 = vmatpush1.bf16.msra.mxu0 %v8557_v17  ;;  %v6241_v17 = vld [vmem:[%s9729_s3 + $0x80] sm:$0xff] }
 0x38b   : > { %6159 = vmatpush1.bf16.msra.mxu1 %v8560_v8  ;;  %5902 = vmatprep.subr.bf16.mxu0 %v8565_v52  ;;  %v6242_v8 = vld [vmem:[%s9729_s3 + $0x88] sm:$0xff]  ;;  %v6273_v52 = vld [vmem:[%s9729_s3 + $0x180] sm:$0xff] }
 0x38c   : > { %6160 = vmatprep.subr.bf16.mxu1 %v8568_v18  ;;  %v6274_v18 = vld [vmem:[%s9729_s3 + $0x188] sm:$0xff] }
 0x38e   : > { %5903 = vmatpush1.bf16.msra.mxu0 %v8563_v19  ;;  %v8635_v19 = vld [vmem:[#allocation7 + $0xbe0] ss:$16 sps:$4 sm:$0xff]  }
 0x38f   : > { %6161 = vmatpush1.bf16.msra.mxu1 %v8566_v20  ;;  %5904 = vmatprep.subr.bf16.mxu0 %v8571_v21  ;;  %v8638_v20 = vld [vmem:[#allocation7 + $0xbe8] ss:$16 sps:$4 sm:$0xff]   ;;  %v7794_v21 = vpack.c.bf16 %v6242_v8, %v6241_v17  ;;  %v6233_v8 = vld [vmem:[%s9729_s3 + $0x40] sm:$0xff] }
 0x390   : > { %6162 = vmatprep.subr.bf16.mxu1 %v8574_v22  ;;  %v6225_v22 = vld [vmem:[%s9729_s3] sm:$0xff]  ;;  %v6282_v17 = vld [vmem:[%s9729_s3 + $0x1c8] sm:$0xff] }
 0x392   : > { %5905 = vmatpush1.bf16.msra.mxu0 %v8569_v42  ;;  %v6226_v42 = vld [vmem:[%s9729_s3 + $0x8] sm:$0xff] }
 0x393   : > { %6163 = vmatpush1.bf16.msra.mxu1 %v8572_v48  ;;  %5906 = vmatprep.subr.bf16.mxu0 %v8577_v26  ;;  %v6257_v48 = vld [vmem:[%s9729_s3 + $0x100] sm:$0xff]  ;;  %v7826_v26 = vpack.c.bf16 %v6274_v18, %v6273_v52  ;;  %v6234_v52 = vld [vmem:[%s9729_s3 + $0x48] sm:$0xff] }
 0x394   : > { %6164 = vmatprep.subr.bf16.mxu1 %v8580_v27  ;;  %v6258_v27 = vld [vmem:[%s9729_s3 + $0x108] sm:$0xff] }
 0x396   : > { %5907 = vmatpush1.bf16.msra.mxu0 %v8575_v28  ;;  %v6243_v28 = vld [vmem:[%s9729_s3 + $0x90] sm:$0xff] }
 0x397   : > { %6165 = vmatpush1.bf16.msra.mxu1 %v8578_v31  ;;  %5908 = vmatprep.subr.bf16.mxu0 %v8583_v33  ;;  %v6244_v31 = vld [vmem:[%s9729_s3 + $0x98] sm:$0xff]  ;;  %v6275_v33 = vld [vmem:[%s9729_s3 + $0x190] sm:$0xff] }
 0x398   : > { %6166 = vmatprep.subr.bf16.mxu1 %v8586_v35  ;;  %v6276_v35 = vld [vmem:[%s9729_s3 + $0x198] sm:$0xff] }
 0x39a   : > { %5909 = vmatpush1.bf16.msra.mxu0 %v8581_v36  ;;  %v7796_v36 = vpack.c.bf16 %v6226_v42, %v6225_v22  ;;  %v6251_v42 = vld [vmem:[%s9729_s3 + $0xd0] sm:$0xff] }
 0x39b   : > { %6167 = vmatpush1.bf16.msra.mxu1 %v8584_v24  ;;  %5910 = vmatprep.subr.bf16.mxu0 %v8589_v29  ;;  %v7828_v24 = vpack.c.bf16 %v6258_v27, %v6257_v48  ;;  %v7798_v29 = vpack.c.bf16 %v6244_v31, %v6243_v28  ;;  %v6252_v48 = vld [vmem:[%s9729_s3 + $0xd8] sm:$0xff]  ;;  %v6235_v31 = vld [vmem:[%s9729_s3 + $0x50] sm:$0xff] }
 0x39c   : > { %6168 = vmatprep.subr.bf16.mxu1 %v8592_v61  ;;  %v6227_v61 = vld [vmem:[%s9729_s3 + $0x10] sm:$0xff]  ;;  %v7814_v27 = vpack.c.bf16 %v6252_v48, %v6251_v42  ;;  %v6284_v28 = vld [vmem:[%s9729_s3 + $0x1d8] sm:$0xff] }
 0x39e   : > { %5911 = vmatpush1.bf16.msra.mxu0 %v8587_v6  ;;  %v6228_v6 = vld [vmem:[%s9729_s3 + $0x18] sm:$0xff] }
 0x39f   : > { %6169 = vmatpush1.bf16.msra.mxu1 %v8590_v39  ;;  %5912 = vmatprep.subr.bf16.mxu0 %v8595_v23  ;;  %v6259_v39 = vld [vmem:[%s9729_s3 + $0x110] sm:$0xff]  ;;  %v7830_v23 = vpack.c.bf16 %v6276_v35, %v6275_v33  ;;  %v6236_v33 = vld [vmem:[%s9729_s3 + $0x58] sm:$0xff] }
 0x3a0   : > { %6170 = vmatprep.subr.bf16.mxu1 %v8598_v41  ;;  %v6260_v41 = vld [vmem:[%s9729_s3 + $0x118] sm:$0xff] }
 0x3a2   : > { %5913 = vmatpush1.bf16.msra.mxu0 %v8593_v60  ;;  %v6245_v60 = vld [vmem:[%s9729_s3 + $0xa0] sm:$0xff] }
 0x3a3   : > { %6171 = vmatpush1.bf16.msra.mxu1 %v8596_v43  ;;  %5914 = vmatprep.subr.bf16.mxu0 %v8601_v40  ;;  %v6246_v43 = vld [vmem:[%s9729_s3 + $0xa8] sm:$0xff]  ;;  %v6277_v40 = vld [vmem:[%s9729_s3 + $0x1a0] sm:$0xff] }
 0x3a4   : > { %6172 = vmatprep.subr.bf16.mxu1 %v8604_v44  ;;  %v6278_v44 = vld [vmem:[%s9729_s3 + $0x1a8] sm:$0xff] }
 0x3a6   : > { %5915 = vmatpush1.bf16.msra.mxu0 %v8599_v45  ;;  %v7800_v45 = vpack.c.bf16 %v6228_v6, %v6227_v61  ;;  %v6253_v6 = vld [vmem:[%s9729_s3 + $0xe0] sm:$0xff] }
 0x3a7   : > { %6173 = vmatpush1.bf16.msra.mxu1 %v8602_v46  ;;  %5916 = vmatprep.subr.bf16.mxu0 %v8607_v47  ;;  %v7832_v46 = vpack.c.bf16 %v6260_v41, %v6259_v39  ;;  %v7802_v47 = vpack.c.bf16 %v6246_v43, %v6245_v60  ;;  %v6254_v39 = vld [vmem:[%s9729_s3 + $0xe8] sm:$0xff]  ;;  %v6237_v43 = vld [vmem:[%s9729_s3 + $0x60] sm:$0xff] }
 0x3a8   : > { %6174 = vmatprep.subr.bf16.mxu1 %v8610_v32  ;;  %v6229_v32 = vld [vmem:[%s9729_s3 + $0x20] sm:$0xff]  ;;  %v7818_v41 = vpack.c.bf16 %v6254_v39, %v6253_v6  ;;  %v6286_v60 = vld [vmem:[%s9729_s3 + $0x1e8] sm:$0xff] }
 0x3aa   : > { %5917 = vmatpush1.bf16.msra.mxu0 %v8605_v51  ;;  %v6230_v51 = vld [vmem:[%s9729_s3 + $0x28] sm:$0xff] }
 0x3ab   : > { %6175 = vmatpush1.bf16.msra.mxu1 %v8608_v53  ;;  %5918 = vmatprep.subr.bf16.mxu0 %v8613_v54  ;;  %v7834_v53 = vpack.c.bf16 %v6278_v44, %v6277_v40  ;;  %v7804_v54 = vpack.c.bf16 %v6230_v51, %v6229_v32  ;;  %v6238_v40 = vld [vmem:[%s9729_s3 + $0x68] sm:$0xff]  ;;  %v6255_v32 = vld [vmem:[%s9729_s3 + $0xf0] sm:$0xff] }
 0x3ac   : > { %6176 = vmatprep.subr.bf16.mxu1 %v8616_v55 }
 0x3ae   : > { %5919 = vmatpush1.bf16.msra.mxu0 %v8611_v57  ;;  %v6247_v57 = vld [vmem:[%s9729_s3 + $0xb0] sm:$0xff] }
 0x3af   : > { %6177 = vmatpush1.bf16.msra.mxu1 %v8614_v34  ;;  %5920 = vmatprep.subr.bf16.mxu0 %v8619_v62  ;;  %v6248_v34 = vld [vmem:[%s9729_s3 + $0xb8] sm:$0xff]  ;;  %v6279_v62 = vld [vmem:[%s9729_s3 + $0x1b0] sm:$0xff] }
 0x3b0   : > { %6178 = vmatprep.subr.bf16.mxu1 %v8622_v13  ;;  %v7806_v13 = vpack.c.bf16 %v6248_v34, %v6247_v57  ;;  %v6239_v57 = vld [vmem:[%s9729_s3 + $0x70] sm:$0xff]  ;;  %v6240_v34 = vld [vmem:[%s9729_s3 + $0x78] sm:$0xff] }
 0x3b2   : > { %5921 = vmatpush1.bf16.msra.mxu0 %v8617_v1  ;;  %v6280_v1 = vld [vmem:[%s9729_s3 + $0x1b8] sm:$0xff] }
 0x3b3   : > { %6179 = vmatpush1.bf16.msra.mxu1 %v8620_v2  ;;  %5922 = vmatprep.subr.bf16.mxu0 %v8625_v4  ;;  %v7838_v2 = vpack.c.bf16 %v6280_v1, %v6279_v62  ;;  %v6231_v4 = vld [vmem:[%s9729_s3 + $0x30] sm:$0xff]  ;;  %v6272_v1 = vld [vmem:[%s9729_s3 + $0x178] sm:$0xff] }
 0x3b4   : > { %6180 = vmatprep.subr.bf16.mxu1 %v8628_v5  ;;  %v6232_v5 = vld [vmem:[%s9729_s3 + $0x38] sm:$0xff]  ;;  %v6271_v62 = vld [vmem:[%s9729_s3 + $0x170] sm:$0xff] }
 0x3b6   : > { %5923 = vmatpush1.bf16.msra.mxu0 %v8623_v9  ;;  %v6263_v9 = vld [vmem:[%s9729_s3 + $0x130] sm:$0xff] }
 0x3b7   : > { %6181 = vmatpush1.bf16.msra.mxu1 %v8626_v10  ;;  %5924 = vmatprep.subr.bf16.mxu0 %v8631_v38  ;;  %v7808_v10 = vpack.c.bf16 %v6232_v5, %v6231_v4  ;;  %v6264_v38 = vld [vmem:[%s9729_s3 + $0x138] sm:$0xff]  ;;  %v3747_v4 = vsub.s32 1, %v9289_v7  ;;  %v9614_v5 = vld [vmem:[#allocation11] sm:$0xff] }
 0x3b8   : > { %6182 = vmatprep.subr.bf16.mxu1 %v8634_v12  ;;  %v7840_v12 = vpack.c.bf16 %v6264_v38, %v6263_v9  ;;  %v9617_v38 = vld [vmem:[#allocation11 + $0x10] sm:$0xff] }
 0x3b9   : > { %v3748_v9 = vrot.slane %v9614_v5, %v3747_v4 }
 0x3ba   : > { %5925 = vmatpush1.bf16.msra.mxu0 %v8629_v30  ;;  %v6249_v30 = vld [vmem:[%s9729_s3 + $0xc0] sm:$0xff] }
 0x3bb   : > { %6183 = vmatpush1.bf16.msra.mxu1 %v8632_v15  ;;  %5926 = vmatprep.subr.bf16.mxu0 %v8637_v16  ;;  %v6250_v15 = vld [vmem:[%s9729_s3 + $0xc8] sm:$0xff]  ;;  %v6281_v16 = vld [vmem:[%s9729_s3 + $0x1c0] sm:$0xff] }
 0x3bc   : > { %6184 = vmatprep.subr.bf16.mxu1 %v8640_v14  ;;  %v7810_v14 = vpack.c.bf16 %v6250_v15, %v6249_v30  ;;  %v7842_v18 = vpack.c.bf16 %v6282_v17, %v6281_v16  ;;  %v9620_v30 = vld [vmem:[#allocation11 + $0x8] sm:$0xff]  ;;  %v9623_v17 = vld [vmem:[#allocation11 + $0x18] sm:$0xff] }
 0x3bd   : > { %v3752_v15 = vrot.slane %v9620_v30, %v3747_v4 }
 0x3be   : > { %5927 = vmatpush1.bf16.msra.mxu0 %v8635_v19  ;;  %v7812_v19 = vpack.c.bf16 %v6234_v52, %v6233_v8  ;;  %v3760_v8 = vrot.slane %v9623_v17, %v3747_v4 }
 0x3bf   : > { %6185 = vmatpush1.bf16.msra.mxu1 %v8638_v20  ;;  %7795 = vmatprep.subr.bf16.mxu0 %v7794_v21  ;;  %v6265_v20 = vld [vmem:[%s9729_s3 + $0x140] sm:$0xff]  ;;  %v6266_v21 = vld [vmem:[%s9729_s3 + $0x148] sm:$0xff] }
 0x3c0   : > { %7827 = vmatprep.subr.bf16.mxu1 %v7826_v26  ;;  %v7844_v22 = vpack.c.bf16 %v6266_v21, %v6265_v20  ;;  %v6283_v26 = vld [vmem:[%s9729_s3 + $0x1d0] sm:$0xff] }
 0x3c1   : > { %7676 = vmatmul.mubr.msk.bf16.vlgmr.msra.gmra.mrb[8].mxu0 %vm9391_vm10, %v9322_v25  ;;  %v7846_v35 = vpack.c.bf16 %v6284_v28, %v6283_v26 }
 0x3c2   : > { %7704 = vmatmul.mubr.msk.bf16.vlgmr.msra.gmra.mrb[8].mxu1 %vm9391_vm10, %v9322_v25  ;;  %7797 = vmatpush3.bf16.msra.mxu0 %v7796_v36  ;;  %v6261_v25 = vld [vmem:[%s9729_s3 + $0x120] sm:$0xff]  ;;  %v7816_v36 = vpack.c.bf16 %v6236_v33, %v6235_v31 }
 0x3c3   : > { %7829 = vmatpush3.bf16.msra.mxu1 %v7828_v24  ;;  %7799 = vmatprep.subr.bf16.mxu0 %v7798_v29  ;;  %v7836_v55 = vpack.c.bf16 %v6262_v49, %v6261_v25  ;;  %v6267_v24 = vld [vmem:[%s9729_s3 + $0x150] sm:$0xff]  ;;  %v6268_v29 = vld [vmem:[%s9729_s3 + $0x158] sm:$0xff] }
 0x3c4   : > { %7831 = vmatprep.subr.bf16.mxu1 %v7830_v23  ;;  %v7848_v61 = vpack.c.bf16 %v6268_v29, %v6267_v24  ;;  %v6285_v23 = vld [vmem:[%s9729_s3 + $0x1e0] sm:$0xff]  ;;  %v6287_v25 = vld [vmem:[%s9729_s3 + $0x1f0] sm:$0xff]  ;;  %v6288_v49 = vld [vmem:[%s9729_s3 + $0x1f8] sm:$0xff] }
 0x3c5   : > { %v7850_v44 = vpack.c.bf16 %v6286_v60, %v6285_v23 }
 0x3c6   : > { %7801 = vmatpush3.bf16.msra.mxu0 %v7800_v45  ;;  %v7820_v45 = vpack.c.bf16 %v6238_v40, %v6237_v43 }
 0x3c7   : > { %7833 = vmatpush3.bf16.msra.mxu1 %v7832_v46  ;;  %7803 = vmatprep.subr.bf16.mxu0 %v7802_v47  ;;  %v6269_v46 = vld [vmem:[%s9729_s3 + $0x160] sm:$0xff]  ;;  %v6270_v47 = vld [vmem:[%s9729_s3 + $0x168] sm:$0xff] }
 0x3c8   : > { %7835 = vmatprep.subr.bf16.mxu1 %v7834_v53  ;;  %v7852_v51 = vpack.c.bf16 %v6270_v47, %v6269_v46  ;;  %v6256_v53 = vld [vmem:[%s9729_s3 + $0xf8] sm:$0xff] }
 0x3ca   : > { %7805 = vmatpush3.bf16.msra.mxu0 %v7804_v54  ;;  %v7822_v54 = vpack.c.bf16 %v6256_v53, %v6255_v32 }
 0x3cb   : > { %7837 = vmatpush3.bf16.msra.mxu1 %v7836_v55  ;;  %7807 = vmatprep.subr.bf16.mxu0 %v7806_v13  ;;  %v7854_v55 = vpack.c.bf16 %v6288_v49, %v6287_v25  ;;  %v7824_v13 = vpack.c.bf16 %v6240_v34, %v6239_v57 }
 0x3cc   : > { %7839 = vmatprep.subr.bf16.mxu1 %v7838_v2  ;;  %v7856_v2 = vpack.c.bf16 %v6272_v1, %v6271_v62 }
 0x3ce   : > { %7809 = vmatpush3.bf16.msra.mxu0 %v7808_v10 }
 0x3cf   : > { %7841 = vmatpush3.bf16.msra.mxu1 %v7840_v12  ;;  %7811 = vmatprep.subr.bf16.mxu0 %v7810_v14  ;;  %v3756_v12 = vrot.slane %v9617_v38, %v3747_v4  ;;  %v8914_v4 = vmov 0.0  }
 0x3d0   : > { %7843 = vmatprep.subr.bf16.mxu1 %v7842_v18 }
 0x3d2   : > { %7813 = vmatpush3.bf16.msra.mxu0 %v7812_v19 }
 0x3d3   : > { %7845 = vmatpush3.bf16.msra.mxu1 %v7844_v22  ;;  %7815 = vmatprep.subr.bf16.mxu0 %v7814_v27 }
 0x3d4   : > { %7847 = vmatprep.subr.bf16.mxu1 %v7846_v35 }
 0x3d6   : > { %7817 = vmatpush3.bf16.msra.mxu0 %v7816_v36 }
 0x3d7   : > { %7849 = vmatpush3.bf16.msra.mxu1 %v7848_v61  ;;  %7819 = vmatprep.subr.bf16.mxu0 %v7818_v41 }
 0x3d8   : > { %7851 = vmatprep.subr.bf16.mxu1 %v7850_v44 }
 0x3da   : > { %7821 = vmatpush3.bf16.msra.mxu0 %v7820_v45 }
 0x3db   : > { %7853 = vmatpush3.bf16.msra.mxu1 %v7852_v51  ;;  %7823 = vmatprep.subr.bf16.mxu0 %v7822_v54 }
 0x3dc   : > { %7855 = vmatprep.subr.bf16.mxu1 %v7854_v55 }
 0x3de   : > { %7825 = vmatpush3.bf16.msra.mxu0 %v7824_v13 }
 0x3df   : > { %7857 = vmatpush3.bf16.msra.mxu1 %v7856_v2  ;;  %v6430_v2 = vld [vmem:[#allocation8] sm:$0x3]  ;;  %7789 = vmatprep.subr.mxu0 %v8914_v4 }
 0x494   : > { %v5930_v10 = vpop.f32.mrb[8].mxu0 }
 0x495   : > { %v6188_v16 = vpop.f32.mrb[8].mxu1  ;;  %v5932_v14 = vpop.f32.mrb[9].mxu0  ;;  %v9626_v19 = vadd.f32 %v5930_v10, %v3748_v9 }
 0x496   : > { %v6190_v52 = vpop.f32.mrb[9].mxu1  ;;  %v5934_v18 = vpop.f32.mrb[10].mxu0  ;;  %v9630_v42 = vadd.f32 %v6188_v16, %v3756_v12  ;;  %v9632_v48 = vadd.f32 %v5932_v14, %v3752_v15 }
 0x497   : > { %v9628_v20 = vadd.f32 %v5934_v18, %v3748_v9  ;;  %v6192_v21 = vpop.f32.mrb[10].mxu1  ;;  %v5936_v22 = vpop.f32.mrb[11].mxu0  ;;  %v9638_v31 = vadd.f32 %v6190_v52, %v3760_v8  ;;  %v6516_v18 = vld [vmem:[#allocation10 + $0x8] sm:$0xff] }
 0x498   : > { %v9634_v26 = vadd.f32 %v6192_v21, %v3756_v12  ;;  %v9636_v27 = vadd.f32 %v5936_v22, %v3752_v15  ;;  %v6194_v28 = vpop.f32.mrb[11].mxu1  ;;  %v6520_v21 = vld [vmem:[#allocation10 + $0x28] sm:$0xff]  ;;  %v6518_v22 = vld [vmem:[#allocation10 + $0x18] sm:$0xff] }
 0x499   : > { %v6197_v33 = vadd.f32 %v9628_v20, %v9626_v19  ;;  %v9642_v35 = vadd.f32 %v6194_v28, %v3760_v8  ;;  %v7858_v28 = vpack.c.bf16 %v6520_v21, %v6516_v18 }
 0x49a   : > { %v6211_v36 = vadd.f32 %v9634_v26, %v9630_v42  ;;  %v6204_v24 = vadd.f32 %v9636_v27, %v9632_v48 }
 0x49b   : > { %v6198_v29 = vrot.slane %v6197_v33, 4  ;;  %v6218_v61 = vadd.f32 %v9642_v35, %v9638_v31  ;;  %7859 = vmatprep.subr.bf16.mxu1 %v7858_v28 }
 0x49c   : > { %v6212_v6 = vrot.slane %v6211_v36, 4  ;;  %v6205_v39 = vrot.slane %v6204_v24, 4 }
 0x49d   : > { %v6199_v23 = vadd.f32 %v6198_v29, %v6197_v33  ;;  %v6219_v41 = vrot.slane %v6218_v61, 4  ;;  %v6522_v33 = vld [vmem:[#allocation10 + $0x38] sm:$0xff] }
 0x49e   : > { %v6213_v60 = vadd.f32 %v6212_v6, %v6211_v36  ;;  %v6206_v43 = vadd.f32 %v6205_v39, %v6204_v24  ;;  %v6515_v36 = vld [vmem:[#allocation10] sm:$0xff]  ;;  %v7866_v29 = vpack.c.bf16 %v6522_v33, %v6518_v22  ;;  %v6517_v6 = vld [vmem:[#allocation10 + $0x10] sm:$0xff] }
 0x49f   : > { %v6200_v40 = vrot.slane %v6199_v23, 2  ;;  %v6220_v44 = vadd.f32 %v6219_v41, %v6218_v61  ;;  %v6519_v24 = vld [vmem:[#allocation10 + $0x20] sm:$0xff]  ;;  %v6521_v39 = vld [vmem:[#allocation10 + $0x30] sm:$0xff] }
 0x4a0   : > { %v6214_v45 = vrot.slane %v6213_v60, 2  ;;  %v6207_v46 = vrot.slane %v6206_v43, 2  ;;  %v7860_v61 = vpack.c.bf16 %v6519_v24, %v6515_v36  ;;  %v7868_v41 = vpack.c.bf16 %v6521_v39, %v6517_v6 }
 0x4a1   : > { %v6201_v47 = vadd.f32 %v6200_v40, %v6199_v23  ;;  %v6221_v32 = vrot.slane %v6220_v44, 2  ;;  %v6524_v23 = vld [vmem:[#allocation10 + $0x48] sm:$0xff]  ;;  %v6530_v40 = vld [vmem:[#allocation10 + $0x78] sm:$0xff] }
 0x4a2   : > { %v6215_v51 = vadd.f32 %v6214_v45, %v6213_v60  ;;  %v6208_v53 = vadd.f32 %v6207_v46, %v6206_v43  ;;  %v6528_v60 = vld [vmem:[#allocation10 + $0x68] sm:$0xff]  ;;  %v6526_v43 = vld [vmem:[#allocation10 + $0x58] sm:$0xff]  ;;  %v6523_v46 = vld [vmem:[#allocation10 + $0x40] sm:$0xff] }
 0x4a3   : > { %v6202_v25 = vrot.slane %v6201_v47, 1  ;;  %v6222_v49 = vadd.f32 %v6221_v32, %v6220_v44  ;;  %v7862_v44 = vpack.c.bf16 %v6528_v60, %v6524_v23  ;;  %v7870_v45 = vpack.c.bf16 %v6530_v40, %v6526_v43  ;;  %v6525_v32 = vld [vmem:[#allocation10 + $0x50] sm:$0xff] }
 0x4a4   : > { %v6216_v54 = vrot.slane %v6215_v51, 1  ;;  %v6209_v55 = vrot.slane %v6208_v53, 1 }
 0x4a5   : > { %v6223_v57 = vrot.slane %v6222_v49, 1  ;;  %v6203_v13 = vadd.f32 %v6202_v25, %v6201_v47  ;;  %v6527_v47 = vld [vmem:[#allocation10 + $0x60] sm:$0xff] }
 0x4a6   : > { %v6210_v34 = vadd.f32 %v6209_v55, %v6208_v53  ;;  %v6217_v1 = vadd.f32 %v6216_v54, %v6215_v51  ;;  %v7864_v51 = vpack.c.bf16 %v6527_v47, %v6523_v46  ;;  %v6529_v53 = vld [vmem:[#allocation10 + $0x70] sm:$0xff] }
 0x4a7   : > { %v6224_v62 = vadd.f32 %v6223_v57, %v6222_v49  ;;  %v7872_v25 = vpack.c.bf16 %v6529_v53, %v6525_v32 }
 0x4a8   : > { %6353 = vmatprep.mubr.f32.mxu0 %v6210_v34 }
 0x4a9   : > { %6423 = vmatprep.mubr.f32.mxu1 %v6224_v62  ;;  %6354 = vmatmul.mubr.f32.vlgmr.msra.gmra.mrb[12].mxu0 %v6203_v13  ;;  %v3269_v13 = vsub.s32 2, %v9289_v7 }
 0x4aa   : > { %6424 = vmatmul.mubr.f32.vlgmr.msra.gmra.mrb[12].mxu1 %v6217_v1  ;;  %7791 = vmatprep.mubr.msk.f32.mxu0 %vm8915_vm12, %v8914_v4 }
 0x4ab   : > { %7790 = vmatpush3.msk.msra.mxu0 %vm6435_vm11, %v6430_v2  ;;  %6599 = vmatprep.mubr.f32.mxu1 %v8914_v4  ;;  %v3270_v1 = vrot.slane %v9614_v5, %v3269_v13  ;;  %v3278_v2 = vrot.slane %v9617_v38, %v3269_v13 }
 0x4ac   : > { %7867 = vmatprep.subr.bf16.mxu0 %v7866_v29  ;;  %7861 = vmatpush1.bf16.msra.mxu1 %v7860_v61 }
 0x4ad   : > { %7863 = vmatprep.subr.bf16.mxu1 %v7862_v44  ;;  %v3287_v7 = vadd.f32 %v3270_v1, %v9381_v37  ;;  %v3289_v5 = vadd.f32 %v3278_v2, %v9383_v63 }
 0x4b0   : > { %7865 = vmatpush1.bf16.msra.mxu1 %v7864_v51 }
 0x57c   : > { %v7749_v9 = vpop.f32.mrb[12].mxu0 }
 0x57d   : > { %v7784_v10 = vpop.f32.mrb[12].mxu1  ;;  %v7750_v12 = vpop.f32.mrb[13].mxu0 }
 0x57e   : > { %v7751_v15 = vadd.f32 %v7750_v12, %v7749_v9  ;;  %v7785_v16 = vpop.f32.mrb[13].mxu1  ;;  %v3282_v9 = vrot.slane %v9623_v17, %v3269_v13  ;;  %v3285_v12 = vadd.f32 %v3278_v2, %v9375_v50 }
 0x57f   : > { %v7786_v14 = vadd.f32 %v7785_v16, %v7784_v10  ;;  %v3283_v10 = vadd.f32 %v3270_v1, %v9373_v58 }
 0x580   : > { %v3286_v16 = vadd.f32 %v3282_v9, %v9379_v59  ;;  %v3290_v50 = vadd.f32 %v3282_v9, %v9387_v3 }
 0x581   : > { %v6426_v8 = vadd.f32 %v7786_v14, %v7751_v15 }
 0x583   : > { %v6429_v52 = vmax.f32 %v6426_v8, 0.0 }
 0x585   : > { %7792 = vmatmul.mubr.msk.f32.vlgmr.msra.gmra.mrb[14].mxu0 %vm6431_vm13, %v6429_v52 }
 0x586   : > { %6670 = vmatprep.mubr.f32.mxu0 %v8914_v4  ;;  %7869 = vmatpush1.bf16.msra.mxu0 %v7868_v41  ;;  %v3274_v4 = vrot.slane %v9620_v30, %v3269_v13 }
 0x587   : > { %7871 = vmatprep.subr.bf16.mxu0 %v7870_v45 }
 0x588   : > { %v3284_v15 = vadd.f32 %v3274_v4, %v9377_v56  ;;  %v3288_v58 = vadd.f32 %v3274_v4, %v9385_v0 }
 0x58a   : > { %7873 = vmatpush1.bf16.msra.mxu0 %v7872_v25 }
 0x658   : > { %v6505_v49 = vpop.f32.mrb[14].mxu0 }
 0x659   : > { %v7707_v54 = vmul.f32 -1.442695, %v6505_v49  ;;  %v7793_v55 = vpop.f32.mrb[15].mxu0 }
 0x65b   : > { %8641 = vpow2.f32 %v7707_v54 }
 0x665   : > { %v8642_v57 = vpop.eup %8641 }
 0x666   : > { %v6512_v34 = vadd.f32 1.0, %v8642_v57 }
 0x668   : > { %8643 = vrcp.f32 %v6512_v34 }
 0x672   : > { %v8644_v62 = vpop.eup %8643 }
 0x673   : > { %7708 = vmatmul.mubr.msk.f32.vlgmr.msra.gmra.mrb[14].mxu1 %vm6531_vm14, %v8644_v62  ;;  %7709 = vmatmul.mubr.msk.f32.vlgmr.msra.gmra.mrb[16].mxu0 %vm6531_vm14, %v8644_v62 }
 0x746   : > { %v6601_v14 = vpop.f32.mrb[14].mxu1  ;;  %v6672_v8 = vpop.f32.mrb[16].mxu0 }
 0x747   : > { %v6680_v38 = vrot.slane %v6601_v14, %v9292_v11  ;;  %v6688_v30 = vrot.slane %v6672_v8, %v9292_v11  ;;  %v6603_v17 = vpop.f32.mrb[15].mxu1  ;;  %v6674_v52 = vpop.f32.mrb[17].mxu0 }
 0x748   : > { %v6684_v56 = vrot.slane %v6603_v17, %v9292_v11  ;;  %v6692_v59 = vrot.slane %v6674_v52, %v9292_v11 }
 0x749   : > { %v6693_v18 = vmul.f32 %v9626_v19, %v6680_v38  ;;  %v6697_v37 = vmul.f32 %v9628_v20, %v6680_v38  ;;  %v6695_v63 = vmul.f32 %v9630_v42, %v6688_v30  ;;  %v6699_v21 = vmul.f32 %v9634_v26, %v6688_v30 }
 0x74a   : > { %v6694_v22 = vmul.f32 %v9632_v48, %v6684_v56  ;;  %v6698_v28 = vmul.f32 %v9636_v27, %v6684_v56  ;;  %v6696_v0 = vmul.f32 %v9638_v31, %v6692_v59  ;;  %v6700_v3 = vmul.f32 %v9642_v35, %v6692_v59 }
 0x74b   : > { %v6701_v11 = vadd.f32 %v6693_v18, %v3283_v10  ;;  %v6705_v33 = vadd.f32 %v6697_v37, %v3287_v7  ;;  %v6703_v19 = vadd.f32 %v6695_v63, %v3285_v12  ;;  %v6707_v36 = vadd.f32 %v6699_v21, %v3289_v5 }
 0x74c   : > { %v6702_v20 = vadd.f32 %v6694_v22, %v3284_v15  ;;  %v6706_v24 = vadd.f32 %v6698_v28, %v3288_v58  ;;  %v6704_v42 = vadd.f32 %v6696_v0, %v3286_v16  ;;  %v6708_v29 = vadd.f32 %v6700_v3, %v3290_v50 }
 0x74d   : > { %v6709_v26 = vmax.f32 %v6701_v11, 0.0  ;;  %v6713_v61 = vmax.f32 %v6705_v33, 0.0  ;;  %v6711_v48 = vmax.f32 %v6703_v19, 0.0  ;;  %v6715_v27 = vmax.f32 %v6707_v36, 0.0 }
 0x74e   : > { %v6710_v31 = vmax.f32 %v6702_v20, 0.0  ;;  %v6714_v35 = vmax.f32 %v6706_v24, 0.0  ;;  %v6712_v6 = vmax.f32 %v6704_v42, 0.0  ;;  %v6716_v39 = vmax.f32 %v6708_v29, 0.0 }
 0x74f   : > { %6717 = vst [vmem:[%s365_s14] sm:$0xff] %v6709_v26  ;;  %6721 = vst [vmem:[%s365_s14 + $0x20] sm:$0xff] %v6713_v61 }
 0x750   : > { %6719 = vst [vmem:[%s365_s14 + $0x10] sm:$0xff] %v6711_v48  ;;  %6723 = vst [vmem:[%s365_s14 + $0x30] sm:$0xff] %v6715_v27 }
 0x751   : > { %6718 = vst [vmem:[%s365_s14 + $0x8] sm:$0xff] %v6710_v31  ;;  %6722 = vst [vmem:[%s365_s14 + $0x28] sm:$0xff] %v6714_v35 }
 0x752   : > { %6720 = vst [vmem:[%s365_s14 + $0x18] sm:$0xff] %v6712_v6  ;;  %6724 = vst [vmem:[%s365_s14 + $0x38] sm:$0xff] %v6716_v39 }
 0x753   : > { %8834 = shalt.err (!%p8831_p8)
}
 0x754   : > { %s8835_s28 = scalar_lea.hbm %s9680_s13, 1024  ;;  %s8839_s17 = scalar_lea.hbm %s9733_s7, 2048 }
 0x755   : > { %p8836_p6 = scmp.ne.s32.totalorder %s9680_s13, %s8835_s28  ;;  %p8840_p3 = scmp.lt.u32.totalorder %s9680_s13, %s9733_s7 }
 0x756   : > { %p8841_p5 = scmp.lt.u32.totalorder %s8839_s17, %s8835_s28  ;;  %p8843_p7 = scmp.lt.u32.totalorder %s8835_s28, %s9680_s13 }
 0x757   : > { %p8837_p10 = pnand %p8836_p6, %p9768_p4 }
 0x758   : > { %p8842_p9 = por %p8841_p5, %p8840_p3 }
 0x759   : > { %p8838_p11 = pneg %p8837_p10 }
 0x75a   : > { %p8844_p12 = por %p8843_p7, %p8842_p9 }
 0x75c   : > { %p8845_p1 = pnand %p8844_p12, %p8838_p11 }
 0x75e   : > { %8848 = shalt.err (!%p8845_p1)
}
 0x75f   : > { %s8917_s15 = smov 512   ;;  %s8918_s18 = smov 32  }
 0x760   : > { %7976 = dma.vmem_to_hbm [thread:$0]  (%p9768_p4), %s9682_s10, 1024, %s9680_s13, %s6726_s30, %s8917_s15, %s8917_s15, %s8918_s18  }
 0x761 PF: > { %s6754_s19 = sand.u32 1, %s8887_s24   ;;  %p9769_p13 = scmp.ne.s32.totalorder %s9749_s29, 0 }
 0x762   : > { %p9770_p0 = scmp.ge.s32.totalorder %s8899_s27, 2  ;;  %s6755_s23 = scalar_lea.sflag [#allocation4], %s6754_s19 }
 0x764   : > { %p7999_p2 = pnand %p9770_p0, %p9769_p13 }
 0x766   : > { %8882 = dma.done.wait (!%p7999_p2), %s6755_s23, 1024  }
 0x767   : > { %8884 = vsyncadd (!%p7999_p2), %s6755_s23, 4294966272  ;;  %p23_p8 = scmp.ge.s32.totalorder %s9123_s11, 4   ;;  %s9771_s24 = smov %s8891_s25 }
 0x768   : > { %s9772_s25 = smov %s8895_s26  ;;  %s9773_s26 = smov %s9135_s21 }
 0x769   : > { %s9774_s27 = smov %s9123_s11  ;;  %25 = sbr.rel (!%p23_p8) target bundleno = 10 (0xa), region = 113 }
 0x770   :  { %6760 = vsyncpa [#allocation3], 1 }
 0x771   :  { %6762 = vsyncpa [#allocation3 + $0x1], 1 }
 0x772   :  { %6763 = vsyncpa [#allocation6], 1 }
 0x773   :  { %6764 = vsyncpa [#allocation9], 1 }
 0x774   :  { %6765 = vsyncpa [#allocation12], 1 }
 0x775   :  { %6766 = vsyncpa [#allocation4], 1 }
 0x776   :  { %6768 = vsyncpa [#allocation4 + $0x1], 1 }

</bundles_post_ra>
